<compile_context>
chip_gen: v7x
topology: tpu7x:2x2x1
jax: 0.10.0
libtpu: 0.0.40
codegen_flags: <defaults>
</compile_context>

<pallas_src>
import math
import functools

import jax
import jax.numpy as jnp
from jax.experimental import pallas as pl
from jax.experimental.pallas import tpu as pltpu


# ----------------------------- in-kernel helpers -----------------------------

def _layer_norm(x, g, b, eps=1e-5):
    mu = jnp.mean(x, axis=-1, keepdims=True)
    xc = x - mu
    var = jnp.mean(xc * xc, axis=-1, keepdims=True)
    return xc * jax.lax.rsqrt(var + eps) * g + b


def _gelu_exact(x):
    # nn.GELU() default = exact erf-based GELU
    return 0.5 * x * (1.0 + jax.lax.erf(x * (1.0 / math.sqrt(2.0))))


# --------------------------------- fused kernel -------------------------------

def fused_forward_kernel(n_heads, n_layers,
                         x_ref, pe_ref, wtok_ref,
                         wqkv_ref, bqkv_ref, wo_ref, bo_ref,
                         wc1_ref, bc1_ref, wc2_ref, bc2_ref,
                         wg_ref, bg_ref,
                         n1g_ref, n1b_ref, n2g_ref, n2b_ref,
                         lng_ref, lnb_ref,
                         wp_ref, bp_ref,
                         o_ref):
    f32 = jnp.float32
    bf16 = jnp.bfloat16

    x = x_ref[...].astype(f32)                               # (T, E) - one batch element
    T, E = x.shape

    # ----- instance norm over time (per batch), unbiased=False -----------------
    mean = jnp.mean(x, axis=0, keepdims=True)                # (1, E)
    xc = x - mean
    var = jnp.mean(xc * xc, axis=0, keepdims=True)
    inv_std = jax.lax.rsqrt(var + 1e-5)                      # rsqrt -> EUP; sqrt only later
    xn = xc * inv_std

    # ----- DataEmbedding: circular TokenEmbedding conv (k=3, no bias) + PE -----
    xnm1 = pltpu.roll(xn, 1, axis=0)                         # x[(t-1) mod T]
    xnp1 = pltpu.roll(xn, T - 1, axis=0)                     # x[(t+1) mod T]
    emb_in = jnp.concatenate([xnm1, xn, xnp1], axis=-1).astype(bf16)   # (T, 3E)
    enc = (jnp.dot(emb_in, wtok_ref[...], preferred_element_type=f32)
           + pe_ref[...])                                    # (T, C)

    C = enc.shape[-1]
    Dh = C // n_heads
    scale = 1.0 / math.sqrt(Dh)

    # structural constants, generated in-kernel (per-batch block => (T,T)/(T,C))
    row = jax.lax.broadcasted_iota(jnp.int32, (T, T), 0)
    col = jax.lax.broadcasted_iota(jnp.int32, (T, T), 1)
    amask = jnp.where(col <= row, 0.0, -1e9).astype(f32)     # causal additive mask
    t_idx = jax.lax.broadcasted_iota(jnp.int32, (T, C), 0)
    s1 = (t_idx >= 1).astype(f32)                            # zero rows that would leak x[-1]
    s2 = (t_idx >= 2).astype(f32)                            # zero rows that would leak x[-2:]

    lng = lng_ref[...]
    lnb = lnb_ref[...]

    for l in range(n_layers):                                # e_layers small -> unrolled
        xin = enc

        # ----- causal MHA: fused QKV matmul, concat heads, single out-proj -----
        qkv = (jnp.dot(xin.astype(bf16), wqkv_ref[l], preferred_element_type=f32)
               + bqkv_ref[l])                                # (T, 3C)
        q = qkv[:, 0:C] * scale
        kT = jnp.transpose(qkv[:, C:2 * C])                  # (C, T): one transpose / layer
        v = qkv[:, 2 * C:3 * C].astype(bf16)

        heads = []
        for h in range(n_heads):
            sl = slice(h * Dh, (h + 1) * Dh)
            s = (jnp.dot(q[:, sl].astype(bf16), kT[sl, :].astype(bf16),
                         preferred_element_type=f32)
                 + amask)                                    # (T, T)
            s = s - jnp.max(s, axis=-1, keepdims=True)
            p = jnp.exp(s)
            p = p * pl.reciprocal(jnp.sum(p, axis=-1, keepdims=True), approx=True)
            heads.append(jnp.dot(p.astype(bf16), v[:, sl],
                                 preferred_element_type=f32))          # (T, Dh)
        attn_cat = jnp.concatenate(heads, axis=-1)            # (T, C)
        attn_out = (jnp.dot(attn_cat.astype(bf16), wo_ref[l],
                            preferred_element_type=f32) + bo_ref[l])
        # dropout -> identity (eval mode)

        x1 = _layer_norm(xin + attn_out, n1g_ref[l], n1b_ref[l])

        # ----- causal conv: Conv1d(C->F,k=3,pad=2) -> GELU -> Conv1d(F->C,k=1),
        #       truncated so out[t] sees x1[t-2], x1[t-1], x1[t] (zeros for t<0).
        #       All 3 taps fused into one K=3C matmul.
        xs1 = pltpu.roll(x1, 1, axis=0) * s1
        xs2 = pltpu.roll(x1, 2, axis=0) * s2
        conv_in = jnp.concatenate([xs2, xs1, x1], axis=-1).astype(bf16)  # (T, 3C)
        hmid = (jnp.dot(conv_in, wc1_ref[l], preferred_element_type=f32)
                + bc1_ref[l])
        hmid = _gelu_exact(hmid)
        conv_out = (jnp.dot(hmid.astype(bf16), wc2_ref[l],
                            preferred_element_type=f32) + bc2_ref[l])

        # ----- gated fusion: single matmul against stacked (2C, C) gate weight -----
        gate_in = jnp.concatenate([x1, conv_out], axis=-1).astype(bf16)  # (T, 2C)
        g = jax.nn.sigmoid(jnp.dot(gate_in, wg_ref[l], preferred_element_type=f32)
                           + bg_ref[l])
        fused = g * x1 + (1.0 - g) * conv_out

        out = _layer_norm(xin + fused, n2g_ref[l], n2b_ref[l])   # residual = block input
        enc = _layer_norm(out, lng, lnb)   # shared model LayerNorm, applied after every
                                           # block (matches the PyTorch loop)

    # ----- projection head + de-normalization (mean/std never leave VMEM) -----
    y = (jnp.dot(enc.astype(bf16), wp_ref[...], preferred_element_type=f32)
         + bp_ref[...])
    std = jnp.sqrt(var + 1e-5)             # the single sqrt of the whole kernel
    o_ref[...] = (y * std + mean).astype(o_ref.dtype)


# ------------------------------ pallas wrapper --------------------------------

def streamdad_forward(x_enc, params, cfg):
    """Model.forward(task_name='anomaly_detection'), one fused pallas_call, grid over B."""
    assert cfg["pred_len"] == 0, "adapt_conv path not exercised (pred_len=0)"
    # TODO(synk): adapt_conv (Conv1d over the time axis) is only active when
    # seq_len != total_len (pred_len != 0); anomaly detection uses pred_len == 0.
    B, T, E = x_enc.shape
    C = cfg["d_model"]
    c_out = cfg["c_out"]
    H = cfg["n_heads"]
    L = cfg["e_layers"]
    assert c_out == E, "de-normalization broadcast requires c_out == enc_in"
    assert C % H == 0

    def wspec(a):
        nd = a.ndim
        return pl.BlockSpec(a.shape, lambda b: (0,) * nd)

    weights = [
        params["pe"], params["tok_w"],
        params["wqkv"], params["bqkv"], params["wo"], params["bo"],
        params["wc1"], params["bc1"], params["wc2"], params["bc2"],
        params["wg"], params["bg"],
        params["n1g"], params["n1b"], params["n2g"], params["n2b"],
        params["ln_g"], params["ln_b"],
        params["proj_w"], params["proj_b"],
    ]

    grid_spec = pltpu.PrefetchScalarGridSpec(
        num_scalar_prefetch=0,
        grid=(B,),
        in_specs=[pl.BlockSpec((None, T, E), lambda b: (b, 0, 0))]
                 + [wspec(w) for w in weights],
        out_specs=pl.BlockSpec((None, T, c_out), lambda b: (b, 0, 0)),
    )

    out = pl.pallas_call(
        functools.partial(fused_forward_kernel, H, L),
        out_shape=jax.ShapeDtypeStruct((B, T, c_out), jnp.float32),
        grid_spec=grid_spec,
        compiler_params=pltpu.CompilerParams(
            dimension_semantics=("parallel",)),
    )(x_enc.astype(jnp.float32), *weights)
    return out


# ------------------------------ parameter setup -------------------------------

def positional_embedding(T, d_model):
    pos = jnp.arange(T, dtype=jnp.float32)[:, None]
    div = jnp.exp(jnp.arange(0, d_model, 2, dtype=jnp.float32)
                  * (-math.log(10000.0) / d_model))
    pe = jnp.zeros((T, d_model), jnp.float32)
    pe = pe.at[:, 0::2].set(jnp.sin(pos * div))
    pe = pe.at[:, 1::2].set(jnp.cos(pos * div))
    return pe


def init_params(key, cfg):
    E, C, F = cfg["enc_in"], cfg["d_model"], cfg["d_ff"]
    T = cfg["seq_len"] + cfg["pred_len"]
    c_out = cfg["c_out"]
    L = cfg["e_layers"]
    f32, bf16 = jnp.float32, jnp.bfloat16

    def nrm(k, shape, dtype, scale=0.05):
        return (scale * jax.random.normal(k, shape, f32)).astype(dtype)

    keys = iter(jax.random.split(key, 24))
    params = {
        # TokenEmbedding Conv1d(E->C,k=3,circular,no bias), stacked as (3E, C):
        # rows [0:E] -> tap x[t-1], [E:2E] -> x[t], [2E:3E] -> x[t+1].
        "tok_w": nrm(next(keys), (3 * E, C), bf16),
        "pe": positional_embedding(T, C),                    # (T, C) f32
        "ln_g": jnp.ones((1, C), f32),
        "ln_b": jnp.zeros((1, C), f32),
        "proj_w": nrm(next(keys), (C, c_out), bf16),         # Linear(d_model, c_out).weight.T
        "proj_b": nrm(next(keys), (1, c_out), f32),
        # per-layer weights, stacked along a leading L dimension
        # fused in-proj: lanes [0:C]=Q, [C:2C]=K, [2C:3C]=V (in_proj_weight.T blocks)
        "wqkv": nrm(next(keys), (L, C, 3 * C), bf16),
        "bqkv": nrm(next(keys), (L, 1, 3 * C), f32),
        "wo": nrm(next(keys), (L, C, C), bf16),              # out_proj.weight.T
        "bo": nrm(next(keys), (L, 1, C), f32),
        # Conv1d(C->F,k=3) stacked as (3C, F): rows [0:C]->x[t-2], [C:2C]->x[t-1], [2C:3C]->x[t]
        "wc1": nrm(next(keys), (L, 3 * C, F), bf16),
        "bc1": nrm(next(keys), (L, 1, F), f32),
        "wc2": nrm(next(keys), (L, F, C), bf16),             # Conv1d(F->C,k=1) weight as (F, C)
        "bc2": nrm(next(keys), (L, 1, C), f32),
        # gate Linear(2C->C).weight.T stacked: rows [0:C] multiply x1, [C:2C] multiply conv_out
        "wg": nrm(next(keys), (L, 2 * C, C), bf16),
        "bg": nrm(next(keys), (L, 1, C), f32),
        "n1g": jnp.ones((L, 1, C), f32),
        "n1b": jnp.zeros((L, 1, C), f32),
        "n2g": jnp.ones((L, 1, C), f32),
        "n2b": jnp.zeros((L, 1, C), f32),
    }
    return params


# ----------------------------------- main --------------------------------------

if __name__ == "__main__":
    cfg = dict(
        task_name="anomaly_detection",
        seq_len=16, pred_len=0,
        enc_in=4, c_out=4,
        d_model=32, d_ff=64,
        n_heads=4, e_layers=2,
        dropout=0.1,           # identity at inference
        kernel_size=3,
    )

    key = jax.random.PRNGKey(0)
    kp, kx = jax.random.split(key)
    params = init_params(kp, cfg)

    B = 2
    x_enc = jax.random.normal(kx, (B, cfg["seq_len"], cfg["enc_in"]), jnp.float32)

    fwd = jax.jit(lambda x, p: streamdad_forward(x, p, cfg))
    out = jax.block_until_ready(fwd(x_enc, params))

    assert out.shape == (B, cfg["seq_len"] + cfg["pred_len"], cfg["c_out"]), out.shape
    assert bool(jnp.all(jnp.isfinite(out)))
    print("KERNEL_OK")
</pallas_src>

<mosaic_0001>
module attributes {stable_mosaic.version = 11 : i64} {
  func.func @fused_forward_kernel(%arg0: i32, %arg1: memref<1x16x4xf32, #tpu.memory_space<vmem>>, %arg2: memref<16x32xf32, #tpu.memory_space<vmem>>, %arg3: memref<12x32xbf16, #tpu.memory_space<vmem>>, %arg4: memref<2x32x96xbf16, #tpu.memory_space<vmem>>, %arg5: memref<2x1x96xf32, #tpu.memory_space<vmem>>, %arg6: memref<2x32x32xbf16, #tpu.memory_space<vmem>>, %arg7: memref<2x1x32xf32, #tpu.memory_space<vmem>>, %arg8: memref<2x96x64xbf16, #tpu.memory_space<vmem>>, %arg9: memref<2x1x64xf32, #tpu.memory_space<vmem>>, %arg10: memref<2x64x32xbf16, #tpu.memory_space<vmem>>, %arg11: memref<2x1x32xf32, #tpu.memory_space<vmem>>, %arg12: memref<2x64x32xbf16, #tpu.memory_space<vmem>>, %arg13: memref<2x1x32xf32, #tpu.memory_space<vmem>>, %arg14: memref<2x1x32xf32, #tpu.memory_space<vmem>>, %arg15: memref<2x1x32xf32, #tpu.memory_space<vmem>>, %arg16: memref<2x1x32xf32, #tpu.memory_space<vmem>>, %arg17: memref<2x1x32xf32, #tpu.memory_space<vmem>>, %arg18: memref<1x32xf32, #tpu.memory_space<vmem>>, %arg19: memref<1x32xf32, #tpu.memory_space<vmem>>, %arg20: memref<32x4xbf16, #tpu.memory_space<vmem>>, %arg21: memref<1x4xf32, #tpu.memory_space<vmem>>, %arg22: memref<1x16x4xf32, #tpu.memory_space<vmem>>) attributes {dimension_semantics = [#tpu.dimension_semantics<parallel>], iteration_bounds = array<i64: 2>, scalar_prefetch = 0 : i64, scratch_operands = 0 : i64, tpu.core_type = #tpu.core_type<tc>, window_params = [{transform_indices = @transform_0, window_bounds = array<i64: 1, 16, 4>}, {pipeline_mode = #tpu.pipeline_mode<synchronous>, transform_indices = @transform_1, window_bounds = array<i64: 16, 32>}, {pipeline_mode = #tpu.pipeline_mode<synchronous>, transform_indices = @transform_2, window_bounds = array<i64: 12, 32>}, {pipeline_mode = #tpu.pipeline_mode<synchronous>, transform_indices = @transform_3, window_bounds = array<i64: 2, 32, 96>}, {pipeline_mode = #tpu.pipeline_mode<synchronous>, transform_indices = @transform_4, window_bounds = array<i64: 2, 1, 96>}, {pipeline_mode = #tpu.pipeline_mode<synchronous>, transform_indices = @transform_5, window_bounds = array<i64: 2, 32, 32>}, {pipeline_mode = #tpu.pipeline_mode<synchronous>, transform_indices = @transform_6, window_bounds = array<i64: 2, 1, 32>}, {pipeline_mode = #tpu.pipeline_mode<synchronous>, transform_indices = @transform_7, window_bounds = array<i64: 2, 96, 64>}, {pipeline_mode = #tpu.pipeline_mode<synchronous>, transform_indices = @transform_8, window_bounds = array<i64: 2, 1, 64>}, {pipeline_mode = #tpu.pipeline_mode<synchronous>, transform_indices = @transform_9, window_bounds = array<i64: 2, 64, 32>}, {pipeline_mode = #tpu.pipeline_mode<synchronous>, transform_indices = @transform_10, window_bounds = array<i64: 2, 1, 32>}, {pipeline_mode = #tpu.pipeline_mode<synchronous>, transform_indices = @transform_11, window_bounds = array<i64: 2, 64, 32>}, {pipeline_mode = #tpu.pipeline_mode<synchronous>, transform_indices = @transform_12, window_bounds = array<i64: 2, 1, 32>}, {pipeline_mode = #tpu.pipeline_mode<synchronous>, transform_indices = @transform_13, window_bounds = array<i64: 2, 1, 32>}, {pipeline_mode = #tpu.pipeline_mode<synchronous>, transform_indices = @transform_14, window_bounds = array<i64: 2, 1, 32>}, {pipeline_mode = #tpu.pipeline_mode<synchronous>, transform_indices = @transform_15, window_bounds = array<i64: 2, 1, 32>}, {pipeline_mode = #tpu.pipeline_mode<synchronous>, transform_indices = @transform_16, window_bounds = array<i64: 2, 1, 32>}, {pipeline_mode = #tpu.pipeline_mode<synchronous>, transform_indices = @transform_17, window_bounds = array<i64: 1, 32>}, {pipeline_mode = #tpu.pipeline_mode<synchronous>, transform_indices = @transform_18, window_bounds = array<i64: 1, 32>}, {pipeline_mode = #tpu.pipeline_mode<synchronous>, transform_indices = @transform_19, window_bounds = array<i64: 32, 4>}, {pipeline_mode = #tpu.pipeline_mode<synchronous>, transform_indices = @transform_20, window_bounds = array<i64: 1, 4>}, {transform_indices = @transform_21, window_bounds = array<i64: 1, 16, 4>}]} {
    %c0 = arith.constant 0 : index
    %c0_0 = arith.constant 0 : index
    %c0_1 = arith.constant 0 : index
    %0 = vector.load %arg1[%c0, %c0_0, %c0_1] : memref<1x16x4xf32, #tpu.memory_space<vmem>>, vector<1x16x4xf32>
    %1 = vector.shape_cast %0 : vector<1x16x4xf32> to vector<16x4xf32>
    %cst = arith.constant dense<0.000000e+00> : vector<4xf32>
    %2 = vector.multi_reduction <add>, %1, %cst [0] : vector<16x4xf32> to vector<4xf32>
    %3 = vector.shape_cast %2 : vector<4xf32> to vector<1x4xf32>
    %cst_2 = arith.constant 1.600000e+01 : f32
    %4 = vector.broadcast %cst_2 : f32 to vector<1x4xf32>
    %5 = arith.divf %3, %4 : vector<1x4xf32>
    %6 = vector.broadcast %5 : vector<1x4xf32> to vector<16x4xf32>
    %7 = arith.subf %1, %6 : vector<16x4xf32>
    %8 = arith.mulf %7, %7 : vector<16x4xf32>
    %cst_3 = arith.constant dense<0.000000e+00> : vector<4xf32>
    %9 = vector.multi_reduction <add>, %8, %cst_3 [0] : vector<16x4xf32> to vector<4xf32>
    %10 = vector.shape_cast %9 : vector<4xf32> to vector<1x4xf32>
    %cst_4 = arith.constant 1.600000e+01 : f32
    %11 = vector.broadcast %cst_4 : f32 to vector<1x4xf32>
    %12 = arith.divf %10, %11 : vector<1x4xf32>
    %cst_5 = arith.constant 9.99999974E-6 : f32
    %13 = vector.broadcast %cst_5 : f32 to vector<1x4xf32>
    %14 = arith.addf %12, %13 : vector<1x4xf32>
    %15 = math.rsqrt %14 : vector<1x4xf32>
    %16 = vector.broadcast %15 : vector<1x4xf32> to vector<16x4xf32>
    %17 = arith.mulf %7, %16 : vector<16x4xf32>
    %c1_i32 = arith.constant 1 : i32
    %18 = tpu.dynamic_rotate %17 by %c1_i32 dim 0 : vector<16x4xf32>, i32 -> vector<16x4xf32>
    %c15_i32 = arith.constant 15 : i32
    %19 = tpu.dynamic_rotate %17 by %c15_i32 dim 0 : vector<16x4xf32>, i32 -> vector<16x4xf32>
    %20 = tpu.concatenate %18, %17, %19 in 1 : vector<16x4xf32>, vector<16x4xf32>, vector<16x4xf32> -> vector<16x12xf32>
    %21 = arith.truncf %20 : vector<16x12xf32> to vector<16x12xbf16>
    %c0_6 = arith.constant 0 : index
    %c0_7 = arith.constant 0 : index
    %22 = vector.load %arg3[%c0_6, %c0_7] : memref<12x32xbf16, #tpu.memory_space<vmem>>, vector<12x32xbf16>
    %cst_8 = arith.constant dense<0.000000e+00> : vector<16x32xf32>
    %23 = tpu.matmul %21, %22, %cst_8 {dimension_numbers = #tpu.dot_dimension_numbers<[1], [0], [0], [1], [0, 0, 1, 1], [], []>} : vector<16x12xbf16>, vector<12x32xbf16>, vector<16x32xf32> -> vector<16x32xf32>
    %c0_9 = arith.constant 0 : index
    %c0_10 = arith.constant 0 : index
    %24 = vector.load %arg2[%c0_9, %c0_10] : memref<16x32xf32, #tpu.memory_space<vmem>>, vector<16x32xf32>
    %25 = arith.addf %23, %24 : vector<16x32xf32>
    %26 = tpu.iota {dimensions = array<i32: 0>} : vector<16x16xi32>
    %27 = tpu.iota {dimensions = array<i32: 1>} : vector<16x16xi32>
    %28 = arith.cmpi sle, %27, %26 : vector<16x16xi32>
    %cst_11 = arith.constant 0.000000e+00 : f32
    %cst_12 = arith.constant -1.000000e+09 : f32
    %29 = vector.broadcast %cst_11 : f32 to vector<16x16xf32>
    %30 = vector.broadcast %cst_12 : f32 to vector<16x16xf32>
    %31 = arith.select %28, %29, %30 : vector<16x16xi1>, vector<16x16xf32>
    %32 = tpu.iota {dimensions = array<i32: 0>} : vector<16x32xi32>
    %c1_i32_13 = arith.constant 1 : i32
    %33 = vector.broadcast %c1_i32_13 : i32 to vector<16x32xi32>
    %34 = arith.cmpi sge, %32, %33 : vector<16x32xi32>
    %35 = arith.extui %34 : vector<16x32xi1> to vector<16x32xi32>
    %36 = arith.sitofp %35 : vector<16x32xi32> to vector<16x32xf32>
    %c2_i32 = arith.constant 2 : i32
    %37 = vector.broadcast %c2_i32 : i32 to vector<16x32xi32>
    %38 = arith.cmpi sge, %32, %37 : vector<16x32xi32>
    %39 = arith.extui %38 : vector<16x32xi1> to vector<16x32xi32>
    %40 = arith.sitofp %39 : vector<16x32xi32> to vector<16x32xf32>
    %c0_14 = arith.constant 0 : index
    %c0_15 = arith.constant 0 : index
    %41 = vector.load %arg18[%c0_14, %c0_15] : memref<1x32xf32, #tpu.memory_space<vmem>>, vector<1x32xf32>
    %c0_16 = arith.constant 0 : index
    %c0_17 = arith.constant 0 : index
    %42 = vector.load %arg19[%c0_16, %c0_17] : memref<1x32xf32, #tpu.memory_space<vmem>>, vector<1x32xf32>
    %43 = arith.truncf %25 : vector<16x32xf32> to vector<16x32xbf16>
    %c0_18 = arith.constant 0 : index
    %c0_19 = arith.constant 0 : index
    %c0_20 = arith.constant 0 : index
    %44 = vector.load %arg4[%c0_18, %c0_19, %c0_20] : memref<2x32x96xbf16, #tpu.memory_space<vmem>>, vector<1x32x96xbf16>
    %45 = vector.shape_cast %44 : vector<1x32x96xbf16> to vector<32x96xbf16>
    %cst_21 = arith.constant dense<0.000000e+00> : vector<16x96xf32>
    %46 = tpu.matmul %43, %45, %cst_21 {dimension_numbers = #tpu.dot_dimension_numbers<[1], [0], [0], [1], [0, 0, 1, 1], [], []>} : vector<16x32xbf16>, vector<32x96xbf16>, vector<16x96xf32> -> vector<16x96xf32>
    %c0_22 = arith.constant 0 : index
    %c0_23 = arith.constant 0 : index
    %c0_24 = arith.constant 0 : index
    %47 = vector.load %arg5[%c0_22, %c0_23, %c0_24] : memref<2x1x96xf32, #tpu.memory_space<vmem>>, vector<1x1x96xf32>
    %48 = vector.shape_cast %47 : vector<1x1x96xf32> to vector<1x96xf32>
    %49 = vector.broadcast %48 : vector<1x96xf32> to vector<16x96xf32>
    %50 = arith.addf %46, %49 : vector<16x96xf32>
    %51 = vector.extract_strided_slice %50 {offsets = [0, 0], sizes = [16, 32], strides = [1, 1]} : vector<16x96xf32> to vector<16x32xf32>
    %cst_25 = arith.constant 0.353553385 : f32
    %52 = vector.broadcast %cst_25 : f32 to vector<16x32xf32>
    %53 = arith.mulf %51, %52 : vector<16x32xf32>
    %54 = vector.extract_strided_slice %50 {offsets = [0, 32], sizes = [16, 32], strides = [1, 1]} : vector<16x96xf32> to vector<16x32xf32>
    %55 = tpu.transpose %54, [1, 0] : vector<16x32xf32> -> vector<32x16xf32>
    %56 = vector.extract_strided_slice %50 {offsets = [0, 64], sizes = [16, 32], strides = [1, 1]} : vector<16x96xf32> to vector<16x32xf32>
    %57 = arith.truncf %56 : vector<16x32xf32> to vector<16x32xbf16>
    %58 = vector.extract_strided_slice %53 {offsets = [0, 0], sizes = [16, 8], strides = [1, 1]} : vector<16x32xf32> to vector<16x8xf32>
    %59 = arith.truncf %58 : vector<16x8xf32> to vector<16x8xbf16>
    %60 = vector.extract_strided_slice %55 {offsets = [0, 0], sizes = [8, 16], strides = [1, 1]} : vector<32x16xf32> to vector<8x16xf32>
    %61 = arith.truncf %60 : vector<8x16xf32> to vector<8x16xbf16>
    %cst_26 = arith.constant dense<0.000000e+00> : vector<16x16xf32>
    %62 = tpu.matmul %59, %61, %cst_26 {dimension_numbers = #tpu.dot_dimension_numbers<[1], [0], [0], [1], [0, 0, 1, 1], [], []>} : vector<16x8xbf16>, vector<8x16xbf16>, vector<16x16xf32> -> vector<16x16xf32>
    %63 = arith.addf %62, %31 : vector<16x16xf32>
    %cst_27 = arith.constant dense<0xFF800000> : vector<16xf32>
    %64 = vector.multi_reduction <maximumf>, %63, %cst_27 [1] : vector<16x16xf32> to vector<16xf32>
    %65 = vector.shape_cast %64 : vector<16xf32> to vector<16x1xf32>
    %66 = vector.broadcast %65 : vector<16x1xf32> to vector<16x16xf32>
    %67 = arith.subf %63, %66 : vector<16x16xf32>
    %68 = math.exp %67 : vector<16x16xf32>
    %cst_28 = arith.constant dense<0.000000e+00> : vector<16xf32>
    %69 = vector.multi_reduction <add>, %68, %cst_28 [1] : vector<16x16xf32> to vector<16xf32>
    %70 = vector.shape_cast %69 : vector<16xf32> to vector<16x1xf32>
    %71 = tpu.reciprocal %70 {approx = true} : vector<16x1xf32> -> vector<16x1xf32>
    %72 = vector.broadcast %71 : vector<16x1xf32> to vector<16x16xf32>
    %73 = arith.mulf %68, %72 : vector<16x16xf32>
    %74 = arith.truncf %73 : vector<16x16xf32> to vector<16x16xbf16>
    %75 = vector.extract_strided_slice %57 {offsets = [0, 0], sizes = [16, 8], strides = [1, 1]} : vector<16x32xbf16> to vector<16x8xbf16>
    %cst_29 = arith.constant dense<0.000000e+00> : vector<16x8xf32>
    %76 = tpu.matmul %74, %75, %cst_29 {dimension_numbers = #tpu.dot_dimension_numbers<[1], [0], [0], [1], [0, 0, 1, 1], [], []>} : vector<16x16xbf16>, vector<16x8xbf16>, vector<16x8xf32> -> vector<16x8xf32>
    %77 = vector.extract_strided_slice %53 {offsets = [0, 8], sizes = [16, 8], strides = [1, 1]} : vector<16x32xf32> to vector<16x8xf32>
    %78 = arith.truncf %77 : vector<16x8xf32> to vector<16x8xbf16>
    %79 = vector.extract_strided_slice %55 {offsets = [8, 0], sizes = [8, 16], strides = [1, 1]} : vector<32x16xf32> to vector<8x16xf32>
    %80 = arith.truncf %79 : vector<8x16xf32> to vector<8x16xbf16>
    %cst_30 = arith.constant dense<0.000000e+00> : vector<16x16xf32>
    %81 = tpu.matmul %78, %80, %cst_30 {dimension_numbers = #tpu.dot_dimension_numbers<[1], [0], [0], [1], [0, 0, 1, 1], [], []>} : vector<16x8xbf16>, vector<8x16xbf16>, vector<16x16xf32> -> vector<16x16xf32>
    %82 = arith.addf %81, %31 : vector<16x16xf32>
    %cst_31 = arith.constant dense<0xFF800000> : vector<16xf32>
    %83 = vector.multi_reduction <maximumf>, %82, %cst_31 [1] : vector<16x16xf32> to vector<16xf32>
    %84 = vector.shape_cast %83 : vector<16xf32> to vector<16x1xf32>
    %85 = vector.broadcast %84 : vector<16x1xf32> to vector<16x16xf32>
    %86 = arith.subf %82, %85 : vector<16x16xf32>
    %87 = math.exp %86 : vector<16x16xf32>
    %cst_32 = arith.constant dense<0.000000e+00> : vector<16xf32>
    %88 = vector.multi_reduction <add>, %87, %cst_32 [1] : vector<16x16xf32> to vector<16xf32>
    %89 = vector.shape_cast %88 : vector<16xf32> to vector<16x1xf32>
    %90 = tpu.reciprocal %89 {approx = true} : vector<16x1xf32> -> vector<16x1xf32>
    %91 = vector.broadcast %90 : vector<16x1xf32> to vector<16x16xf32>
    %92 = arith.mulf %87, %91 : vector<16x16xf32>
    %93 = arith.truncf %92 : vector<16x16xf32> to vector<16x16xbf16>
    %94 = vector.extract_strided_slice %57 {offsets = [0, 8], sizes = [16, 8], strides = [1, 1]} : vector<16x32xbf16> to vector<16x8xbf16>
    %cst_33 = arith.constant dense<0.000000e+00> : vector<16x8xf32>
    %95 = tpu.matmul %93, %94, %cst_33 {dimension_numbers = #tpu.dot_dimension_numbers<[1], [0], [0], [1], [0, 0, 1, 1], [], []>} : vector<16x16xbf16>, vector<16x8xbf16>, vector<16x8xf32> -> vector<16x8xf32>
    %96 = vector.extract_strided_slice %53 {offsets = [0, 16], sizes = [16, 8], strides = [1, 1]} : vector<16x32xf32> to vector<16x8xf32>
    %97 = arith.truncf %96 : vector<16x8xf32> to vector<16x8xbf16>
    %98 = vector.extract_strided_slice %55 {offsets = [16, 0], sizes = [8, 16], strides = [1, 1]} : vector<32x16xf32> to vector<8x16xf32>
    %99 = arith.truncf %98 : vector<8x16xf32> to vector<8x16xbf16>
    %cst_34 = arith.constant dense<0.000000e+00> : vector<16x16xf32>
    %100 = tpu.matmul %97, %99, %cst_34 {dimension_numbers = #tpu.dot_dimension_numbers<[1], [0], [0], [1], [0, 0, 1, 1], [], []>} : vector<16x8xbf16>, vector<8x16xbf16>, vector<16x16xf32> -> vector<16x16xf32>
    %101 = arith.addf %100, %31 : vector<16x16xf32>
    %cst_35 = arith.constant dense<0xFF800000> : vector<16xf32>
    %102 = vector.multi_reduction <maximumf>, %101, %cst_35 [1] : vector<16x16xf32> to vector<16xf32>
    %103 = vector.shape_cast %102 : vector<16xf32> to vector<16x1xf32>
    %104 = vector.broadcast %103 : vector<16x1xf32> to vector<16x16xf32>
    %105 = arith.subf %101, %104 : vector<16x16xf32>
    %106 = math.exp %105 : vector<16x16xf32>
    %cst_36 = arith.constant dense<0.000000e+00> : vector<16xf32>
    %107 = vector.multi_reduction <add>, %106, %cst_36 [1] : vector<16x16xf32> to vector<16xf32>
    %108 = vector.shape_cast %107 : vector<16xf32> to vector<16x1xf32>
    %109 = tpu.reciprocal %108 {approx = true} : vector<16x1xf32> -> vector<16x1xf32>
    %110 = vector.broadcast %109 : vector<16x1xf32> to vector<16x16xf32>
    %111 = arith.mulf %106, %110 : vector<16x16xf32>
    %112 = arith.truncf %111 : vector<16x16xf32> to vector<16x16xbf16>
    %113 = vector.extract_strided_slice %57 {offsets = [0, 16], sizes = [16, 8], strides = [1, 1]} : vector<16x32xbf16> to vector<16x8xbf16>
    %cst_37 = arith.constant dense<0.000000e+00> : vector<16x8xf32>
    %114 = tpu.matmul %112, %113, %cst_37 {dimension_numbers = #tpu.dot_dimension_numbers<[1], [0], [0], [1], [0, 0, 1, 1], [], []>} : vector<16x16xbf16>, vector<16x8xbf16>, vector<16x8xf32> -> vector<16x8xf32>
    %115 = vector.extract_strided_slice %53 {offsets = [0, 24], sizes = [16, 8], strides = [1, 1]} : vector<16x32xf32> to vector<16x8xf32>
    %116 = arith.truncf %115 : vector<16x8xf32> to vector<16x8xbf16>
    %117 = vector.extract_strided_slice %55 {offsets = [24, 0], sizes = [8, 16], strides = [1, 1]} : vector<32x16xf32> to vector<8x16xf32>
    %118 = arith.truncf %117 : vector<8x16xf32> to vector<8x16xbf16>
    %cst_38 = arith.constant dense<0.000000e+00> : vector<16x16xf32>
    %119 = tpu.matmul %116, %118, %cst_38 {dimension_numbers = #tpu.dot_dimension_numbers<[1], [0], [0], [1], [0, 0, 1, 1], [], []>} : vector<16x8xbf16>, vector<8x16xbf16>, vector<16x16xf32> -> vector<16x16xf32>
    %120 = arith.addf %119, %31 : vector<16x16xf32>
    %cst_39 = arith.constant dense<0xFF800000> : vector<16xf32>
    %121 = vector.multi_reduction <maximumf>, %120, %cst_39 [1] : vector<16x16xf32> to vector<16xf32>
    %122 = vector.shape_cast %121 : vector<16xf32> to vector<16x1xf32>
    %123 = vector.broadcast %122 : vector<16x1xf32> to vector<16x16xf32>
    %124 = arith.subf %120, %123 : vector<16x16xf32>
    %125 = math.exp %124 : vector<16x16xf32>
    %cst_40 = arith.constant dense<0.000000e+00> : vector<16xf32>
    %126 = vector.multi_reduction <add>, %125, %cst_40 [1] : vector<16x16xf32> to vector<16xf32>
    %127 = vector.shape_cast %126 : vector<16xf32> to vector<16x1xf32>
    %128 = tpu.reciprocal %127 {approx = true} : vector<16x1xf32> -> vector<16x1xf32>
    %129 = vector.broadcast %128 : vector<16x1xf32> to vector<16x16xf32>
    %130 = arith.mulf %125, %129 : vector<16x16xf32>
    %131 = arith.truncf %130 : vector<16x16xf32> to vector<16x16xbf16>
    %132 = vector.extract_strided_slice %57 {offsets = [0, 24], sizes = [16, 8], strides = [1, 1]} : vector<16x32xbf16> to vector<16x8xbf16>
    %cst_41 = arith.constant dense<0.000000e+00> : vector<16x8xf32>
    %133 = tpu.matmul %131, %132, %cst_41 {dimension_numbers = #tpu.dot_dimension_numbers<[1], [0], [0], [1], [0, 0, 1, 1], [], []>} : vector<16x16xbf16>, vector<16x8xbf16>, vector<16x8xf32> -> vector<16x8xf32>
    %134 = tpu.concatenate %76, %95, %114, %133 in 1 : vector<16x8xf32>, vector<16x8xf32>, vector<16x8xf32>, vector<16x8xf32> -> vector<16x32xf32>
    %135 = arith.truncf %134 : vector<16x32xf32> to vector<16x32xbf16>
    %c0_42 = arith.constant 0 : index
    %c0_43 = arith.constant 0 : index
    %c0_44 = arith.constant 0 : index
    %136 = vector.load %arg6[%c0_42, %c0_43, %c0_44] : memref<2x32x32xbf16, #tpu.memory_space<vmem>>, vector<1x32x32xbf16>
    %137 = vector.shape_cast %136 : vector<1x32x32xbf16> to vector<32x32xbf16>
    %cst_45 = arith.constant dense<0.000000e+00> : vector<16x32xf32>
    %138 = tpu.matmul %135, %137, %cst_45 {dimension_numbers = #tpu.dot_dimension_numbers<[1], [0], [0], [1], [0, 0, 1, 1], [], []>} : vector<16x32xbf16>, vector<32x32xbf16>, vector<16x32xf32> -> vector<16x32xf32>
    %c0_46 = arith.constant 0 : index
    %c0_47 = arith.constant 0 : index
    %c0_48 = arith.constant 0 : index
    %139 = vector.load %arg7[%c0_46, %c0_47, %c0_48] : memref<2x1x32xf32, #tpu.memory_space<vmem>>, vector<1x1x32xf32>
    %140 = vector.shape_cast %139 : vector<1x1x32xf32> to vector<1x32xf32>
    %141 = vector.broadcast %140 : vector<1x32xf32> to vector<16x32xf32>
    %142 = arith.addf %138, %141 : vector<16x32xf32>
    %143 = arith.addf %25, %142 : vector<16x32xf32>
    %c0_49 = arith.constant 0 : index
    %c0_50 = arith.constant 0 : index
    %c0_51 = arith.constant 0 : index
    %144 = vector.load %arg14[%c0_49, %c0_50, %c0_51] : memref<2x1x32xf32, #tpu.memory_space<vmem>>, vector<1x1x32xf32>
    %145 = vector.shape_cast %144 : vector<1x1x32xf32> to vector<1x32xf32>
    %c0_52 = arith.constant 0 : index
    %c0_53 = arith.constant 0 : index
    %c0_54 = arith.constant 0 : index
    %146 = vector.load %arg15[%c0_52, %c0_53, %c0_54] : memref<2x1x32xf32, #tpu.memory_space<vmem>>, vector<1x1x32xf32>
    %147 = vector.shape_cast %146 : vector<1x1x32xf32> to vector<1x32xf32>
    %cst_55 = arith.constant dense<0.000000e+00> : vector<16xf32>
    %148 = vector.multi_reduction <add>, %143, %cst_55 [1] : vector<16x32xf32> to vector<16xf32>
    %149 = vector.shape_cast %148 : vector<16xf32> to vector<16x1xf32>
    %cst_56 = arith.constant 3.200000e+01 : f32
    %150 = vector.broadcast %cst_56 : f32 to vector<16x1xf32>
    %151 = arith.divf %149, %150 : vector<16x1xf32>
    %152 = vector.broadcast %151 : vector<16x1xf32> to vector<16x32xf32>
    %153 = arith.subf %143, %152 : vector<16x32xf32>
    %154 = arith.mulf %153, %153 : vector<16x32xf32>
    %cst_57 = arith.constant dense<0.000000e+00> : vector<16xf32>
    %155 = vector.multi_reduction <add>, %154, %cst_57 [1] : vector<16x32xf32> to vector<16xf32>
    %156 = vector.shape_cast %155 : vector<16xf32> to vector<16x1xf32>
    %cst_58 = arith.constant 3.200000e+01 : f32
    %157 = vector.broadcast %cst_58 : f32 to vector<16x1xf32>
    %158 = arith.divf %156, %157 : vector<16x1xf32>
    %cst_59 = arith.constant 9.99999974E-6 : f32
    %159 = vector.broadcast %cst_59 : f32 to vector<16x1xf32>
    %160 = arith.addf %158, %159 : vector<16x1xf32>
    %161 = math.rsqrt %160 : vector<16x1xf32>
    %162 = vector.broadcast %161 : vector<16x1xf32> to vector<16x32xf32>
    %163 = arith.mulf %153, %162 : vector<16x32xf32>
    %164 = vector.broadcast %145 : vector<1x32xf32> to vector<16x32xf32>
    %165 = arith.mulf %163, %164 : vector<16x32xf32>
    %166 = vector.broadcast %147 : vector<1x32xf32> to vector<16x32xf32>
    %167 = arith.addf %165, %166 : vector<16x32xf32>
    %c1_i32_60 = arith.constant 1 : i32
    %168 = tpu.dynamic_rotate %167 by %c1_i32_60 dim 0 : vector<16x32xf32>, i32 -> vector<16x32xf32>
    %169 = arith.mulf %168, %36 : vector<16x32xf32>
    %c2_i32_61 = arith.constant 2 : i32
    %170 = tpu.dynamic_rotate %167 by %c2_i32_61 dim 0 : vector<16x32xf32>, i32 -> vector<16x32xf32>
    %171 = arith.mulf %170, %40 : vector<16x32xf32>
    %172 = tpu.concatenate %171, %169, %167 in 1 : vector<16x32xf32>, vector<16x32xf32>, vector<16x32xf32> -> vector<16x96xf32>
    %173 = arith.truncf %172 : vector<16x96xf32> to vector<16x96xbf16>
    %c0_62 = arith.constant 0 : index
    %c0_63 = arith.constant 0 : index
    %c0_64 = arith.constant 0 : index
    %174 = vector.load %arg8[%c0_62, %c0_63, %c0_64] : memref<2x96x64xbf16, #tpu.memory_space<vmem>>, vector<1x96x64xbf16>
    %175 = vector.shape_cast %174 : vector<1x96x64xbf16> to vector<96x64xbf16>
    %cst_65 = arith.constant dense<0.000000e+00> : vector<16x64xf32>
    %176 = tpu.matmul %173, %175, %cst_65 {dimension_numbers = #tpu.dot_dimension_numbers<[1], [0], [0], [1], [0, 0, 1, 1], [], []>} : vector<16x96xbf16>, vector<96x64xbf16>, vector<16x64xf32> -> vector<16x64xf32>
    %c0_66 = arith.constant 0 : index
    %c0_67 = arith.constant 0 : index
    %c0_68 = arith.constant 0 : index
    %177 = vector.load %arg9[%c0_66, %c0_67, %c0_68] : memref<2x1x64xf32, #tpu.memory_space<vmem>>, vector<1x1x64xf32>
    %178 = vector.shape_cast %177 : vector<1x1x64xf32> to vector<1x64xf32>
    %179 = vector.broadcast %178 : vector<1x64xf32> to vector<16x64xf32>
    %180 = arith.addf %176, %179 : vector<16x64xf32>
    %cst_69 = arith.constant 5.000000e-01 : f32
    %181 = vector.broadcast %cst_69 : f32 to vector<16x64xf32>
    %182 = arith.mulf %181, %180 : vector<16x64xf32>
    %cst_70 = arith.constant 0.707106769 : f32
    %183 = vector.broadcast %cst_70 : f32 to vector<16x64xf32>
    %184 = arith.mulf %180, %183 : vector<16x64xf32>
    %185 = math.erf %184 : vector<16x64xf32>
    %cst_71 = arith.constant 1.000000e+00 : f32
    %186 = vector.broadcast %cst_71 : f32 to vector<16x64xf32>
    %187 = arith.addf %186, %185 : vector<16x64xf32>
    %188 = arith.mulf %182, %187 : vector<16x64xf32>
    %189 = arith.truncf %188 : vector<16x64xf32> to vector<16x64xbf16>
    %c0_72 = arith.constant 0 : index
    %c0_73 = arith.constant 0 : index
    %c0_74 = arith.constant 0 : index
    %190 = vector.load %arg10[%c0_72, %c0_73, %c0_74] : memref<2x64x32xbf16, #tpu.memory_space<vmem>>, vector<1x64x32xbf16>
    %191 = vector.shape_cast %190 : vector<1x64x32xbf16> to vector<64x32xbf16>
    %cst_75 = arith.constant dense<0.000000e+00> : vector<16x32xf32>
    %192 = tpu.matmul %189, %191, %cst_75 {dimension_numbers = #tpu.dot_dimension_numbers<[1], [0], [0], [1], [0, 0, 1, 1], [], []>} : vector<16x64xbf16>, vector<64x32xbf16>, vector<16x32xf32> -> vector<16x32xf32>
    %c0_76 = arith.constant 0 : index
    %c0_77 = arith.constant 0 : index
    %c0_78 = arith.constant 0 : index
    %193 = vector.load %arg11[%c0_76, %c0_77, %c0_78] : memref<2x1x32xf32, #tpu.memory_space<vmem>>, vector<1x1x32xf32>
    %194 = vector.shape_cast %193 : vector<1x1x32xf32> to vector<1x32xf32>
    %195 = vector.broadcast %194 : vector<1x32xf32> to vector<16x32xf32>
    %196 = arith.addf %192, %195 : vector<16x32xf32>
    %197 = tpu.concatenate %167, %196 in 1 : vector<16x32xf32>, vector<16x32xf32> -> vector<16x64xf32>
    %198 = arith.truncf %197 : vector<16x64xf32> to vector<16x64xbf16>
    %c0_79 = arith.constant 0 : index
    %c0_80 = arith.constant 0 : index
    %c0_81 = arith.constant 0 : index
    %199 = vector.load %arg12[%c0_79, %c0_80, %c0_81] : memref<2x64x32xbf16, #tpu.memory_space<vmem>>, vector<1x64x32xbf16>
    %200 = vector.shape_cast %199 : vector<1x64x32xbf16> to vector<64x32xbf16>
    %cst_82 = arith.constant dense<0.000000e+00> : vector<16x32xf32>
    %201 = tpu.matmul %198, %200, %cst_82 {dimension_numbers = #tpu.dot_dimension_numbers<[1], [0], [0], [1], [0, 0, 1, 1], [], []>} : vector<16x64xbf16>, vector<64x32xbf16>, vector<16x32xf32> -> vector<16x32xf32>
    %c0_83 = arith.constant 0 : index
    %c0_84 = arith.constant 0 : index
    %c0_85 = arith.constant 0 : index
    %202 = vector.load %arg13[%c0_83, %c0_84, %c0_85] : memref<2x1x32xf32, #tpu.memory_space<vmem>>, vector<1x1x32xf32>
    %203 = vector.shape_cast %202 : vector<1x1x32xf32> to vector<1x32xf32>
    %204 = vector.broadcast %203 : vector<1x32xf32> to vector<16x32xf32>
    %205 = arith.addf %201, %204 : vector<16x32xf32>
    %206 = arith.negf %205 : vector<16x32xf32>
    %207 = math.exp %206 : vector<16x32xf32>
    %cst_86 = arith.constant 1.000000e+00 : f32
    %208 = vector.broadcast %cst_86 : f32 to vector<16x32xf32>
    %209 = arith.addf %208, %207 : vector<16x32xf32>
    %210 = arith.divf %208, %209 : vector<16x32xf32>
    %211 = arith.mulf %210, %167 : vector<16x32xf32>
    %cst_87 = arith.constant 1.000000e+00 : f32
    %212 = vector.broadcast %cst_87 : f32 to vector<16x32xf32>
    %213 = arith.subf %212, %210 : vector<16x32xf32>
    %214 = arith.mulf %213, %196 : vector<16x32xf32>
    %215 = arith.addf %211, %214 : vector<16x32xf32>
    %216 = arith.addf %25, %215 : vector<16x32xf32>
    %c0_88 = arith.constant 0 : index
    %c0_89 = arith.constant 0 : index
    %c0_90 = arith.constant 0 : index
    %217 = vector.load %arg16[%c0_88, %c0_89, %c0_90] : memref<2x1x32xf32, #tpu.memory_space<vmem>>, vector<1x1x32xf32>
    %218 = vector.shape_cast %217 : vector<1x1x32xf32> to vector<1x32xf32>
    %c0_91 = arith.constant 0 : index
    %c0_92 = arith.constant 0 : index
    %c0_93 = arith.constant 0 : index
    %219 = vector.load %arg17[%c0_91, %c0_92, %c0_93] : memref<2x1x32xf32, #tpu.memory_space<vmem>>, vector<1x1x32xf32>
    %220 = vector.shape_cast %219 : vector<1x1x32xf32> to vector<1x32xf32>
    %cst_94 = arith.constant dense<0.000000e+00> : vector<16xf32>
    %221 = vector.multi_reduction <add>, %216, %cst_94 [1] : vector<16x32xf32> to vector<16xf32>
    %222 = vector.shape_cast %221 : vector<16xf32> to vector<16x1xf32>
    %cst_95 = arith.constant 3.200000e+01 : f32
    %223 = vector.broadcast %cst_95 : f32 to vector<16x1xf32>
    %224 = arith.divf %222, %223 : vector<16x1xf32>
    %225 = vector.broadcast %224 : vector<16x1xf32> to vector<16x32xf32>
    %226 = arith.subf %216, %225 : vector<16x32xf32>
    %227 = arith.mulf %226, %226 : vector<16x32xf32>
    %cst_96 = arith.constant dense<0.000000e+00> : vector<16xf32>
    %228 = vector.multi_reduction <add>, %227, %cst_96 [1] : vector<16x32xf32> to vector<16xf32>
    %229 = vector.shape_cast %228 : vector<16xf32> to vector<16x1xf32>
    %cst_97 = arith.constant 3.200000e+01 : f32
    %230 = vector.broadcast %cst_97 : f32 to vector<16x1xf32>
    %231 = arith.divf %229, %230 : vector<16x1xf32>
    %cst_98 = arith.constant 9.99999974E-6 : f32
    %232 = vector.broadcast %cst_98 : f32 to vector<16x1xf32>
    %233 = arith.addf %231, %232 : vector<16x1xf32>
    %234 = math.rsqrt %233 : vector<16x1xf32>
    %235 = vector.broadcast %234 : vector<16x1xf32> to vector<16x32xf32>
    %236 = arith.mulf %226, %235 : vector<16x32xf32>
    %237 = vector.broadcast %218 : vector<1x32xf32> to vector<16x32xf32>
    %238 = arith.mulf %236, %237 : vector<16x32xf32>
    %239 = vector.broadcast %220 : vector<1x32xf32> to vector<16x32xf32>
    %240 = arith.addf %238, %239 : vector<16x32xf32>
    %cst_99 = arith.constant dense<0.000000e+00> : vector<16xf32>
    %241 = vector.multi_reduction <add>, %240, %cst_99 [1] : vector<16x32xf32> to vector<16xf32>
    %242 = vector.shape_cast %241 : vector<16xf32> to vector<16x1xf32>
    %cst_100 = arith.constant 3.200000e+01 : f32
    %243 = vector.broadcast %cst_100 : f32 to vector<16x1xf32>
    %244 = arith.divf %242, %243 : vector<16x1xf32>
    %245 = vector.broadcast %244 : vector<16x1xf32> to vector<16x32xf32>
    %246 = arith.subf %240, %245 : vector<16x32xf32>
    %247 = arith.mulf %246, %246 : vector<16x32xf32>
    %cst_101 = arith.constant dense<0.000000e+00> : vector<16xf32>
    %248 = vector.multi_reduction <add>, %247, %cst_101 [1] : vector<16x32xf32> to vector<16xf32>
    %249 = vector.shape_cast %248 : vector<16xf32> to vector<16x1xf32>
    %cst_102 = arith.constant 3.200000e+01 : f32
    %250 = vector.broadcast %cst_102 : f32 to vector<16x1xf32>
    %251 = arith.divf %249, %250 : vector<16x1xf32>
    %cst_103 = arith.constant 9.99999974E-6 : f32
    %252 = vector.broadcast %cst_103 : f32 to vector<16x1xf32>
    %253 = arith.addf %251, %252 : vector<16x1xf32>
    %254 = math.rsqrt %253 : vector<16x1xf32>
    %255 = vector.broadcast %254 : vector<16x1xf32> to vector<16x32xf32>
    %256 = arith.mulf %246, %255 : vector<16x32xf32>
    %257 = vector.broadcast %41 : vector<1x32xf32> to vector<16x32xf32>
    %258 = arith.mulf %256, %257 : vector<16x32xf32>
    %259 = vector.broadcast %42 : vector<1x32xf32> to vector<16x32xf32>
    %260 = arith.addf %258, %259 : vector<16x32xf32>
    %261 = arith.truncf %260 : vector<16x32xf32> to vector<16x32xbf16>
    %c1 = arith.constant 1 : index
    %c0_104 = arith.constant 0 : index
    %c0_105 = arith.constant 0 : index
    %262 = vector.load %arg4[%c1, %c0_104, %c0_105] : memref<2x32x96xbf16, #tpu.memory_space<vmem>>, vector<1x32x96xbf16>
    %263 = vector.shape_cast %262 : vector<1x32x96xbf16> to vector<32x96xbf16>
    %cst_106 = arith.constant dense<0.000000e+00> : vector<16x96xf32>
    %264 = tpu.matmul %261, %263, %cst_106 {dimension_numbers = #tpu.dot_dimension_numbers<[1], [0], [0], [1], [0, 0, 1, 1], [], []>} : vector<16x32xbf16>, vector<32x96xbf16>, vector<16x96xf32> -> vector<16x96xf32>
    %c1_107 = arith.constant 1 : index
    %c0_108 = arith.constant 0 : index
    %c0_109 = arith.constant 0 : index
    %265 = vector.load %arg5[%c1_107, %c0_108, %c0_109] : memref<2x1x96xf32, #tpu.memory_space<vmem>>, vector<1x1x96xf32>
    %266 = vector.shape_cast %265 : vector<1x1x96xf32> to vector<1x96xf32>
    %267 = vector.broadcast %266 : vector<1x96xf32> to vector<16x96xf32>
    %268 = arith.addf %264, %267 : vector<16x96xf32>
    %269 = vector.extract_strided_slice %268 {offsets = [0, 0], sizes = [16, 32], strides = [1, 1]} : vector<16x96xf32> to vector<16x32xf32>
    %cst_110 = arith.constant 0.353553385 : f32
    %270 = vector.broadcast %cst_110 : f32 to vector<16x32xf32>
    %271 = arith.mulf %269, %270 : vector<16x32xf32>
    %272 = vector.extract_strided_slice %268 {offsets = [0, 32], sizes = [16, 32], strides = [1, 1]} : vector<16x96xf32> to vector<16x32xf32>
    %273 = tpu.transpose %272, [1, 0] : vector<16x32xf32> -> vector<32x16xf32>
    %274 = vector.extract_strided_slice %268 {offsets = [0, 64], sizes = [16, 32], strides = [1, 1]} : vector<16x96xf32> to vector<16x32xf32>
    %275 = arith.truncf %274 : vector<16x32xf32> to vector<16x32xbf16>
    %276 = vector.extract_strided_slice %271 {offsets = [0, 0], sizes = [16, 8], strides = [1, 1]} : vector<16x32xf32> to vector<16x8xf32>
    %277 = arith.truncf %276 : vector<16x8xf32> to vector<16x8xbf16>
    %278 = vector.extract_strided_slice %273 {offsets = [0, 0], sizes = [8, 16], strides = [1, 1]} : vector<32x16xf32> to vector<8x16xf32>
    %279 = arith.truncf %278 : vector<8x16xf32> to vector<8x16xbf16>
    %cst_111 = arith.constant dense<0.000000e+00> : vector<16x16xf32>
    %280 = tpu.matmul %277, %279, %cst_111 {dimension_numbers = #tpu.dot_dimension_numbers<[1], [0], [0], [1], [0, 0, 1, 1], [], []>} : vector<16x8xbf16>, vector<8x16xbf16>, vector<16x16xf32> -> vector<16x16xf32>
    %281 = arith.addf %280, %31 : vector<16x16xf32>
    %cst_112 = arith.constant dense<0xFF800000> : vector<16xf32>
    %282 = vector.multi_reduction <maximumf>, %281, %cst_112 [1] : vector<16x16xf32> to vector<16xf32>
    %283 = vector.shape_cast %282 : vector<16xf32> to vector<16x1xf32>
    %284 = vector.broadcast %283 : vector<16x1xf32> to vector<16x16xf32>
    %285 = arith.subf %281, %284 : vector<16x16xf32>
    %286 = math.exp %285 : vector<16x16xf32>
    %cst_113 = arith.constant dense<0.000000e+00> : vector<16xf32>
    %287 = vector.multi_reduction <add>, %286, %cst_113 [1] : vector<16x16xf32> to vector<16xf32>
    %288 = vector.shape_cast %287 : vector<16xf32> to vector<16x1xf32>
    %289 = tpu.reciprocal %288 {approx = true} : vector<16x1xf32> -> vector<16x1xf32>
    %290 = vector.broadcast %289 : vector<16x1xf32> to vector<16x16xf32>
    %291 = arith.mulf %286, %290 : vector<16x16xf32>
    %292 = arith.truncf %291 : vector<16x16xf32> to vector<16x16xbf16>
    %293 = vector.extract_strided_slice %275 {offsets = [0, 0], sizes = [16, 8], strides = [1, 1]} : vector<16x32xbf16> to vector<16x8xbf16>
    %cst_114 = arith.constant dense<0.000000e+00> : vector<16x8xf32>
    %294 = tpu.matmul %292, %293, %cst_114 {dimension_numbers = #tpu.dot_dimension_numbers<[1], [0], [0], [1], [0, 0, 1, 1], [], []>} : vector<16x16xbf16>, vector<16x8xbf16>, vector<16x8xf32> -> vector<16x8xf32>
    %295 = vector.extract_strided_slice %271 {offsets = [0, 8], sizes = [16, 8], strides = [1, 1]} : vector<16x32xf32> to vector<16x8xf32>
    %296 = arith.truncf %295 : vector<16x8xf32> to vector<16x8xbf16>
    %297 = vector.extract_strided_slice %273 {offsets = [8, 0], sizes = [8, 16], strides = [1, 1]} : vector<32x16xf32> to vector<8x16xf32>
    %298 = arith.truncf %297 : vector<8x16xf32> to vector<8x16xbf16>
    %cst_115 = arith.constant dense<0.000000e+00> : vector<16x16xf32>
    %299 = tpu.matmul %296, %298, %cst_115 {dimension_numbers = #tpu.dot_dimension_numbers<[1], [0], [0], [1], [0, 0, 1, 1], [], []>} : vector<16x8xbf16>, vector<8x16xbf16>, vector<16x16xf32> -> vector<16x16xf32>
    %300 = arith.addf %299, %31 : vector<16x16xf32>
    %cst_116 = arith.constant dense<0xFF800000> : vector<16xf32>
    %301 = vector.multi_reduction <maximumf>, %300, %cst_116 [1] : vector<16x16xf32> to vector<16xf32>
    %302 = vector.shape_cast %301 : vector<16xf32> to vector<16x1xf32>
    %303 = vector.broadcast %302 : vector<16x1xf32> to vector<16x16xf32>
    %304 = arith.subf %300, %303 : vector<16x16xf32>
    %305 = math.exp %304 : vector<16x16xf32>
    %cst_117 = arith.constant dense<0.000000e+00> : vector<16xf32>
    %306 = vector.multi_reduction <add>, %305, %cst_117 [1] : vector<16x16xf32> to vector<16xf32>
    %307 = vector.shape_cast %306 : vector<16xf32> to vector<16x1xf32>
    %308 = tpu.reciprocal %307 {approx = true} : vector<16x1xf32> -> vector<16x1xf32>
    %309 = vector.broadcast %308 : vector<16x1xf32> to vector<16x16xf32>
    %310 = arith.mulf %305, %309 : vector<16x16xf32>
    %311 = arith.truncf %310 : vector<16x16xf32> to vector<16x16xbf16>
    %312 = vector.extract_strided_slice %275 {offsets = [0, 8], sizes = [16, 8], strides = [1, 1]} : vector<16x32xbf16> to vector<16x8xbf16>
    %cst_118 = arith.constant dense<0.000000e+00> : vector<16x8xf32>
    %313 = tpu.matmul %311, %312, %cst_118 {dimension_numbers = #tpu.dot_dimension_numbers<[1], [0], [0], [1], [0, 0, 1, 1], [], []>} : vector<16x16xbf16>, vector<16x8xbf16>, vector<16x8xf32> -> vector<16x8xf32>
    %314 = vector.extract_strided_slice %271 {offsets = [0, 16], sizes = [16, 8], strides = [1, 1]} : vector<16x32xf32> to vector<16x8xf32>
    %315 = arith.truncf %314 : vector<16x8xf32> to vector<16x8xbf16>
    %316 = vector.extract_strided_slice %273 {offsets = [16, 0], sizes = [8, 16], strides = [1, 1]} : vector<32x16xf32> to vector<8x16xf32>
    %317 = arith.truncf %316 : vector<8x16xf32> to vector<8x16xbf16>
    %cst_119 = arith.constant dense<0.000000e+00> : vector<16x16xf32>
    %318 = tpu.matmul %315, %317, %cst_119 {dimension_numbers = #tpu.dot_dimension_numbers<[1], [0], [0], [1], [0, 0, 1, 1], [], []>} : vector<16x8xbf16>, vector<8x16xbf16>, vector<16x16xf32> -> vector<16x16xf32>
    %319 = arith.addf %318, %31 : vector<16x16xf32>
    %cst_120 = arith.constant dense<0xFF800000> : vector<16xf32>
    %320 = vector.multi_reduction <maximumf>, %319, %cst_120 [1] : vector<16x16xf32> to vector<16xf32>
    %321 = vector.shape_cast %320 : vector<16xf32> to vector<16x1xf32>
    %322 = vector.broadcast %321 : vector<16x1xf32> to vector<16x16xf32>
    %323 = arith.subf %319, %322 : vector<16x16xf32>
    %324 = math.exp %323 : vector<16x16xf32>
    %cst_121 = arith.constant dense<0.000000e+00> : vector<16xf32>
    %325 = vector.multi_reduction <add>, %324, %cst_121 [1] : vector<16x16xf32> to vector<16xf32>
    %326 = vector.shape_cast %325 : vector<16xf32> to vector<16x1xf32>
    %327 = tpu.reciprocal %326 {approx = true} : vector<16x1xf32> -> vector<16x1xf32>
    %328 = vector.broadcast %327 : vector<16x1xf32> to vector<16x16xf32>
    %329 = arith.mulf %324, %328 : vector<16x16xf32>
    %330 = arith.truncf %329 : vector<16x16xf32> to vector<16x16xbf16>
    %331 = vector.extract_strided_slice %275 {offsets = [0, 16], sizes = [16, 8], strides = [1, 1]} : vector<16x32xbf16> to vector<16x8xbf16>
    %cst_122 = arith.constant dense<0.000000e+00> : vector<16x8xf32>
    %332 = tpu.matmul %330, %331, %cst_122 {dimension_numbers = #tpu.dot_dimension_numbers<[1], [0], [0], [1], [0, 0, 1, 1], [], []>} : vector<16x16xbf16>, vector<16x8xbf16>, vector<16x8xf32> -> vector<16x8xf32>
    %333 = vector.extract_strided_slice %271 {offsets = [0, 24], sizes = [16, 8], strides = [1, 1]} : vector<16x32xf32> to vector<16x8xf32>
    %334 = arith.truncf %333 : vector<16x8xf32> to vector<16x8xbf16>
    %335 = vector.extract_strided_slice %273 {offsets = [24, 0], sizes = [8, 16], strides = [1, 1]} : vector<32x16xf32> to vector<8x16xf32>
    %336 = arith.truncf %335 : vector<8x16xf32> to vector<8x16xbf16>
    %cst_123 = arith.constant dense<0.000000e+00> : vector<16x16xf32>
    %337 = tpu.matmul %334, %336, %cst_123 {dimension_numbers = #tpu.dot_dimension_numbers<[1], [0], [0], [1], [0, 0, 1, 1], [], []>} : vector<16x8xbf16>, vector<8x16xbf16>, vector<16x16xf32> -> vector<16x16xf32>
    %338 = arith.addf %337, %31 : vector<16x16xf32>
    %cst_124 = arith.constant dense<0xFF800000> : vector<16xf32>
    %339 = vector.multi_reduction <maximumf>, %338, %cst_124 [1] : vector<16x16xf32> to vector<16xf32>
    %340 = vector.shape_cast %339 : vector<16xf32> to vector<16x1xf32>
    %341 = vector.broadcast %340 : vector<16x1xf32> to vector<16x16xf32>
    %342 = arith.subf %338, %341 : vector<16x16xf32>
    %343 = math.exp %342 : vector<16x16xf32>
    %cst_125 = arith.constant dense<0.000000e+00> : vector<16xf32>
    %344 = vector.multi_reduction <add>, %343, %cst_125 [1] : vector<16x16xf32> to vector<16xf32>
    %345 = vector.shape_cast %344 : vector<16xf32> to vector<16x1xf32>
    %346 = tpu.reciprocal %345 {approx = true} : vector<16x1xf32> -> vector<16x1xf32>
    %347 = vector.broadcast %346 : vector<16x1xf32> to vector<16x16xf32>
    %348 = arith.mulf %343, %347 : vector<16x16xf32>
    %349 = arith.truncf %348 : vector<16x16xf32> to vector<16x16xbf16>
    %350 = vector.extract_strided_slice %275 {offsets = [0, 24], sizes = [16, 8], strides = [1, 1]} : vector<16x32xbf16> to vector<16x8xbf16>
    %cst_126 = arith.constant dense<0.000000e+00> : vector<16x8xf32>
    %351 = tpu.matmul %349, %350, %cst_126 {dimension_numbers = #tpu.dot_dimension_numbers<[1], [0], [0], [1], [0, 0, 1, 1], [], []>} : vector<16x16xbf16>, vector<16x8xbf16>, vector<16x8xf32> -> vector<16x8xf32>
    %352 = tpu.concatenate %294, %313, %332, %351 in 1 : vector<16x8xf32>, vector<16x8xf32>, vector<16x8xf32>, vector<16x8xf32> -> vector<16x32xf32>
    %353 = arith.truncf %352 : vector<16x32xf32> to vector<16x32xbf16>
    %c1_127 = arith.constant 1 : index
    %c0_128 = arith.constant 0 : index
    %c0_129 = arith.constant 0 : index
    %354 = vector.load %arg6[%c1_127, %c0_128, %c0_129] : memref<2x32x32xbf16, #tpu.memory_space<vmem>>, vector<1x32x32xbf16>
    %355 = vector.shape_cast %354 : vector<1x32x32xbf16> to vector<32x32xbf16>
    %cst_130 = arith.constant dense<0.000000e+00> : vector<16x32xf32>
    %356 = tpu.matmul %353, %355, %cst_130 {dimension_numbers = #tpu.dot_dimension_numbers<[1], [0], [0], [1], [0, 0, 1, 1], [], []>} : vector<16x32xbf16>, vector<32x32xbf16>, vector<16x32xf32> -> vector<16x32xf32>
    %c1_131 = arith.constant 1 : index
    %c0_132 = arith.constant 0 : index
    %c0_133 = arith.constant 0 : index
    %357 = vector.load %arg7[%c1_131, %c0_132, %c0_133] : memref<2x1x32xf32, #tpu.memory_space<vmem>>, vector<1x1x32xf32>
    %358 = vector.shape_cast %357 : vector<1x1x32xf32> to vector<1x32xf32>
    %359 = vector.broadcast %358 : vector<1x32xf32> to vector<16x32xf32>
    %360 = arith.addf %356, %359 : vector<16x32xf32>
    %361 = arith.addf %260, %360 : vector<16x32xf32>
    %c1_134 = arith.constant 1 : index
    %c0_135 = arith.constant 0 : index
    %c0_136 = arith.constant 0 : index
    %362 = vector.load %arg14[%c1_134, %c0_135, %c0_136] : memref<2x1x32xf32, #tpu.memory_space<vmem>>, vector<1x1x32xf32>
    %363 = vector.shape_cast %362 : vector<1x1x32xf32> to vector<1x32xf32>
    %c1_137 = arith.constant 1 : index
    %c0_138 = arith.constant 0 : index
    %c0_139 = arith.constant 0 : index
    %364 = vector.load %arg15[%c1_137, %c0_138, %c0_139] : memref<2x1x32xf32, #tpu.memory_space<vmem>>, vector<1x1x32xf32>
    %365 = vector.shape_cast %364 : vector<1x1x32xf32> to vector<1x32xf32>
    %cst_140 = arith.constant dense<0.000000e+00> : vector<16xf32>
    %366 = vector.multi_reduction <add>, %361, %cst_140 [1] : vector<16x32xf32> to vector<16xf32>
    %367 = vector.shape_cast %366 : vector<16xf32> to vector<16x1xf32>
    %cst_141 = arith.constant 3.200000e+01 : f32
    %368 = vector.broadcast %cst_141 : f32 to vector<16x1xf32>
    %369 = arith.divf %367, %368 : vector<16x1xf32>
    %370 = vector.broadcast %369 : vector<16x1xf32> to vector<16x32xf32>
    %371 = arith.subf %361, %370 : vector<16x32xf32>
    %372 = arith.mulf %371, %371 : vector<16x32xf32>
    %cst_142 = arith.constant dense<0.000000e+00> : vector<16xf32>
    %373 = vector.multi_reduction <add>, %372, %cst_142 [1] : vector<16x32xf32> to vector<16xf32>
    %374 = vector.shape_cast %373 : vector<16xf32> to vector<16x1xf32>
    %cst_143 = arith.constant 3.200000e+01 : f32
    %375 = vector.broadcast %cst_143 : f32 to vector<16x1xf32>
    %376 = arith.divf %374, %375 : vector<16x1xf32>
    %cst_144 = arith.constant 9.99999974E-6 : f32
    %377 = vector.broadcast %cst_144 : f32 to vector<16x1xf32>
    %378 = arith.addf %376, %377 : vector<16x1xf32>
    %379 = math.rsqrt %378 : vector<16x1xf32>
    %380 = vector.broadcast %379 : vector<16x1xf32> to vector<16x32xf32>
    %381 = arith.mulf %371, %380 : vector<16x32xf32>
    %382 = vector.broadcast %363 : vector<1x32xf32> to vector<16x32xf32>
    %383 = arith.mulf %381, %382 : vector<16x32xf32>
    %384 = vector.broadcast %365 : vector<1x32xf32> to vector<16x32xf32>
    %385 = arith.addf %383, %384 : vector<16x32xf32>
    %c1_i32_145 = arith.constant 1 : i32
    %386 = tpu.dynamic_rotate %385 by %c1_i32_145 dim 0 : vector<16x32xf32>, i32 -> vector<16x32xf32>
    %387 = arith.mulf %386, %36 : vector<16x32xf32>
    %c2_i32_146 = arith.constant 2 : i32
    %388 = tpu.dynamic_rotate %385 by %c2_i32_146 dim 0 : vector<16x32xf32>, i32 -> vector<16x32xf32>
    %389 = arith.mulf %388, %40 : vector<16x32xf32>
    %390 = tpu.concatenate %389, %387, %385 in 1 : vector<16x32xf32>, vector<16x32xf32>, vector<16x32xf32> -> vector<16x96xf32>
    %391 = arith.truncf %390 : vector<16x96xf32> to vector<16x96xbf16>
    %c1_147 = arith.constant 1 : index
    %c0_148 = arith.constant 0 : index
    %c0_149 = arith.constant 0 : index
    %392 = vector.load %arg8[%c1_147, %c0_148, %c0_149] : memref<2x96x64xbf16, #tpu.memory_space<vmem>>, vector<1x96x64xbf16>
    %393 = vector.shape_cast %392 : vector<1x96x64xbf16> to vector<96x64xbf16>
    %cst_150 = arith.constant dense<0.000000e+00> : vector<16x64xf32>
    %394 = tpu.matmul %391, %393, %cst_150 {dimension_numbers = #tpu.dot_dimension_numbers<[1], [0], [0], [1], [0, 0, 1, 1], [], []>} : vector<16x96xbf16>, vector<96x64xbf16>, vector<16x64xf32> -> vector<16x64xf32>
    %c1_151 = arith.constant 1 : index
    %c0_152 = arith.constant 0 : index
    %c0_153 = arith.constant 0 : index
    %395 = vector.load %arg9[%c1_151, %c0_152, %c0_153] : memref<2x1x64xf32, #tpu.memory_space<vmem>>, vector<1x1x64xf32>
    %396 = vector.shape_cast %395 : vector<1x1x64xf32> to vector<1x64xf32>
    %397 = vector.broadcast %396 : vector<1x64xf32> to vector<16x64xf32>
    %398 = arith.addf %394, %397 : vector<16x64xf32>
    %cst_154 = arith.constant 5.000000e-01 : f32
    %399 = vector.broadcast %cst_154 : f32 to vector<16x64xf32>
    %400 = arith.mulf %399, %398 : vector<16x64xf32>
    %cst_155 = arith.constant 0.707106769 : f32
    %401 = vector.broadcast %cst_155 : f32 to vector<16x64xf32>
    %402 = arith.mulf %398, %401 : vector<16x64xf32>
    %403 = math.erf %402 : vector<16x64xf32>
    %cst_156 = arith.constant 1.000000e+00 : f32
    %404 = vector.broadcast %cst_156 : f32 to vector<16x64xf32>
    %405 = arith.addf %404, %403 : vector<16x64xf32>
    %406 = arith.mulf %400, %405 : vector<16x64xf32>
    %407 = arith.truncf %406 : vector<16x64xf32> to vector<16x64xbf16>
    %c1_157 = arith.constant 1 : index
    %c0_158 = arith.constant 0 : index
    %c0_159 = arith.constant 0 : index
    %408 = vector.load %arg10[%c1_157, %c0_158, %c0_159] : memref<2x64x32xbf16, #tpu.memory_space<vmem>>, vector<1x64x32xbf16>
    %409 = vector.shape_cast %408 : vector<1x64x32xbf16> to vector<64x32xbf16>
    %cst_160 = arith.constant dense<0.000000e+00> : vector<16x32xf32>
    %410 = tpu.matmul %407, %409, %cst_160 {dimension_numbers = #tpu.dot_dimension_numbers<[1], [0], [0], [1], [0, 0, 1, 1], [], []>} : vector<16x64xbf16>, vector<64x32xbf16>, vector<16x32xf32> -> vector<16x32xf32>
    %c1_161 = arith.constant 1 : index
    %c0_162 = arith.constant 0 : index
    %c0_163 = arith.constant 0 : index
    %411 = vector.load %arg11[%c1_161, %c0_162, %c0_163] : memref<2x1x32xf32, #tpu.memory_space<vmem>>, vector<1x1x32xf32>
    %412 = vector.shape_cast %411 : vector<1x1x32xf32> to vector<1x32xf32>
    %413 = vector.broadcast %412 : vector<1x32xf32> to vector<16x32xf32>
    %414 = arith.addf %410, %413 : vector<16x32xf32>
    %415 = tpu.concatenate %385, %414 in 1 : vector<16x32xf32>, vector<16x32xf32> -> vector<16x64xf32>
    %416 = arith.truncf %415 : vector<16x64xf32> to vector<16x64xbf16>
    %c1_164 = arith.constant 1 : index
    %c0_165 = arith.constant 0 : index
    %c0_166 = arith.constant 0 : index
    %417 = vector.load %arg12[%c1_164, %c0_165, %c0_166] : memref<2x64x32xbf16, #tpu.memory_space<vmem>>, vector<1x64x32xbf16>
    %418 = vector.shape_cast %417 : vector<1x64x32xbf16> to vector<64x32xbf16>
    %cst_167 = arith.constant dense<0.000000e+00> : vector<16x32xf32>
    %419 = tpu.matmul %416, %418, %cst_167 {dimension_numbers = #tpu.dot_dimension_numbers<[1], [0], [0], [1], [0, 0, 1, 1], [], []>} : vector<16x64xbf16>, vector<64x32xbf16>, vector<16x32xf32> -> vector<16x32xf32>
    %c1_168 = arith.constant 1 : index
    %c0_169 = arith.constant 0 : index
    %c0_170 = arith.constant 0 : index
    %420 = vector.load %arg13[%c1_168, %c0_169, %c0_170] : memref<2x1x32xf32, #tpu.memory_space<vmem>>, vector<1x1x32xf32>
    %421 = vector.shape_cast %420 : vector<1x1x32xf32> to vector<1x32xf32>
    %422 = vector.broadcast %421 : vector<1x32xf32> to vector<16x32xf32>
    %423 = arith.addf %419, %422 : vector<16x32xf32>
    %424 = arith.negf %423 : vector<16x32xf32>
    %425 = math.exp %424 : vector<16x32xf32>
    %cst_171 = arith.constant 1.000000e+00 : f32
    %426 = vector.broadcast %cst_171 : f32 to vector<16x32xf32>
    %427 = arith.addf %426, %425 : vector<16x32xf32>
    %428 = arith.divf %426, %427 : vector<16x32xf32>
    %429 = arith.mulf %428, %385 : vector<16x32xf32>
    %cst_172 = arith.constant 1.000000e+00 : f32
    %430 = vector.broadcast %cst_172 : f32 to vector<16x32xf32>
    %431 = arith.subf %430, %428 : vector<16x32xf32>
    %432 = arith.mulf %431, %414 : vector<16x32xf32>
    %433 = arith.addf %429, %432 : vector<16x32xf32>
    %434 = arith.addf %260, %433 : vector<16x32xf32>
    %c1_173 = arith.constant 1 : index
    %c0_174 = arith.constant 0 : index
    %c0_175 = arith.constant 0 : index
    %435 = vector.load %arg16[%c1_173, %c0_174, %c0_175] : memref<2x1x32xf32, #tpu.memory_space<vmem>>, vector<1x1x32xf32>
    %436 = vector.shape_cast %435 : vector<1x1x32xf32> to vector<1x32xf32>
    %c1_176 = arith.constant 1 : index
    %c0_177 = arith.constant 0 : index
    %c0_178 = arith.constant 0 : index
    %437 = vector.load %arg17[%c1_176, %c0_177, %c0_178] : memref<2x1x32xf32, #tpu.memory_space<vmem>>, vector<1x1x32xf32>
    %438 = vector.shape_cast %437 : vector<1x1x32xf32> to vector<1x32xf32>
    %cst_179 = arith.constant dense<0.000000e+00> : vector<16xf32>
    %439 = vector.multi_reduction <add>, %434, %cst_179 [1] : vector<16x32xf32> to vector<16xf32>
    %440 = vector.shape_cast %439 : vector<16xf32> to vector<16x1xf32>
    %cst_180 = arith.constant 3.200000e+01 : f32
    %441 = vector.broadcast %cst_180 : f32 to vector<16x1xf32>
    %442 = arith.divf %440, %441 : vector<16x1xf32>
    %443 = vector.broadcast %442 : vector<16x1xf32> to vector<16x32xf32>
    %444 = arith.subf %434, %443 : vector<16x32xf32>
    %445 = arith.mulf %444, %444 : vector<16x32xf32>
    %cst_181 = arith.constant dense<0.000000e+00> : vector<16xf32>
    %446 = vector.multi_reduction <add>, %445, %cst_181 [1] : vector<16x32xf32> to vector<16xf32>
    %447 = vector.shape_cast %446 : vector<16xf32> to vector<16x1xf32>
    %cst_182 = arith.constant 3.200000e+01 : f32
    %448 = vector.broadcast %cst_182 : f32 to vector<16x1xf32>
    %449 = arith.divf %447, %448 : vector<16x1xf32>
    %cst_183 = arith.constant 9.99999974E-6 : f32
    %450 = vector.broadcast %cst_183 : f32 to vector<16x1xf32>
    %451 = arith.addf %449, %450 : vector<16x1xf32>
    %452 = math.rsqrt %451 : vector<16x1xf32>
    %453 = vector.broadcast %452 : vector<16x1xf32> to vector<16x32xf32>
    %454 = arith.mulf %444, %453 : vector<16x32xf32>
    %455 = vector.broadcast %436 : vector<1x32xf32> to vector<16x32xf32>
    %456 = arith.mulf %454, %455 : vector<16x32xf32>
    %457 = vector.broadcast %438 : vector<1x32xf32> to vector<16x32xf32>
    %458 = arith.addf %456, %457 : vector<16x32xf32>
    %cst_184 = arith.constant dense<0.000000e+00> : vector<16xf32>
    %459 = vector.multi_reduction <add>, %458, %cst_184 [1] : vector<16x32xf32> to vector<16xf32>
    %460 = vector.shape_cast %459 : vector<16xf32> to vector<16x1xf32>
    %cst_185 = arith.constant 3.200000e+01 : f32
    %461 = vector.broadcast %cst_185 : f32 to vector<16x1xf32>
    %462 = arith.divf %460, %461 : vector<16x1xf32>
    %463 = vector.broadcast %462 : vector<16x1xf32> to vector<16x32xf32>
    %464 = arith.subf %458, %463 : vector<16x32xf32>
    %465 = arith.mulf %464, %464 : vector<16x32xf32>
    %cst_186 = arith.constant dense<0.000000e+00> : vector<16xf32>
    %466 = vector.multi_reduction <add>, %465, %cst_186 [1] : vector<16x32xf32> to vector<16xf32>
    %467 = vector.shape_cast %466 : vector<16xf32> to vector<16x1xf32>
    %cst_187 = arith.constant 3.200000e+01 : f32
    %468 = vector.broadcast %cst_187 : f32 to vector<16x1xf32>
    %469 = arith.divf %467, %468 : vector<16x1xf32>
    %cst_188 = arith.constant 9.99999974E-6 : f32
    %470 = vector.broadcast %cst_188 : f32 to vector<16x1xf32>
    %471 = arith.addf %469, %470 : vector<16x1xf32>
    %472 = math.rsqrt %471 : vector<16x1xf32>
    %473 = vector.broadcast %472 : vector<16x1xf32> to vector<16x32xf32>
    %474 = arith.mulf %464, %473 : vector<16x32xf32>
    %475 = vector.broadcast %41 : vector<1x32xf32> to vector<16x32xf32>
    %476 = arith.mulf %474, %475 : vector<16x32xf32>
    %477 = vector.broadcast %42 : vector<1x32xf32> to vector<16x32xf32>
    %478 = arith.addf %476, %477 : vector<16x32xf32>
    %479 = arith.truncf %478 : vector<16x32xf32> to vector<16x32xbf16>
    %c0_189 = arith.constant 0 : index
    %c0_190 = arith.constant 0 : index
    %480 = vector.load %arg20[%c0_189, %c0_190] : memref<32x4xbf16, #tpu.memory_space<vmem>>, vector<32x4xbf16>
    %cst_191 = arith.constant dense<0.000000e+00> : vector<16x4xf32>
    %481 = tpu.matmul %479, %480, %cst_191 {dimension_numbers = #tpu.dot_dimension_numbers<[1], [0], [0], [1], [0, 0, 1, 1], [], []>} : vector<16x32xbf16>, vector<32x4xbf16>, vector<16x4xf32> -> vector<16x4xf32>
    %c0_192 = arith.constant 0 : index
    %c0_193 = arith.constant 0 : index
    %482 = vector.load %arg21[%c0_192, %c0_193] : memref<1x4xf32, #tpu.memory_space<vmem>>, vector<1x4xf32>
    %483 = vector.broadcast %482 : vector<1x4xf32> to vector<16x4xf32>
    %484 = arith.addf %481, %483 : vector<16x4xf32>
    %cst_194 = arith.constant 9.99999974E-6 : f32
    %485 = vector.broadcast %cst_194 : f32 to vector<1x4xf32>
    %486 = arith.addf %12, %485 : vector<1x4xf32>
    %487 = math.sqrt %486 : vector<1x4xf32>
    %488 = vector.broadcast %487 : vector<1x4xf32> to vector<16x4xf32>
    %489 = arith.mulf %484, %488 : vector<16x4xf32>
    %490 = vector.broadcast %5 : vector<1x4xf32> to vector<16x4xf32>
    %491 = arith.addf %489, %490 : vector<16x4xf32>
    %c0_195 = arith.constant 0 : index
    %c0_196 = arith.constant 0 : index
    %c0_197 = arith.constant 0 : index
    %492 = vector.load %arg22[%c0_195, %c0_196, %c0_197] : memref<1x16x4xf32, #tpu.memory_space<vmem>>, vector<1x16x4xf32>
    %493 = vector.shape_cast %492 : vector<1x16x4xf32> to vector<16x4xf32>
    %494 = vector.shape_cast %491 : vector<16x4xf32> to vector<1x16x4xf32>
    tpu.vector_store %arg22[%c0_195, %c0_196, %c0_197], %494 {strides = array<i32>} : memref<1x16x4xf32, #tpu.memory_space<vmem>>, vector<1x16x4xf32>,
    return
  }
  func.func @transform_0(%arg0: i32) -> (i32, i32, i32) {
    %c0_i32 = arith.constant 0 : i32
    %c0_i32_0 = arith.constant 0 : i32
    %c0_i32_1 = arith.constant 0 : i32
    return %arg0, %c0_i32, %c0_i32_0 : i32, i32, i32
  }
  func.func @transform_1(%arg0: i32) -> (i32, i32) {
    %c0_i32 = arith.constant 0 : i32
    %c0_i32_0 = arith.constant 0 : i32
    %c0_i32_1 = arith.constant 0 : i32
    return %c0_i32, %c0_i32_0 : i32, i32
  }
  func.func @transform_2(%arg0: i32) -> (i32, i32) {
    %c0_i32 = arith.constant 0 : i32
    %c0_i32_0 = arith.constant 0 : i32
    %c0_i32_1 = arith.constant 0 : i32
    return %c0_i32, %c0_i32_0 : i32, i32
  }
  func.func @transform_3(%arg0: i32) -> (i32, i32, i32) {
    %c0_i32 = arith.constant 0 : i32
    %c0_i32_0 = arith.constant 0 : i32
    %c0_i32_1 = arith.constant 0 : i32
    %c0_i32_2 = arith.constant 0 : i32
    return %c0_i32, %c0_i32_0, %c0_i32_1 : i32, i32, i32
  }
  func.func @transform_4(%arg0: i32) -> (i32, i32, i32) {
    %c0_i32 = arith.constant 0 : i32
    %c0_i32_0 = arith.constant 0 : i32
    %c0_i32_1 = arith.constant 0 : i32
    %c0_i32_2 = arith.constant 0 : i32
    return %c0_i32, %c0_i32_0, %c0_i32_1 : i32, i32, i32
  }
  func.func @transform_5(%arg0: i32) -> (i32, i32, i32) {
    %c0_i32 = arith.constant 0 : i32
    %c0_i32_0 = arith.constant 0 : i32
    %c0_i32_1 = arith.constant 0 : i32
    %c0_i32_2 = arith.constant 0 : i32
    return %c0_i32, %c0_i32_0, %c0_i32_1 : i32, i32, i32
  }
  func.func @transform_6(%arg0: i32) -> (i32, i32, i32) {
    %c0_i32 = arith.constant 0 : i32
    %c0_i32_0 = arith.constant 0 : i32
    %c0_i32_1 = arith.constant 0 : i32
    %c0_i32_2 = arith.constant 0 : i32
    return %c0_i32, %c0_i32_0, %c0_i32_1 : i32, i32, i32
  }
  func.func @transform_7(%arg0: i32) -> (i32, i32, i32) {
    %c0_i32 = arith.constant 0 : i32
    %c0_i32_0 = arith.constant 0 : i32
    %c0_i32_1 = arith.constant 0 : i32
    %c0_i32_2 = arith.constant 0 : i32
    return %c0_i32, %c0_i32_0, %c0_i32_1 : i32, i32, i32
  }
  func.func @transform_8(%arg0: i32) -> (i32, i32, i32) {
    %c0_i32 = arith.constant 0 : i32
    %c0_i32_0 = arith.constant 0 : i32
    %c0_i32_1 = arith.constant 0 : i32
    %c0_i32_2 = arith.constant 0 : i32
    return %c0_i32, %c0_i32_0, %c0_i32_1 : i32, i32, i32
  }
  func.func @transform_9(%arg0: i32) -> (i32, i32, i32) {
    %c0_i32 = arith.constant 0 : i32
    %c0_i32_0 = arith.constant 0 : i32
    %c0_i32_1 = arith.constant 0 : i32
    %c0_i32_2 = arith.constant 0 : i32
    return %c0_i32, %c0_i32_0, %c0_i32_1 : i32, i32, i32
  }
  func.func @transform_10(%arg0: i32) -> (i32, i32, i32) {
    %c0_i32 = arith.constant 0 : i32
    %c0_i32_0 = arith.constant 0 : i32
    %c0_i32_1 = arith.constant 0 : i32
    %c0_i32_2 = arith.constant 0 : i32
    return %c0_i32, %c0_i32_0, %c0_i32_1 : i32, i32, i32
  }
  func.func @transform_11(%arg0: i32) -> (i32, i32, i32) {
    %c0_i32 = arith.constant 0 : i32
    %c0_i32_0 = arith.constant 0 : i32
    %c0_i32_1 = arith.constant 0 : i32
    %c0_i32_2 = arith.constant 0 : i32
    return %c0_i32, %c0_i32_0, %c0_i32_1 : i32, i32, i32
  }
  func.func @transform_12(%arg0: i32) -> (i32, i32, i32) {
    %c0_i32 = arith.constant 0 : i32
    %c0_i32_0 = arith.constant 0 : i32
    %c0_i32_1 = arith.constant 0 : i32
    %c0_i32_2 = arith.constant 0 : i32
    return %c0_i32, %c0_i32_0, %c0_i32_1 : i32, i32, i32
  }
  func.func @transform_13(%arg0: i32) -> (i32, i32, i32) {
    %c0_i32 = arith.constant 0 : i32
    %c0_i32_0 = arith.constant 0 : i32
    %c0_i32_1 = arith.constant 0 : i32
    %c0_i32_2 = arith.constant 0 : i32
    return %c0_i32, %c0_i32_0, %c0_i32_1 : i32, i32, i32
  }
  func.func @transform_14(%arg0: i32) -> (i32, i32, i32) {
    %c0_i32 = arith.constant 0 : i32
    %c0_i32_0 = arith.constant 0 : i32
    %c0_i32_1 = arith.constant 0 : i32
    %c0_i32_2 = arith.constant 0 : i32
    return %c0_i32, %c0_i32_0, %c0_i32_1 : i32, i32, i32
  }
  func.func @transform_15(%arg0: i32) -> (i32, i32, i32) {
    %c0_i32 = arith.constant 0 : i32
    %c0_i32_0 = arith.constant 0 : i32
    %c0_i32_1 = arith.constant 0 : i32
    %c0_i32_2 = arith.constant 0 : i32
    return %c0_i32, %c0_i32_0, %c0_i32_1 : i32, i32, i32
  }
  func.func @transform_16(%arg0: i32) -> (i32, i32, i32) {
    %c0_i32 = arith.constant 0 : i32
    %c0_i32_0 = arith.constant 0 : i32
    %c0_i32_1 = arith.constant 0 : i32
    %c0_i32_2 = arith.constant 0 : i32
    return %c0_i32, %c0_i32_0, %c0_i32_1 : i32, i32, i32
  }
  func.func @transform_17(%arg0: i32) -> (i32, i32) {
    %c0_i32 = arith.constant 0 : i32
    %c0_i32_0 = arith.constant 0 : i32
    %c0_i32_1 = arith.constant 0 : i32
    return %c0_i32, %c0_i32_0 : i32, i32
  }
  func.func @transform_18(%arg0: i32) -> (i32, i32) {
    %c0_i32 = arith.constant 0 : i32
    %c0_i32_0 = arith.constant 0 : i32
    %c0_i32_1 = arith.constant 0 : i32
    return %c0_i32, %c0_i32_0 : i32, i32
  }
  func.func @transform_19(%arg0: i32) -> (i32, i32) {
    %c0_i32 = arith.constant 0 : i32
    %c0_i32_0 = arith.constant 0 : i32
    %c0_i32_1 = arith.constant 0 : i32
    return %c0_i32, %c0_i32_0 : i32, i32
  }
  func.func @transform_20(%arg0: i32) -> (i32, i32) {
    %c0_i32 = arith.constant 0 : i32
    %c0_i32_0 = arith.constant 0 : i32
    %c0_i32_1 = arith.constant 0 : i32
    return %c0_i32, %c0_i32_0 : i32, i32
  }
  func.func @transform_21(%arg0: i32) -> (i32, i32, i32) {
    %c0_i32 = arith.constant 0 : i32
    %c0_i32_0 = arith.constant 0 : i32
    %c0_i32_1 = arith.constant 0 : i32
    return %arg0, %c0_i32, %c0_i32_0 : i32, i32, i32
  }
}

</mosaic_0001>

<bundles_post_ra>
// kernel: _lambda_.1
= control target key start
LH: loop header
LB: loop body
LE: loop exit
PB: predicated region body
PF: predicated region fallthrough
CT: control target
= control target key end

     0   :  { %s4744_s0 = inlined_call_operand.vmem [shape: f32[2,16,4], index: 0, kind: input, shape index: {}]   ;;  %s4745_s1 = inlined_call_operand.vmem [shape: f32[16,32], index: 1, kind: input, shape index: {}]   ;;  %s4746_s2 = inlined_call_operand.vmem [shape: bf16[12,32], index: 2, kind: input, shape index: {}]   ;;  %s4747_s3 = inlined_call_operand.vmem [shape: bf16[2,32,96], index: 3, kind: input, shape index: {}]   ;;  %s4748_s4 = inlined_call_operand.vmem [shape: f32[2,1,96], index: 4, kind: input, shape index: {}]   ;;  %s4749_s5 = inlined_call_operand.vmem [shape: bf16[2,32,32], index: 5, kind: input, shape index: {}]   ;;  %s4750_s6 = inlined_call_operand.vmem [shape: f32[2,1,32], index: 6, kind: input, shape index: {}]   ;;  %s4751_s7 = inlined_call_operand.vmem [shape: bf16[2,96,64], index: 7, kind: input, shape index: {}]   ;;  %s4752_s8 = inlined_call_operand.vmem [shape: f32[2,1,64], index: 8, kind: input, shape index: {}]   ;;  %s4753_s9 = inlined_call_operand.vmem [shape: bf16[2,64,32], index: 9, kind: input, shape index: {}]   ;;  %s4754_s10 = inlined_call_operand.vmem [shape: f32[2,1,32], index: 10, kind: input, shape index: {}]   ;;  %s4755_s11 = inlined_call_operand.vmem [shape: bf16[2,64,32], index: 11, kind: input, shape index: {}]   ;;  %s4756_s12 = inlined_call_operand.vmem [shape: f32[2,1,32], index: 12, kind: input, shape index: {}]   ;;  %s4757_s13 = inlined_call_operand.vmem [shape: f32[2,1,32], index: 13, kind: input, shape index: {}]   ;;  %s4758_s14 = inlined_call_operand.vmem [shape: f32[2,1,32], index: 14, kind: input, shape index: {}]   ;;  %s4759_s15 = inlined_call_operand.vmem [shape: f32[2,1,32], index: 15, kind: input, shape index: {}]   ;;  %s4760_s16 = inlined_call_operand.vmem [shape: f32[2,1,32], index: 16, kind: input, shape index: {}]   ;;  %s4761_s17 = inlined_call_operand.vmem [shape: f32[1,32], index: 17, kind: input, shape index: {}]   ;;  %s4762_s18 = inlined_call_operand.vmem [shape: f32[1,32], index: 18, kind: input, shape index: {}]   ;;  %s4763_s19 = inlined_call_operand.vmem [shape: bf16[32,4], index: 19, kind: input, shape index: {}]   ;;  %s4764_s20 = inlined_call_operand.vmem [shape: f32[1,4], index: 20, kind: input, shape index: {}]   ;;  %s4765_s21 = inlined_call_operand.vmem [shape: f32[2,16,4], index: 21, kind: output, shape index: {}]  }
   0x1   :  { %4784 = sst [smem:[#allocation2_spill]] %s4744_s0 }
   0x2   :  { %4785 = sst [smem:[#allocation3_spill]] %s4745_s1 }
   0x3   :  { %4786 = sst [smem:[#allocation4_spill]] %s4746_s2  ;;  %s4115_s2 = smov 0  }
   0x4   :  { %4787 = sst [smem:[#allocation5_spill]] %s4747_s3 }
   0x5   :  { %4788 = sst [smem:[#allocation6_spill]] %s4748_s4 }
   0x6   :  { %4789 = sst [smem:[#allocation7_spill]] %s4749_s5 }
   0x7 LB: > { %s3277_s25 = sadd.s32 4294967295, %s3987_s2   ;;  %p3281_p0 = scmp.ge.s32.totalorder %s3987_s2, 1  ;;  %s3987_s2 = sphi %s4115_s2, %s31_s2  }
   0x8   : > { %p587_p1 = scmp.lt.s32.totalorder %s3987_s2, 3 }
   0xa   : > { %p588_p2 = pnand %p3281_p0, %p587_p1 }
   0xb   : > { %p647_p3 = scmp.lt.s32.totalorder (!%p588_p2), %s3277_s25, 1  ;;  %vm660_vm0 = vcmask (!%p588_p2), 31744   ;;  %s4790_s28 = sld [smem:[#allocation2_spill]] (!%p588_p2)  ;;  %v692_v27 = vlaneseq (!%p588_p2)  ;;  %vm737_vm1 = vcmask (!%p588_p2), 1045504   ;;  %v3989_v29 = vmov (!%p588_p2), 0.0  }
   0xc   : > { %591 = sbr.rel (%p588_p2) target bundleno = 7589 (0x1da5), region = 104  ;;  %s4791_s30 = sld [smem:[#allocation4_spill]] (!%p588_p2)  ;;  %3512 = vmatprep.subr.bf16.mxu0 (!%p588_p2), %v3989_v29  ;;  %3518 = vmatprep.subr.bf16.mxu1 (!%p588_p2), %v3989_v29  ;;  %vm3990_vm2 = vmmov (!%p588_p2), 0   ;;  %vm720_vm5 = vcmask (!%p588_p2), 64512   ;;  %vm733_vm6 = vcmask (!%p588_p2), 97280   ;;  %vm827_vm7 = vcmask (!%p588_p2), 261120  }
   0xd   : > { %v4148_v31 = vshrl.u32 (!%p588_p2), %v692_v27, 7  ;;  %3514 = vmatprep.mubr.msk.bf16.mxu0 (!%p588_p2), %vm3990_vm2, %v3989_v29  ;;  %3522 = vmatprep.mubr.msk.bf16.mxu1 (!%p588_p2), %vm3990_vm2, %v3989_v29  ;;  %s3991_s5 = smov (!%p588_p2), 4   ;;  %s4777_s22 = smov (!%p588_p2), 8   ;;  %vm920_vm8 = vcmask (!%p588_p2), 1043456   ;;  %vm965_vm11 = vcmask (!%p588_p2), 130048   ;;  %vm1426_vm12 = vcmask (!%p588_p2), 195584  }
   0xe   : > { %s4792_s24 = sld [smem:[#allocation5_spill]] (!%p588_p2)  ;;  %s4793_s0 = sld [smem:[#allocation3_spill]] (!%p588_p2) }
   0xf   : > { %vm699_vm3 = vcmp.lt.s32.totalorder (!%p588_p2), %v4148_v31, 7  ;;  %vm694_vm4 = vcmp.lt.s32.totalorder (!%p588_p2), %v4148_v31, 1  ;;  %s4794_s1 = sld [smem:[#allocation6_spill]] (!%p588_p2)  ;;  %s4780_s27 = smov (!%p588_p2), 96   ;;  %vm789_vm13 = vcmp.ge.s32.totalorder (!%p588_p2), %v4148_v31, 1  ;;  %vm795_vm14 = vcmp.ge.s32.totalorder (!%p588_p2), %v4148_v31, 2 }
  0x10   : > { %s4778_s3 = smov (!%p588_p2), 120   ;;  %s3998_s4 = smov (!%p588_p2), 64   ;;  %vm1552_vm15 = vcmp.lt.s32.totalorder (!%p588_p2), %v4148_v31, 2 }
  0x11   : > { %s4772_s23 = smov (!%p588_p2), 40  }
  0x12   : > { %v3828_v28 = vld [vmem:[%s4791_s30] sm:$0x3f] (!%p588_p2)   ;;  %s4771_s30 = smov (!%p588_p2), 56  }
  0x13   : > { %s4809_s25 = smov (!%p647_p3, %s3277_s25), 1  ;;  %v739_v30 = vsel %vm737_vm1, %v3828_v28, 0  ;;  %vm1575_vm1 = vcmask 523264  }
  0x14   : > { %s4770_s26 = sshll.u32 %s4809_s25, 4  ;;  %3513 = vmatpush3.bf16.msra.mxu0 %v739_v30  ;;  %v3829_v56 = vld [vmem:[%s4792_s24] sm:$0xff]   ;;  %v3830_v57 = vld [vmem:[%s4792_s24 + $0x8] sm:$0xff]  }
  0x15   : > { %s651_s29 = scalar_lea.vmem %s4790_s28, %s4770_s26  ;;  %3526 = vmatprep.subr.bf16.mxu0 %v3989_v29  ;;  %3519 = vmatpush3.bf16.msra.mxu1 %v3829_v56  ;;  %v726_v58 = vld [vmem:[%s4793_s0] sm:$0xff]  ;;  %v727_v60 = vld [vmem:[%s4793_s0 + $0x8] sm:$0xff]  ;;  %s4779_s28 = smov 112  }
  0x16   : > { %v658_v0 = vld [vmem:[%s651_s29] sm:$0xff]  ;;  %v659_v1 = vld [vmem:[%s651_s29 + $0x8] sm:$0xff]  ;;  %3520 = vmatprep.subr.bf16.mxu1 %v3989_v29  ;;  %s4774_s29 = smov 104   ;;  %s4776_s26 = smov 16  }
  0x17   : > { %v661_v2 = vsel %vm660_vm0, %v658_v0, 0.0  ;;  %v662_v3 = vsel %vm660_vm0, %v659_v1, 0.0 }
  0x18   : > { %v663_v4 = vadd.f32 %v662_v3, %v661_v2  ;;  %v3290_v3 = vld [vmem:[%s4794_s1] ss:$0 sm:$0xff] }
  0x19   : > { %3521 = vmatpush3.bf16.msra.mxu1 %v3830_v57 }
  0x1a   : > { %v664_v5 = vrot.slane %v663_v4, 4  ;;  %3532 = vmatprep.subr.bf16.mxu1 %v3989_v29 }
  0x1c   : > { %v665_v6 = vadd.f32 %v664_v5, %v663_v4 }
  0x1e   : > { %v666_v7 = vrot.slane %v665_v6, 2 }
  0x20   : > { %v667_v8 = vadd.f32 %v666_v7, %v665_v6 }
  0x22   : > { %v668_v9 = vrot.slane %v667_v8, 1 }
  0x24   : > { %v669_v10 = vadd.f32 %v668_v9, %v667_v8 }
  0x26   : > { %v4133_v11 = vmul.f32 0.0625, %v669_v10 }
  0x28   : > { %v672_v12 = vsub.f32 %v658_v0, %v4133_v11  ;;  %v673_v13 = vsub.f32 %v659_v1, %v4133_v11 }
  0x2a   : > { %v674_v14 = vmul.f32 %v672_v12, %v672_v12  ;;  %v675_v15 = vmul.f32 %v673_v13, %v673_v13 }
  0x2c   : > { %v676_v16 = vsel %vm660_vm0, %v674_v14, 0.0  ;;  %v677_v17 = vsel %vm660_vm0, %v675_v15, 0.0 }
  0x2d   : > { %v678_v18 = vadd.f32 %v677_v17, %v676_v16 }
  0x2f   : > { %v679_v19 = vrot.slane %v678_v18, 4 }
  0x31   : > { %v680_v20 = vadd.f32 %v679_v19, %v678_v18 }
  0x33   : > { %v681_v21 = vrot.slane %v680_v20, 2 }
  0x35   : > { %v682_v22 = vadd.f32 %v681_v21, %v680_v20 }
  0x37   : > { %v683_v23 = vrot.slane %v682_v22, 1 }
  0x39   : > { %v684_v24 = vadd.f32 %v683_v23, %v682_v22 }
  0x3b   : > { %v685_v25 = vmul.f32 0.0625, %v684_v24 }
  0x3d   : > { %v4139_v26 = vadd.f32 1e-05, %v685_v25 }
  0x3f   : > { %3867 = vrsqrt.f32 %v4139_v26 }
  0x49   : > { %v4151_v32 = vpop.eup %3867 }
  0x4a   : > { %v688_v33 = vmul.f32 %v4151_v32, %v672_v12  ;;  %v689_v34 = vmul.f32 %v4151_v32, %v673_v13 }
  0x4c   : > { %v691_v35 = vrot.slane %v689_v34, 7  ;;  %v3758_v36 = vpack.i.bf16 %v689_v34, %v688_v33  ;;  %v690_v37 = vrot.slane %v688_v33, 7  ;;  %v697_v38 = vrot.slane %v688_v33, 1 }
  0x4d   : > { %v698_v39 = vrot.slane %v689_v34, 1 }
  0x4e   : > { %3759 = vrot.lane.b32.xlu0 %v3758_v36, %s3991_s5  ;;  %v695_v40 = vsel %vm694_vm4, %v690_v37, %v691_v35  ;;  %v696_v41 = vsel %vm694_vm4, %v691_v35, %v690_v37  ;;  %v784_v37 = vand.u32 127, %v692_v27  ;;  %s4773_s5 = smov 48  }
  0x4f   : > { %v700_v42 = vsel %vm699_vm3, %v697_v38, %v698_v39  ;;  %v701_v43 = vsel %vm699_vm3, %v698_v39, %v697_v38  ;;  %v782_v38 = vadd.s32 8, %v4148_v31  ;;  %v3997_v39 = vmov -1e+09  }
  0x50   : > { %v3763_v44 = vpack.i.bf16 %v701_v43, %v700_v42  ;;  %vm785_vm9 = vcmp.le.s32.totalorder %v784_v37, %v4148_v31  ;;  %vm1634_vm3 = vcmask 785408   ;;  %v3858_v31 = vld [vmem:[%s4753_s9 + $0x28] sm:$0xff]  }
  0x51   : > { %vm786_vm10 = vcmp.le.s32.totalorder %v784_v37, %v782_v38 }
  0x52   : > { %3764 = vrot.lane.b32.xlu0 %v3763_v44, %s4777_s22  ;;  %v4230_v42 = vsel %vm786_vm10, 0.0, %v3997_v39 }
  0xc0   : > { %v3760_v45 = vpop.permute.xlu0 %3759 }
  0xc1   : > { %v3762_v46 = vunpack.i.h.bf16 %v3760_v45  ;;  %v3761_v47 = vunpack.i.l.bf16 %v3760_v45 }
  0xc3   : > { %v718_v51 = vsel %vm660_vm0, %v696_v41, %v3761_v47  ;;  %v719_v52 = vsel %vm660_vm0, %v695_v40, %v3762_v46  ;;  %v4228_v40 = vsel %vm785_vm9, 0.0, %v3997_v39 }
  0xc4   : > { %v3765_v48 = vpop.permute.xlu0 %3764 }
  0xc5   : > { %v3767_v49 = vunpack.i.h.bf16 %v3765_v48  ;;  %v3766_v50 = vunpack.i.l.bf16 %v3765_v48 }
  0xc7   : > { %v721_v53 = vsel %vm720_vm5, %v718_v51, %v3766_v50  ;;  %v722_v54 = vsel %vm720_vm5, %v719_v52, %v3767_v49 }
  0xc8   : > { %v723_v55 = vpack.c.bf16 %v722_v54, %v721_v53 }
  0xca   : > { %3515 = vmatmul.mubr.msk.bf16.vlgmr.msra.gmra.mrb[0].mxu0 %vm733_vm6, %v723_v55 }
  0xcb   : > { %3528 = vmatprep.mubr.msk.bf16.mxu0 %vm3990_vm2, %v3989_v29 }
 0x19d   : > { %v775_v59 = vpop.f32.mrb[0].mxu0 }
 0x19e   : > { %v3516_v61 = vpop.f32.mrb[1].mxu0  ;;  %v4186_v63 = vadd.f32 %v775_v59, %v726_v58 }
 0x19f   : > { %v778_v62 = vpop.f32.mrb[2].mxu0 }
 0x1a0   : > { %v4188_v0 = vadd.f32 %v778_v62, %v727_v60  ;;  %v3517_v1 = vpop.f32.mrb[3].mxu0 }
 0x1a2   : > { %v803_v2 = vpack.c.bf16 %v4188_v0, %v4186_v63 }
 0x1a4   : > { %3523 = vmatmul.mubr.msk.bf16.vlgmr.msra.gmra.mrb[0].mxu1 %vm827_vm7, %v803_v2 }
 0x1a5   : > { %3534 = vmatprep.mubr.msk.bf16.mxu1 %vm3990_vm2, %v3989_v29 }
 0x277   : > { %v865_v4 = vpop.f32.mrb[0].mxu1 }
 0x278   : > { %v866_v5 = vadd.f32 %v3290_v3, %v865_v4  ;;  %v3524_v6 = vpop.f32.mrb[1].mxu1 }
 0x279   : > { %v868_v7 = vpop.f32.mrb[2].mxu1 }
 0x27a   : > { %v869_v8 = vadd.f32 %v3290_v3, %v868_v7  ;;  %876 = vrot.lane.b32.xlu1 %v866_v5, %s4780_s27  ;;  %v3525_v9 = vpop.f32.mrb[3].mxu1  ;;  %v872_v10 = vmul.f32 0.35355338, %v866_v5 }
 0x27c   : > { %v873_v12 = vmul.f32 0.35355338, %v869_v8  ;;  %v4199_v13 = vpack.c.bf16 %v869_v8, %v866_v5 }
 0x27e   : > { %v915_v14 = vpack.c.bf16 %v873_v12, %v872_v10  ;;  %878 = vrot.lane.b32.xlu1 %v869_v8, %s4780_s27  ;;  %s4782_s27 = smov 32  }
 0x280   : > { %1039 = vrot.lane.b32.xlu0 %v915_v14, %s4778_s3  ;;  %s4797_s3 = smov 112  }
 0x282   : > { %1159 = vrot.lane.b32.xlu1 %v915_v14, %s4779_s28  ;;  %s4802_s28 = smov 56  }
 0x286   : > { %1279 = vrot.lane.b32.xlu1 %v915_v14, %s4774_s29  ;;  %s4798_s29 = smov 120  }
 0x2ec   : > { %v877_v15 = vpop.permute.xlu1 %876 }
 0x2ed   : > { %882 = vxpose.xlu0.b32.start [1/2] (short) (narrow) %v877_v15, 32 }
 0x2f0   : > { %v879_v16 = vpop.permute.xlu1 %878 }
 0x2f1   : > { %883 = vxpose.xlu0.b32.end [2/2] (short) (narrow) %v879_v16, 32 }
 0x2f2   : > { %v1040_v17 = vpop.permute.xlu0 %1039 }
 0x2f4   : > { %v1160_v35 = vpop.permute.xlu1 %1159 }
 0x2f8   : > { %v1280_v36 = vpop.permute.xlu1 %1279 }
 0x36d   : > { %v898_v18 = vpop.trf.xlu0 }
 0x36e   : > { %v916_v19 = vpack.c.bf16 %v898_v18, %v898_v18 }
 0x370   : > { %v922_v20 = vsel %vm920_vm8, %v916_v19, 0 }
 0x371   : > { %3527 = vmatpush3.bf16.msra.mxu0 %v922_v20  ;;  %v899_v21 = vpop.trf.xlu0 }
 0x372   : > { %v1037_v22 = vpack.c.bf16 %v899_v21, %v899_v21  ;;  %3538 = vmatprep.subr.bf16.mxu0 %v3989_v29 }
 0x374   : > { %3529 = vmatmul.mubr.msk.bf16.vlgmr.msra.gmra.mrb[4].mxu0 %vm720_vm5, %v915_v14  ;;  %v1045_v23 = vsel %vm920_vm8, %v1037_v22, 0 }
 0x375   : > { %3539 = vmatpush3.bf16.msra.mxu0 %v1045_v23  ;;  %3540 = vmatprep.mubr.msk.bf16.mxu0 %vm3990_vm2, %v3989_v29  ;;  %v900_v24 = vpop.trf.xlu0 }
 0x376   : > { %v1158_v25 = vpack.c.bf16 %v900_v24, %v900_v24  ;;  %3550 = vmatprep.subr.bf16.mxu0 %v3989_v29 }
 0x378   : > { %v1165_v28 = vsel %vm920_vm8, %v1158_v25, 0 }
 0x379   : > { %v901_v30 = vpop.trf.xlu0 }
 0x37a   : > { %v1278_v33 = vpack.c.bf16 %v901_v30, %v901_v30 }
 0x37c   : > { %3541 = vmatmul.mubr.msk.bf16.vlgmr.msra.gmra.mrb[8].mxu0 %vm720_vm5, %v1040_v17  ;;  %v1285_v34 = vsel %vm920_vm8, %v1278_v33, 0 }
 0x37d   : > { %3551 = vmatpush3.bf16.msra.mxu0 %v1165_v28  ;;  %3552 = vmatprep.mubr.msk.bf16.mxu0 %vm3990_vm2, %v3989_v29 }
 0x37e   : > { %3562 = vmatprep.subr.bf16.mxu0 %v3989_v29 }
 0x384   : > { %3553 = vmatmul.mubr.msk.bf16.vlgmr.msra.gmra.mrb[12].mxu0 %vm720_vm5, %v1160_v35 }
 0x385   : > { %3563 = vmatpush3.bf16.msra.mxu0 %v1285_v34  ;;  %3564 = vmatprep.mubr.msk.bf16.mxu0 %vm3990_vm2, %v3989_v29 }
 0x386   : > { %3574 = vmatprep.subr.bf16.mxu0 %v3989_v29 }
 0x38c   : > { %3565 = vmatmul.mubr.msk.bf16.vlgmr.msra.gmra.mrb[16].mxu0 %vm720_vm5, %v1280_v36 }
 0x38d   : > { %3578 = vmatprep.mubr.msk.bf16.mxu0 %vm3990_vm2, %v3989_v29 }
 0x447   : > { %v958_v41 = vpop.f32.mrb[4].mxu0 }
 0x448   : > { %v959_v43 = vadd.f32 %v958_v41, %v4228_v40  ;;  %v3530_v44 = vpop.f32.mrb[5].mxu0 }
 0x449   : > { %v961_v45 = vpop.f32.mrb[6].mxu0 }
 0x44a   : > { %v962_v46 = vadd.f32 %v961_v45, %v4230_v42  ;;  %v3531_v47 = vpop.f32.mrb[7].mxu0  ;;  %v966_v27 = vsel %vm965_vm11, %v959_v43, -inf }
 0x44b   : > { %967 = vmax.xlane.f32.xlu1 %v966_v27 }
 0x44c   : > { %v969_v48 = vsel %vm965_vm11, %v962_v46, -inf }
 0x44d   : > { %970 = vmax.xlane.f32.xlu0 %v969_v48 }
 0x44f   : > { %v1081_v49 = vpop.f32.mrb[8].mxu0 }
 0x450   : > { %v1082_v50 = vadd.f32 %v1081_v49, %v4228_v40  ;;  %v3542_v51 = vpop.f32.mrb[9].mxu0 }
 0x451   : > { %v1084_v52 = vpop.f32.mrb[10].mxu0 }
 0x452   : > { %v1085_v53 = vadd.f32 %v1084_v52, %v4230_v42  ;;  %v3543_v54 = vpop.f32.mrb[11].mxu0  ;;  %v1088_v55 = vsel %vm965_vm11, %v1082_v50, -inf }
 0x453   : > { %1089 = vmax.xlane.f32.xlu1 %v1088_v55 }
 0x454   : > { %v1091_v56 = vsel %vm965_vm11, %v1085_v53, -inf }
 0x457   : > { %1092 = vmax.xlane.f32.xlu1 %v1091_v56  ;;  %v1201_v57 = vpop.f32.mrb[12].mxu0 }
 0x458   : > { %v1202_v58 = vadd.f32 %v1201_v57, %v4228_v40  ;;  %v3554_v59 = vpop.f32.mrb[13].mxu0 }
 0x459   : > { %v1204_v60 = vpop.f32.mrb[14].mxu0 }
 0x45a   : > { %v1205_v61 = vadd.f32 %v1204_v60, %v4230_v42  ;;  %v3555_v62 = vpop.f32.mrb[15].mxu0  ;;  %v1208_v1 = vsel %vm965_vm11, %v1202_v58, -inf }
 0x45b   : > { %1209 = vmax.xlane.f32.xlu1 %v1208_v1 }
 0x45c   : > { %v1211_v2 = vsel %vm965_vm11, %v1205_v61, -inf }
 0x45f   : > { %1212 = vmax.xlane.f32.xlu1 %v1211_v2  ;;  %v1321_v3 = vpop.f32.mrb[16].mxu0 }
 0x460   : > { %v1322_v4 = vadd.f32 %v1321_v3, %v4228_v40  ;;  %v3566_v5 = vpop.f32.mrb[17].mxu0 }
 0x461   : > { %v1324_v6 = vpop.f32.mrb[18].mxu0 }
 0x462   : > { %v1325_v7 = vadd.f32 %v1324_v6, %v4230_v42  ;;  %v3567_v8 = vpop.f32.mrb[19].mxu0  ;;  %v1328_v9 = vsel %vm965_vm11, %v1322_v4, -inf }
 0x463   : > { %990 = vrot.lane.b32.xlu0 %v4199_v13, %s3998_s4  ;;  %1329 = vmax.xlane.f32.xlu1 %v1328_v9 }
 0x464   : > { %v1331_v10 = vsel %vm965_vm11, %v1325_v7, -inf }
 0x467   : > { %1332 = vmax.xlane.f32.xlu1 %v1331_v10 }
 0x478   : > { %1111 = vrot.lane.b32.xlu1 %v4199_v13, %s4771_s30  ;;  %s4775_s30 = smov 24  }
 0x4d8   : > { %v968_v12 = vpop.xlane.xlu1 %967 }
 0x4d9   : > { %v972_v14 = vsub.f32 %v959_v43, %v968_v12 }
 0x4da   : > { %v971_v15 = vpop.xlane.xlu0 %970 }
 0x4db   : > { %v974_v16 = vmul.f32 1.442695, %v972_v14  ;;  %v973_v17 = vsub.f32 %v962_v46, %v971_v15 }
 0x4dd   : > { %3869 = vpow2.f32 %v974_v16  ;;  %v976_v18 = vmul.f32 1.442695, %v973_v17 }
 0x4de   : > { %v991_v19 = vpop.permute.xlu0 %990 }
 0x4df   : > { %3871 = vpow2.f32 %v976_v18  ;;  %3533 = vmatpush3.bf16.msra.mxu1 %v991_v19 }
 0x4e0   : > { %v1090_v20 = vpop.xlane.xlu1 %1089  ;;  %3544 = vmatprep.subr.bf16.mxu1 %v3989_v29 }
 0x4e1   : > { %v1094_v21 = vsub.f32 %v1082_v50, %v1090_v20 }
 0x4e3   : > { %v1096_v22 = vmul.f32 1.442695, %v1094_v21 }
 0x4e4   : > { %v1093_v23 = vpop.xlane.xlu1 %1092 }
 0x4e5   : > { %3873 = vpow2.f32 %v1096_v22  ;;  %v1095_v24 = vsub.f32 %v1085_v53, %v1093_v23 }
 0x4e7   : > { %v3870_v25 = vpop.eup %3869  ;;  %v1098_v28 = vmul.f32 1.442695, %v1095_v24 }
 0x4e8   : > { %v1210_v30 = vpop.xlane.xlu1 %1209  ;;  %v978_v33 = vsel %vm965_vm11, %v3870_v25, 0.0 }
 0x4e9   : > { %v3872_v34 = vpop.eup %3871  ;;  %3875 = vpow2.f32 %v1098_v28  ;;  %v1214_v35 = vsub.f32 %v1202_v58, %v1210_v30  ;;  %979 = vadd.xlane.f32.xlu1 %v978_v33 }
 0x4ea   : > { %v981_v38 = vsel %vm965_vm11, %v3872_v34, 0.0 }
 0x4eb   : > { %v1216_v36 = vmul.f32 1.442695, %v1214_v35 }
 0x4ec   : > { %v1213_v37 = vpop.xlane.xlu1 %1212 }
 0x4ed   : > { %3877 = vpow2.f32 %v1216_v36  ;;  %v1215_v39 = vsub.f32 %v1205_v61, %v1213_v37  ;;  %982 = vadd.xlane.f32.xlu1 %v981_v38 }
 0x4ef   : > { %v3874_v41 = vpop.eup %3873  ;;  %v1218_v43 = vmul.f32 1.442695, %v1215_v39 }
 0x4f0   : > { %v1330_v44 = vpop.xlane.xlu1 %1329  ;;  %v1100_v45 = vsel %vm965_vm11, %v3874_v41, 0.0 }
 0x4f1   : > { %3879 = vpow2.f32 %v1218_v43  ;;  %v1334_v46 = vsub.f32 %v1322_v4, %v1330_v44  ;;  %1101 = vadd.xlane.f32.xlu1 %v1100_v45 }
 0x4f3   : > { %v3876_v47 = vpop.eup %3875  ;;  %v1336_v27 = vmul.f32 1.442695, %v1334_v46 }
 0x4f4   : > { %v1333_v48 = vpop.xlane.xlu1 %1332  ;;  %v1103_v49 = vsel %vm965_vm11, %v3876_v47, 0.0 }
 0x4f5   : > { %3881 = vpow2.f32 %v1336_v27  ;;  %v1335_v50 = vsub.f32 %v1325_v7, %v1333_v48  ;;  %1104 = vadd.xlane.f32.xlu1 %v1103_v49 }
 0x4f7   : > { %v3878_v51 = vpop.eup %3877  ;;  %v1338_v52 = vmul.f32 1.442695, %v1335_v50 }
 0x4f8   : > { %v1220_v53 = vsel %vm965_vm11, %v3878_v51, 0.0  ;;  %v1112_v60 = vpop.permute.xlu1 %1111 }
 0x4f9   : > { %3883 = vpow2.f32 %v1338_v52  ;;  %1221 = vadd.xlane.f32.xlu1 %v1220_v53 }
 0x4fb   : > { %v3880_v54 = vpop.eup %3879 }
 0x4fc   : > { %v1223_v55 = vsel %vm965_vm11, %v3880_v54, 0.0 }
 0x4fd   : > { %1224 = vadd.xlane.f32.xlu1 %v1223_v55 }
 0x4ff   : > { %v3882_v56 = vpop.eup %3881 }
 0x500   : > { %v1340_v57 = vsel %vm965_vm11, %v3882_v56, 0.0 }
 0x501   : > { %1341 = vadd.xlane.f32.xlu0 %v1340_v57 }
 0x503   : > { %v3884_v58 = vpop.eup %3883 }
 0x504   : > { %v1343_v59 = vsel %vm965_vm11, %v3884_v58, 0.0 }
 0x505   : > { %1344 = vadd.xlane.f32.xlu1 %v1343_v59 }
 0x516   : > { %1231 = vrot.lane.b32.xlu1 %v4199_v13, %s4773_s5  ;;  %s4799_s5 = smov 104  }
 0x517   : > { %1351 = vrot.lane.b32.xlu0 %v4199_v13, %s4772_s23  ;;  %s4795_s23 = sld [smem:[#allocation7_spill]] }
 0x51d   : > { %v3831_v44 = vld [vmem:[%s4795_s23] sm:$0xff]   ;;  %v3832_v48 = vld [vmem:[%s4795_s23 + $0x8] sm:$0xff]  }
 0x51e   : > { %3575 = vmatpush3.bf16.msra.mxu0 %v3831_v44 }
 0x51f   : > { %3576 = vmatprep.subr.bf16.mxu0 %v3989_v29 }
 0x522   : > { %3577 = vmatpush3.bf16.msra.mxu0 %v3832_v48  ;;  %v3836_v48 = vld [vmem:[%s4751_s7 + $0x18] sm:$0xff]  }
 0x523   : > { %3598 = vmatprep.subr.bf16.mxu0 %v3989_v29 }
 0x576   : > { %v980_v61 = vpop.xlane.xlu1 %979 }
 0x577   : > { %3885 = vrcp.f32 %v980_v61 }
 0x57a   : > { %v983_v62 = vpop.xlane.xlu1 %982 }
 0x57b   : > { %3887 = vrcp.f32 %v983_v62 }
 0x57e   : > { %v1102_v1 = vpop.xlane.xlu1 %1101 }
 0x57f   : > { %3889 = vrcp.f32 %v1102_v1 }
 0x581   : > { %v3886_v3 = vpop.eup %3885 }
 0x582   : > { %v1105_v2 = vpop.xlane.xlu1 %1104  ;;  %v986_v5 = vmul.f32 %v3886_v3, %v3870_v25 }
 0x583   : > { %3891 = vrcp.f32 %v1105_v2 }
 0x585   : > { %v3888_v4 = vpop.eup %3887 }
 0x586   : > { %v987_v6 = vmul.f32 %v3888_v4, %v3872_v34  ;;  %v1222_v7 = vpop.xlane.xlu1 %1221 }
 0x587   : > { %3893 = vrcp.f32 %v1222_v7 }
 0x588   : > { %v988_v8 = vpack.c.bf16 %v987_v6, %v986_v5 }
 0x589   : > { %v3890_v13 = vpop.eup %3889 }
 0x58a   : > { %3535 = vmatmul.mubr.msk.bf16.vlgmr.msra.gmra.mrb[4].mxu1 %vm965_vm11, %v988_v8  ;;  %v1225_v9 = vpop.xlane.xlu1 %1224  ;;  %v1108_v12 = vmul.f32 %v3890_v13, %v3874_v41 }
 0x58b   : > { %3545 = vmatpush3.bf16.msra.mxu1 %v1112_v60  ;;  %3895 = vrcp.f32 %v1225_v9  ;;  %3546 = vmatprep.mubr.msk.bf16.mxu1 %vm3990_vm2, %v3989_v29 }
 0x58c   : > { %3556 = vmatprep.subr.bf16.mxu1 %v3989_v29 }
 0x58d   : > { %v3892_v10 = vpop.eup %3891 }
 0x58e   : > { %v1109_v14 = vmul.f32 %v3892_v10, %v3876_v47  ;;  %v1342_v15 = vpop.xlane.xlu0 %1341  ;;  %v3302_v10 = vld [vmem:[%s4750_s6] ss:$0 sm:$0xff] }
 0x58f   : > { %3897 = vrcp.f32 %v1342_v15 }
 0x590   : > { %v1110_v16 = vpack.c.bf16 %v1109_v14, %v1108_v12 }
 0x591   : > { %v3894_v18 = vpop.eup %3893 }
 0x592   : > { %3547 = vmatmul.mubr.msk.bf16.vlgmr.msra.gmra.mrb[8].mxu1 %vm965_vm11, %v1110_v16  ;;  %v1345_v17 = vpop.xlane.xlu1 %1344  ;;  %v1228_v20 = vmul.f32 %v3894_v18, %v3878_v51  ;;  %v1352_v24 = vpop.permute.xlu0 %1351 }
 0x593   : > { %3899 = vrcp.f32 %v1345_v17  ;;  %3558 = vmatprep.mubr.msk.bf16.mxu1 %vm3990_vm2, %v3989_v29 }
 0x595   : > { %v3896_v19 = vpop.eup %3895 }
 0x596   : > { %v1229_v21 = vmul.f32 %v3896_v19, %v3880_v54  ;;  %v1232_v22 = vpop.permute.xlu1 %1231 }
 0x597   : > { %3557 = vmatpush3.bf16.msra.mxu1 %v1232_v22 }
 0x598   : > { %v1230_v23 = vpack.c.bf16 %v1229_v21, %v1228_v20  ;;  %3568 = vmatprep.subr.bf16.mxu1 %v3989_v29 }
 0x599   : > { %v3898_v25 = vpop.eup %3897 }
 0x59a   : > { %3559 = vmatmul.mubr.msk.bf16.vlgmr.msra.gmra.mrb[12].mxu1 %vm965_vm11, %v1230_v23  ;;  %v1348_v30 = vmul.f32 %v3898_v25, %v3882_v56 }
 0x59b   : > { %3569 = vmatpush3.bf16.msra.mxu1 %v1352_v24  ;;  %3570 = vmatprep.mubr.msk.bf16.mxu1 %vm3990_vm2, %v3989_v29 }
 0x59c   : > { %3582 = vmatprep.subr.bf16.mxu1 %v3989_v29 }
 0x59d   : > { %v3900_v28 = vpop.eup %3899 }
 0x59e   : > { %v1349_v33 = vmul.f32 %v3900_v28, %v3884_v58 }
 0x5a0   : > { %v1350_v34 = vpack.c.bf16 %v1349_v33, %v1348_v30 }
 0x5a2   : > { %3571 = vmatmul.mubr.msk.bf16.vlgmr.msra.gmra.mrb[16].mxu1 %vm965_vm11, %v1350_v34 }
 0x5a3   : > { %3594 = vmatprep.mubr.msk.bf16.mxu1 %vm3990_vm2, %v3989_v29 }
 0x65d   : > { %v1030_v35 = vpop.f32.mrb[4].mxu1 }
 0x65e   : > { %v3536_v36 = vpop.f32.mrb[5].mxu1 }
 0x65f   : > { %v1033_v37 = vpop.f32.mrb[6].mxu1 }
 0x660   : > { %v3537_v38 = vpop.f32.mrb[7].mxu1 }
 0x661   : > { %v3833_v38 = vld [vmem:[%s4751_s7] sm:$0xff]  }
 0x662   : > { %3583 = vmatpush3.bf16.msra.mxu1 %v3833_v38 }
 0x663   : > { %3584 = vmatprep.subr.bf16.mxu1 %v3989_v29 }
 0x665   : > { %v1151_v39 = vpop.f32.mrb[8].mxu1 }
 0x666   : > { %v3548_v41 = vpop.f32.mrb[9].mxu1 }
 0x667   : > { %v1154_v43 = vpop.f32.mrb[10].mxu1  ;;  %v3835_v41 = vld [vmem:[%s4751_s7 + $0x10] sm:$0xff]  }
 0x668   : > { %v3768_v45 = vpack.i.bf16 %v1154_v43, %v1151_v39  ;;  %v3549_v46 = vpop.f32.mrb[11].mxu1  ;;  %v3834_v39 = vld [vmem:[%s4751_s7 + $0x8] sm:$0xff]  }
 0x669   : > { %3585 = vmatpush3.bf16.msra.mxu1 %v3834_v39 }
 0x66a   : > { %3769 = vrot.lane.b32.xlu1 %v3768_v45, %s4777_s22  ;;  %3586 = vmatprep.subr.bf16.mxu1 %v3989_v29  ;;  %s4796_s22 = smov 96  }
 0x66d   : > { %v1271_v47 = vpop.f32.mrb[12].mxu1  ;;  %3587 = vmatpush3.bf16.msra.mxu1 %v3835_v41 }
 0x66e   : > { %v3560_v27 = vpop.f32.mrb[13].mxu1  ;;  %3588 = vmatprep.subr.bf16.mxu1 %v3989_v29 }
 0x66f   : > { %v1274_v49 = vpop.f32.mrb[14].mxu1 }
 0x670   : > { %v3773_v50 = vpack.i.bf16 %v1274_v49, %v1271_v47  ;;  %v3561_v51 = vpop.f32.mrb[15].mxu1 }
 0x671   : > { %3589 = vmatpush3.bf16.msra.mxu1 %v3836_v48 }
 0x672   : > { %3774 = vrot.lane.b32.xlu0 %v3773_v50, %s4776_s26  ;;  %v3306_v50 = vld [vmem:[%s4757_s13] ss:$0 sm:$0xff]  ;;  %3590 = vmatprep.subr.bf16.mxu1 %v3989_v29  ;;  %s4800_s26 = smov 48  }
 0x675   : > { %v1391_v52 = vpop.f32.mrb[16].mxu1 }
 0x676   : > { %v3572_v53 = vpop.f32.mrb[17].mxu1 }
 0x677   : > { %v1394_v54 = vpop.f32.mrb[18].mxu1 }
 0x678   : > { %v3778_v55 = vpack.i.bf16 %v1394_v54, %v1391_v52  ;;  %v3573_v56 = vpop.f32.mrb[19].mxu1  ;;  %v3837_v52 = vld [vmem:[%s4751_s7 + $0x20] sm:$0xff]  }
 0x679   : > { %3591 = vmatpush3.bf16.msra.mxu1 %v3837_v52 }
 0x67a   : > { %3779 = vrot.lane.b32.xlu1 %v3778_v55, %s4775_s30  ;;  %v3307_v55 = vld [vmem:[%s4758_s14] ss:$0 sm:$0xff]  ;;  %3592 = vmatprep.subr.bf16.mxu1 %v3989_v29  ;;  %s4801_s30 = smov 40  }
 0x6dc   : > { %v3770_v57 = vpop.permute.xlu1 %3769 }
 0x6dd   : > { %v3772_v59 = vunpack.i.h.bf16 %v3770_v57  ;;  %v3771_v60 = vunpack.i.l.bf16 %v3770_v57 }
 0x6df   : > { %v1423_v2 = vsel %vm720_vm5, %v1033_v37, %v3772_v59  ;;  %v1422_v3 = vsel %vm720_vm5, %v1030_v35, %v3771_v60  ;;  %v3838_v59 = vld [vmem:[%s4751_s7 + $0x28] sm:$0xff]  }
 0x6e0   : > { %3593 = vmatpush3.bf16.msra.mxu1 %v3838_v59 }
 0x6e1   : > { %3622 = vmatprep.subr.bf16.mxu1 %v3989_v29 }
 0x6e4   : > { %v3775_v58 = vpop.permute.xlu0 %3774 }
 0x6e5   : > { %v3777_v61 = vunpack.i.h.bf16 %v3775_v58  ;;  %v3776_v62 = vunpack.i.l.bf16 %v3775_v58 }
 0x6e7   : > { %v1424_v6 = vsel %vm965_vm11, %v1422_v3, %v3776_v62  ;;  %v1425_v7 = vsel %vm965_vm11, %v1423_v2, %v3777_v61  ;;  %v4347_v62 = vsel %vm789_vm13, 1.0, %v3989_v29 }
 0x6ec   : > { %v3780_v1 = vpop.permute.xlu1 %3779 }
 0x6ed   : > { %v3782_v4 = vunpack.i.h.bf16 %v3780_v1  ;;  %v3781_v5 = vunpack.i.l.bf16 %v3780_v1 }
 0x6ef   : > { %v1427_v8 = vsel %vm1426_vm12, %v1424_v6, %v3781_v5  ;;  %v1428_v9 = vsel %vm1426_vm12, %v1425_v7, %v3782_v4 }
 0x6f0   : > { %v1429_v13 = vpack.c.bf16 %v1428_v9, %v1427_v8  ;;  %v4363_v9 = vsel %vm795_vm14, 1.0, %v3989_v29 }
 0x6f2   : > { %3579 = vmatmul.mubr.msk.bf16.vlgmr.msra.gmra.mrb[20].mxu0 %vm827_vm7, %v1429_v13 }
 0x6f3   : > { %3606 = vmatprep.mubr.msk.bf16.mxu0 %vm3990_vm2, %v3989_v29 }
 0x7c5   : > { %v1490_v12 = vpop.f32.mrb[20].mxu0 }
 0x7c6   : > { %v1491_v14 = vadd.f32 %v3302_v10, %v1490_v12  ;;  %v3580_v15 = vpop.f32.mrb[21].mxu0 }
 0x7c7   : > { %v1493_v16 = vpop.f32.mrb[22].mxu0 }
 0x7c8   : > { %v1494_v17 = vadd.f32 %v3302_v10, %v1493_v16  ;;  %v3581_v18 = vpop.f32.mrb[23].mxu0  ;;  %v1497_v19 = vadd.f32 %v1491_v14, %v4186_v63 }
 0x7ca   : > { %v1501_v20 = vsel %vm827_vm7, %v1497_v19, 0.0  ;;  %v1498_v21 = vadd.f32 %v1494_v17, %v4188_v0 }
 0x7cb   : > { %1502 = vadd.xlane.f32.xlu0 %v1501_v20 }
 0x7cc   : > { %v1504_v22 = vsel %vm827_vm7, %v1498_v21, 0.0 }
 0x7cd   : > { %1505 = vadd.xlane.f32.xlu1 %v1504_v22 }
 0x858   : > { %v1503_v23 = vpop.xlane.xlu0 %1502 }
 0x859   : > { %v1508_v24 = vmul.f32 0.03125, %v1503_v23 }
 0x85a   : > { %v1506_v25 = vpop.xlane.xlu1 %1505 }
 0x85b   : > { %v1510_v28 = vsub.f32 %v1497_v19, %v1508_v24  ;;  %v1509_v30 = vmul.f32 0.03125, %v1506_v25  ;;  %v3839_v25 = vld [vmem:[%s4753_s9] sm:$0xff]  }
 0x85c   : > { %3599 = vmatpush3.bf16.msra.mxu0 %v3839_v25 }
 0x85d   : > { %v1511_v33 = vsub.f32 %v1498_v21, %v1509_v30  ;;  %v1512_v34 = vmul.f32 %v1510_v28, %v1510_v28  ;;  %3600 = vmatprep.subr.bf16.mxu0 %v3989_v29  ;;  %v3841_v30 = vld [vmem:[%s4753_s9 + $0x10] sm:$0xff]  }
 0x85f   : > { %v1514_v35 = vsel %vm827_vm7, %v1512_v34, 0.0  ;;  %v1513_v36 = vmul.f32 %v1511_v33, %v1511_v33  ;;  %v3308_v34 = vld [vmem:[%s4752_s8] ss:$0 sm:$0xff] }
 0x860   : > { %1515 = vadd.xlane.f32.xlu0 %v1514_v35 }
 0x861   : > { %v1517_v37 = vsel %vm827_vm7, %v1513_v36, 0.0 }
 0x864   : > { %1518 = vadd.xlane.f32.xlu0 %v1517_v37 }
 0x8ed   : > { %v1516_v43 = vpop.xlane.xlu0 %1515 }
 0x8ee   : > { %v1520_v44 = vmul.f32 0.03125, %v1516_v43 }
 0x8f0   : > { %v1522_v45 = vadd.f32 1e-05, %v1520_v44 }
 0x8f1   : > { %v1519_v46 = vpop.xlane.xlu0 %1518 }
 0x8f2   : > { %3901 = vrsqrt.f32 %v1522_v45  ;;  %v1521_v47 = vmul.f32 0.03125, %v1519_v46 }
 0x8f4   : > { %v1523_v27 = vadd.f32 1e-05, %v1521_v47 }
 0x8f6   : > { %3903 = vrsqrt.f32 %v1523_v27 }
 0x8fc   : > { %v3902_v49 = vpop.eup %3901 }
 0x8fd   : > { %v1526_v51 = vmul.f32 %v3902_v49, %v1510_v28  ;;  %v3840_v28 = vld [vmem:[%s4753_s9 + $0x8] sm:$0xff]  }
 0x8fe   : > { %3601 = vmatpush3.bf16.msra.mxu0 %v3840_v28 }
 0x8ff   : > { %v1534_v53 = vmul.f32 %v3306_v50, %v1526_v51  ;;  %3602 = vmatprep.subr.bf16.mxu0 %v3989_v29 }
 0x900   : > { %v3904_v54 = vpop.eup %3903 }
 0x901   : > { %v1527_v56 = vmul.f32 %v3904_v54, %v1511_v33  ;;  %v4335_v58 = vadd.f32 %v3307_v55, %v1534_v53  ;;  %v3842_v33 = vld [vmem:[%s4753_s9 + $0x18] sm:$0xff]   ;;  %v3843_v53 = vld [vmem:[%s4755_s11] sm:$0xff]   ;;  %v3844_v54 = vld [vmem:[%s4755_s11 + $0x8] sm:$0xff]  }
 0x902   : > { %3603 = vmatpush3.bf16.msra.mxu0 %v3841_v30 }
 0x903   : > { %v1535_v57 = vmul.f32 %v3306_v50, %v1527_v56  ;;  %v1544_v1 = vrot.slane %v4335_v58, 7  ;;  %v1550_v8 = vrot.slane %v4335_v58, 6  ;;  %3604 = vmatprep.subr.bf16.mxu0 %v3989_v29  ;;  %v3846_v56 = vld [vmem:[%s4755_s11 + $0x18] sm:$0xff]  }
 0x905   : > { %v4341_v60 = vadd.f32 %v3307_v55, %v1535_v57  ;;  %v3845_v55 = vld [vmem:[%s4755_s11 + $0x10] sm:$0xff]   ;;  %v3316_v57 = vld [vmem:[%s4754_s10] ss:$0 sm:$0xff] }
 0x906   : > { %3605 = vmatpush3.bf16.msra.mxu0 %v3842_v33 }
 0x907   : > { %v3788_v61 = vpack.i.bf16 %v4341_v60, %v4335_v58  ;;  %v1545_v2 = vrot.slane %v4341_v60, 7  ;;  %v1551_v7 = vrot.slane %v4341_v60, 6  ;;  %3610 = vmatprep.subr.bf16.mxu0 %v3989_v29 }
 0x909   : > { %3789 = vrot.lane.b32.xlu0 %v3788_v61, %s3998_s4  ;;  %v1547_v3 = vsel %vm694_vm4, %v1545_v2, %v1544_v1  ;;  %v1546_v5 = vsel %vm694_vm4, %v1544_v1, %v1545_v2  ;;  %v1554_v13 = vsel %vm1552_vm15, %v1551_v7, %v1550_v8  ;;  %v1553_v19 = vsel %vm1552_vm15, %v1550_v8, %v1551_v7 }
 0x90a   : > { %v1548_v4 = vmul.f32 %v4347_v62, %v1547_v3  ;;  %v1555_v14 = vmul.f32 %v4363_v9, %v1554_v13 }
 0x90c   : > { %v3783_v6 = vpack.i.bf16 %v1546_v5, %v1548_v4 }
 0x90e   : > { %3784 = vrot.lane.b32.xlu1 %v3783_v6, %s4782_s27 }
 0x97b   : > { %v3790_v10 = vpop.permute.xlu0 %3789 }
 0x97c   : > { %v3792_v17 = vunpack.i.h.bf16 %v3790_v10  ;;  %v3791_v18 = vunpack.i.l.bf16 %v3790_v10 }
 0x980   : > { %v3785_v12 = vpop.permute.xlu1 %3784 }
 0x981   : > { %v3787_v15 = vunpack.i.h.bf16 %v3785_v12  ;;  %v3786_v16 = vunpack.i.l.bf16 %v3785_v12 }
 0x983   : > { %v1574_v20 = vsel %vm827_vm7, %v1553_v19, %v3787_v15  ;;  %v1573_v21 = vsel %vm827_vm7, %v1555_v14, %v3786_v16  ;;  %v3322_v14 = vld [vmem:[%s4756_s12] ss:$0 sm:$0xff] }
 0x984   : > { %v1577_v22 = vsel %vm1575_vm1, %v1574_v20, %v3792_v17  ;;  %v1576_v23 = vsel %vm1575_vm1, %v1573_v21, %v3791_v18 }
 0x985   : > { %v1578_v24 = vpack.c.bf16 %v1577_v22, %v1576_v23 }
 0x987   : > { %3595 = vmatmul.mubr.msk.bf16.vlgmr.msra.gmra.mrb[20].mxu1 %vm1634_vm3, %v1578_v24 }
 0x988   : > { %3626 = vmatprep.mubr.msk.bf16.mxu1 %vm3990_vm2, %v3989_v29 }
 0xa5a   : > { %v1672_v35 = vpop.f32.mrb[20].mxu1 }
 0xa5b   : > { %v1673_v36 = vadd.f32 %v3308_v34, %v1672_v35  ;;  %v3596_v37 = vpop.f32.mrb[21].mxu1 }
 0xa5c   : > { %v1675_v38 = vpop.f32.mrb[22].mxu1 }
 0xa5d   : > { %v1681_v39 = vmul.f32 0.70710677, %v1673_v36  ;;  %v1676_v41 = vadd.f32 %v3308_v34, %v1675_v38  ;;  %v3597_v43 = vpop.f32.mrb[23].mxu1  ;;  %v1679_v27 = vmul.f32 0.5, %v1673_v36 }
 0xa5f   : > { %3905 = verf.f32 %v1681_v39  ;;  %v1682_v44 = vmul.f32 0.70710677, %v1676_v41  ;;  %v1680_v48 = vmul.f32 0.5, %v1676_v41 }
 0xa61   : > { %3907 = verf.f32 %v1682_v44 }
 0xa69   : > { %v3906_v45 = vpop.eup %3905 }
 0xa6a   : > { %v1685_v46 = vadd.f32 1.0, %v3906_v45 }
 0xa6b   : > { %v3908_v47 = vpop.eup %3907 }
 0xa6c   : > { %v1686_v49 = vadd.f32 1.0, %v3908_v47  ;;  %v1687_v50 = vmul.f32 %v1685_v46, %v1679_v27 }
 0xa6e   : > { %v1688_v51 = vmul.f32 %v1686_v49, %v1680_v48 }
 0xa70   : > { %v1689_v52 = vpack.c.bf16 %v1688_v51, %v1687_v50 }
 0xa72   : > { %3607 = vmatmul.mubr.msk.bf16.vlgmr.msra.gmra.mrb[24].mxu0 %vm1575_vm1, %v1689_v52 }
 0xa73   : > { %3618 = vmatprep.mubr.msk.bf16.mxu0 %vm3990_vm2, %v3989_v29  ;;  %3611 = vmatpush3.bf16.msra.mxu0 %v3843_v53 }
 0xa74   : > { %3612 = vmatprep.subr.bf16.mxu0 %v3989_v29 }
 0xa77   : > { %3613 = vmatpush3.bf16.msra.mxu0 %v3844_v54 }
 0xa78   : > { %3614 = vmatprep.subr.bf16.mxu0 %v3989_v29 }
 0xa7b   : > { %3615 = vmatpush3.bf16.msra.mxu0 %v3845_v55 }
 0xa7c   : > { %3616 = vmatprep.subr.bf16.mxu0 %v3989_v29 }
 0xa7f   : > { %3617 = vmatpush3.bf16.msra.mxu0 %v3846_v56 }
 0xa80   : > { %3636 = vmatprep.subr.bf16.mxu0 %v3989_v29 }
 0xb45   : > { %v1766_v59 = vpop.f32.mrb[24].mxu0 }
 0xb46   : > { %v3608_v61 = vpop.f32.mrb[25].mxu0  ;;  %v1767_v2 = vadd.f32 %v3316_v57, %v1766_v59 }
 0xb47   : > { %v1769_v1 = vpop.f32.mrb[26].mxu0 }
 0xb48   : > { %v1770_v3 = vadd.f32 %v3316_v57, %v1769_v1  ;;  %v3609_v4 = vpop.f32.mrb[27].mxu0  ;;  %v3330_v1 = vld [vmem:[%s4759_s15] ss:$0 sm:$0xff] }
 0xb49   : > { %v3331_v4 = vld [vmem:[%s4760_s16] ss:$0 sm:$0xff] }
 0xb4a   : > { %v3793_v5 = vpack.i.bf16 %v1770_v3, %v1767_v2 }
 0xb4c   : > { %3794 = vrot.lane.b32.xlu1 %v3793_v5, %s4782_s27  ;;  %s4806_s27 = smov 32  }
 0xbbe   : > { %v3795_v6 = vpop.permute.xlu1 %3794 }
 0xbbf   : > { %v3797_v7 = vunpack.i.h.bf16 %v3795_v6  ;;  %v3796_v8 = vunpack.i.l.bf16 %v3795_v6 }
 0xbc1   : > { %v1782_v13 = vsel %vm827_vm7, %v4341_v60, %v3797_v7  ;;  %v1781_v10 = vsel %vm827_vm7, %v4335_v58, %v3796_v8 }
 0xbc2   : > { %v1783_v12 = vpack.c.bf16 %v1782_v13, %v1781_v10 }
 0xbc4   : > { %3619 = vmatmul.mubr.msk.bf16.vlgmr.msra.gmra.mrb[28].mxu0 %vm1575_vm1, %v1783_v12 }
 0xbc5   : > { %3638 = vmatprep.mubr.msk.bf16.mxu0 %vm3990_vm2, %v3989_v29 }
 0xc97   : > { %v1860_v15 = vpop.f32.mrb[28].mxu0 }
 0xc98   : > { %v1861_v16 = vadd.f32 %v3322_v14, %v1860_v15  ;;  %v3620_v17 = vpop.f32.mrb[29].mxu0 }
 0xc99   : > { %v1863_v18 = vpop.f32.mrb[30].mxu0 }
 0xc9a   : > { %v3328_v19 = vmul.f32 -1.442695, %v1861_v16  ;;  %v1864_v20 = vadd.f32 %v3322_v14, %v1863_v18  ;;  %v3621_v21 = vpop.f32.mrb[31].mxu0 }
 0xc9c   : > { %3909 = vpow2.f32 %v3328_v19  ;;  %v3329_v22 = vmul.f32 -1.442695, %v1864_v20 }
 0xc9e   : > { %3911 = vpow2.f32 %v3329_v22 }
 0xca6   : > { %v3910_v23 = vpop.eup %3909 }
 0xca7   : > { %v1873_v24 = vadd.f32 1.0, %v3910_v23 }
 0xca8   : > { %v3912_v25 = vpop.eup %3911 }
 0xca9   : > { %3913 = vrcp.f32 %v1873_v24  ;;  %v1874_v28 = vadd.f32 1.0, %v3912_v25  ;;  %v3847_v24 = vld [vmem:[%s4792_s24 + $0x10] sm:$0xff]   ;;  %v3848_v25 = vld [vmem:[%s4792_s24 + $0x18] sm:$0xff]  }
 0xcaa   : > { %3623 = vmatpush3.bf16.msra.mxu1 %v3847_v24 }
 0xcab   : > { %3915 = vrcp.f32 %v1874_v28  ;;  %3624 = vmatprep.subr.bf16.mxu1 %v3989_v29 }
 0xcae   : > { %3625 = vmatpush3.bf16.msra.mxu1 %v3848_v25 }
 0xcaf   : > { %3630 = vmatprep.subr.bf16.mxu1 %v3989_v29 }
 0xcb3   : > { %v3914_v30 = vpop.eup %3913 }
 0xcb4   : > { %v1881_v33 = vsub.f32 1.0, %v3914_v30  ;;  %v1879_v35 = vmul.f32 %v3914_v30, %v4335_v58 }
 0xcb5   : > { %v3916_v34 = vpop.eup %3915 }
 0xcb6   : > { %v1883_v36 = vmul.f32 %v1881_v33, %v1767_v2  ;;  %v1882_v37 = vsub.f32 1.0, %v3916_v34  ;;  %v1880_v39 = vmul.f32 %v3916_v34, %v4341_v60 }
 0xcb8   : > { %v1885_v38 = vadd.f32 %v1883_v36, %v1879_v35  ;;  %v1884_v41 = vmul.f32 %v1882_v37, %v1770_v3 }
 0xcba   : > { %v1887_v43 = vadd.f32 %v1885_v38, %v4186_v63  ;;  %v1886_v44 = vadd.f32 %v1884_v41, %v1880_v39  ;;  %v4458_v38 = vld [vmem:[%s4761_s17] ss:$0 sm:$0xff] }
 0xcbc   : > { %v1891_v45 = vsel %vm827_vm7, %v1887_v43, 0.0  ;;  %v1888_v46 = vadd.f32 %v1886_v44, %v4188_v0 }
 0xcbd   : > { %1892 = vadd.xlane.f32.xlu1 %v1891_v45  ;;  %v4464_v45 = vld [vmem:[%s4762_s18] ss:$0 sm:$0xff] }
 0xcbe   : > { %v1894_v47 = vsel %vm827_vm7, %v1888_v46, 0.0 }
 0xcbf   : > { %1895 = vadd.xlane.f32.xlu0 %v1894_v47 }
 0xd4a   : > { %v1893_v27 = vpop.xlane.xlu1 %1892 }
 0xd4b   : > { %v1897_v48 = vmul.f32 0.03125, %v1893_v27 }
 0xd4c   : > { %v1896_v58 = vpop.xlane.xlu0 %1895 }
 0xd4d   : > { %v1899_v49 = vsub.f32 %v1887_v43, %v1897_v48  ;;  %v1898_v50 = vmul.f32 0.03125, %v1896_v58  ;;  %v3339_v58 = vld [vmem:[%s4794_s1 + $0x1] ss:$0 sm:$0xff] }
 0xd4f   : > { %v1900_v51 = vsub.f32 %v1888_v46, %v1898_v50  ;;  %v1901_v52 = vmul.f32 %v1899_v49, %v1899_v49 }
 0xd51   : > { %v1903_v60 = vsel %vm827_vm7, %v1901_v52, 0.0  ;;  %v1902_v53 = vmul.f32 %v1900_v51, %v1900_v51 }
 0xd52   : > { %1904 = vadd.xlane.f32.xlu0 %v1903_v60 }
 0xd53   : > { %v1906_v63 = vsel %vm827_vm7, %v1902_v53, 0.0 }
 0xd54   : > { %1907 = vadd.xlane.f32.xlu1 %v1906_v63 }
 0xddf   : > { %v1905_v54 = vpop.xlane.xlu0 %1904 }
 0xde0   : > { %v1909_v0 = vmul.f32 0.03125, %v1905_v54 }
 0xde1   : > { %v1908_v55 = vpop.xlane.xlu1 %1907 }
 0xde2   : > { %v1911_v56 = vadd.f32 1e-05, %v1909_v0  ;;  %v1910_v57 = vmul.f32 0.03125, %v1908_v55 }
 0xde4   : > { %3917 = vrsqrt.f32 %v1911_v56  ;;  %v1912_v59 = vadd.f32 1e-05, %v1910_v57 }
 0xde6   : > { %3919 = vrsqrt.f32 %v1912_v59 }
 0xdee   : > { %v3918_v61 = vpop.eup %3917 }
 0xdef   : > { %v1915_v2 = vmul.f32 %v3918_v61, %v1899_v49 }
 0xdf0   : > { %v3920_v3 = vpop.eup %3919 }
 0xdf1   : > { %v1923_v5 = vmul.f32 %v3330_v1, %v1915_v2  ;;  %v1916_v6 = vmul.f32 %v3920_v3, %v1900_v51 }
 0xdf3   : > { %v1931_v7 = vadd.f32 %v3331_v4, %v1923_v5  ;;  %v1924_v8 = vmul.f32 %v3330_v1, %v1916_v6 }
 0xdf5   : > { %v1933_v13 = vsel %vm827_vm7, %v1931_v7, 0.0  ;;  %v1932_v10 = vadd.f32 %v3331_v4, %v1924_v8 }
 0xdf6   : > { %1934 = vadd.xlane.f32.xlu0 %v1933_v13 }
 0xdf7   : > { %v1936_v12 = vsel %vm827_vm7, %v1932_v10, 0.0 }
 0xdf8   : > { %1937 = vadd.xlane.f32.xlu1 %v1936_v12 }
 0xe83   : > { %v1935_v14 = vpop.xlane.xlu0 %1934 }
 0xe84   : > { %v1939_v15 = vmul.f32 0.03125, %v1935_v14 }
 0xe85   : > { %v1938_v16 = vpop.xlane.xlu1 %1937 }
 0xe86   : > { %v1941_v17 = vsub.f32 %v1931_v7, %v1939_v15  ;;  %v1940_v18 = vmul.f32 0.03125, %v1938_v16 }
 0xe88   : > { %v1942_v19 = vsub.f32 %v1932_v10, %v1940_v18  ;;  %v1943_v20 = vmul.f32 %v1941_v17, %v1941_v17 }
 0xe8a   : > { %v1945_v21 = vsel %vm827_vm7, %v1943_v20, 0.0  ;;  %v1944_v22 = vmul.f32 %v1942_v19, %v1942_v19 }
 0xe8b   : > { %1946 = vadd.xlane.f32.xlu0 %v1945_v21 }
 0xe8c   : > { %v1948_v23 = vsel %vm827_vm7, %v1944_v22, 0.0 }
 0xe8d   : > { %1949 = vadd.xlane.f32.xlu1 %v1948_v23 }
 0xf18   : > { %v1947_v28 = vpop.xlane.xlu0 %1946 }
 0xf19   : > { %v1951_v30 = vmul.f32 0.03125, %v1947_v28 }
 0xf1a   : > { %v1950_v33 = vpop.xlane.xlu1 %1949 }
 0xf1b   : > { %v1953_v34 = vadd.f32 1e-05, %v1951_v30  ;;  %v1952_v35 = vmul.f32 0.03125, %v1950_v33 }
 0xf1d   : > { %3921 = vrsqrt.f32 %v1953_v34  ;;  %v1954_v36 = vadd.f32 1e-05, %v1952_v35 }
 0xf1f   : > { %3923 = vrsqrt.f32 %v1954_v36 }
 0xf27   : > { %v3922_v37 = vpop.eup %3921 }
 0xf28   : > { %v1957_v39 = vmul.f32 %v3922_v37, %v1941_v17 }
 0xf29   : > { %v3924_v41 = vpop.eup %3923 }
 0xf2a   : > { %v1965_v43 = vmul.f32 %v4458_v38, %v1957_v39  ;;  %v1958_v44 = vmul.f32 %v3924_v41, %v1942_v19 }
 0xf2c   : > { %v1966_v46 = vmul.f32 %v4458_v38, %v1958_v44  ;;  %v4468_v47 = vadd.f32 %v4464_v45, %v1965_v43 }
 0xf2e   : > { %v4471_v27 = vadd.f32 %v4464_v45, %v1966_v46 }
 0xf30   : > { %v1975_v48 = vpack.c.bf16 %v4471_v27, %v4468_v47 }
 0xf32   : > { %3627 = vmatmul.mubr.msk.bf16.vlgmr.msra.gmra.mrb[24].mxu1 %vm827_vm7, %v1975_v48 }
 0xf33   : > { %3632 = vmatprep.mubr.msk.bf16.mxu1 %vm3990_vm2, %v3989_v29 }
0x1005   : > { %v2038_v49 = vpop.f32.mrb[24].mxu1 }
0x1006   : > { %v2039_v50 = vadd.f32 %v3339_v58, %v2038_v49  ;;  %v3628_v51 = vpop.f32.mrb[25].mxu1 }
0x1007   : > { %v2041_v52 = vpop.f32.mrb[26].mxu1 }
0x1008   : > { %v2042_v60 = vadd.f32 %v3339_v58, %v2041_v52  ;;  %2049 = vrot.lane.b32.xlu0 %v2039_v50, %s4796_s22  ;;  %v3629_v53 = vpop.f32.mrb[27].mxu1  ;;  %v2045_v63 = vmul.f32 0.35355338, %v2039_v50 }
0x100a   : > { %v2046_v54 = vmul.f32 0.35355338, %v2042_v60  ;;  %v4482_v0 = vpack.c.bf16 %v2042_v60, %v2039_v50  ;;  %2051 = vrot.lane.b32.xlu1 %v2042_v60, %s4796_s22 }
0x100c   : > { %v2088_v55 = vpack.c.bf16 %v2046_v54, %v2045_v63 }
0x100e   : > { %2330 = vrot.lane.b32.xlu0 %v2088_v55, %s4797_s3  ;;  %2210 = vrot.lane.b32.xlu1 %v2088_v55, %s4798_s29  ;;  %s4803_s29 = smov 8   ;;  %s4807_s3 = sshll.u32 %s4809_s25, 4 }
0x1012   : > { %2450 = vrot.lane.b32.xlu0 %v2088_v55, %s4799_s5  ;;  %s656_s5 = scalar_lea.vmem %s4765_s21, %s4807_s3 }
0x107a   : > { %v2050_v56 = vpop.permute.xlu0 %2049 }
0x107b   : > { %2055 = vxpose.xlu1.b32.start [1/2] (short) (narrow) %v2050_v56, 32 }
0x107c   : > { %v2052_v57 = vpop.permute.xlu1 %2051 }
0x107f   : > { %2056 = vxpose.xlu1.b32.end [2/2] (short) (narrow) %v2052_v57, 32 }
0x1080   : > { %v2211_v59 = vpop.permute.xlu1 %2210  ;;  %v2331_v14 = vpop.permute.xlu0 %2330 }
0x1084   : > { %v2451_v15 = vpop.permute.xlu0 %2450 }
0x10fb   : > { %v2071_v61 = vpop.trf.xlu1 }
0x10fc   : > { %v2089_v1 = vpack.c.bf16 %v2071_v61, %v2071_v61 }
0x10fe   : > { %v2094_v2 = vsel %vm920_vm8, %v2089_v1, 0 }
0x10ff   : > { %3631 = vmatpush3.bf16.msra.mxu1 %v2094_v2  ;;  %v2072_v3 = vpop.trf.xlu1 }
0x1100   : > { %v2208_v4 = vpack.c.bf16 %v2072_v3, %v2072_v3  ;;  %3642 = vmatprep.subr.bf16.mxu1 %v3989_v29 }
0x1102   : > { %3633 = vmatmul.mubr.msk.bf16.vlgmr.msra.gmra.mrb[28].mxu1 %vm720_vm5, %v2088_v55  ;;  %v2216_v5 = vsel %vm920_vm8, %v2208_v4, 0 }
0x1103   : > { %3643 = vmatpush3.bf16.msra.mxu1 %v2216_v5  ;;  %3644 = vmatprep.mubr.msk.bf16.mxu1 %vm3990_vm2, %v3989_v29  ;;  %v2073_v6 = vpop.trf.xlu1 }
0x1104   : > { %v2329_v7 = vpack.c.bf16 %v2073_v6, %v2073_v6  ;;  %3654 = vmatprep.subr.bf16.mxu1 %v3989_v29 }
0x1106   : > { %v2336_v8 = vsel %vm920_vm8, %v2329_v7, 0 }
0x1107   : > { %v2074_v13 = vpop.trf.xlu1 }
0x1108   : > { %v2449_v10 = vpack.c.bf16 %v2074_v13, %v2074_v13 }
0x110a   : > { %3645 = vmatmul.mubr.msk.bf16.vlgmr.msra.gmra.mrb[32].mxu1 %vm720_vm5, %v2211_v59  ;;  %v2456_v12 = vsel %vm920_vm8, %v2449_v10, 0 }
0x110b   : > { %3655 = vmatpush3.bf16.msra.mxu1 %v2336_v8  ;;  %3656 = vmatprep.mubr.msk.bf16.mxu1 %vm3990_vm2, %v3989_v29 }
0x110c   : > { %3666 = vmatprep.subr.bf16.mxu1 %v3989_v29 }
0x1112   : > { %3657 = vmatmul.mubr.msk.bf16.vlgmr.msra.gmra.mrb[36].mxu1 %vm720_vm5, %v2331_v14 }
0x1113   : > { %3667 = vmatpush3.bf16.msra.mxu1 %v2456_v12  ;;  %3668 = vmatprep.mubr.msk.bf16.mxu1 %vm3990_vm2, %v3989_v29 }
0x1114   : > { %3678 = vmatprep.subr.bf16.mxu1 %v3989_v29 }
0x111a   : > { %3669 = vmatmul.mubr.msk.bf16.vlgmr.msra.gmra.mrb[40].mxu1 %vm720_vm5, %v2451_v15 }
0x111b   : > { %3682 = vmatprep.mubr.msk.bf16.mxu1 %vm3990_vm2, %v3989_v29 }
0x11d5   : > { %v2130_v16 = vpop.f32.mrb[28].mxu1 }
0x11d6   : > { %v2131_v17 = vadd.f32 %v2130_v16, %v4228_v40  ;;  %v3634_v18 = vpop.f32.mrb[29].mxu1 }
0x11d7   : > { %v2133_v19 = vpop.f32.mrb[30].mxu1 }
0x11d8   : > { %v2134_v20 = vadd.f32 %v2133_v19, %v4230_v42  ;;  %v3635_v21 = vpop.f32.mrb[31].mxu1  ;;  %v2137_v22 = vsel %vm965_vm11, %v2131_v17, -inf }
0x11d9   : > { %2138 = vmax.xlane.f32.xlu0 %v2137_v22 }
0x11da   : > { %v2140_v23 = vsel %vm965_vm11, %v2134_v20, -inf }
0x11dd   : > { %2141 = vmax.xlane.f32.xlu0 %v2140_v23  ;;  %v2252_v24 = vpop.f32.mrb[32].mxu1 }
0x11de   : > { %v2253_v25 = vadd.f32 %v2252_v24, %v4228_v40  ;;  %v3646_v28 = vpop.f32.mrb[33].mxu1 }
0x11df   : > { %v2255_v30 = vpop.f32.mrb[34].mxu1 }
0x11e0   : > { %v2256_v33 = vadd.f32 %v2255_v30, %v4230_v42  ;;  %v3647_v34 = vpop.f32.mrb[35].mxu1  ;;  %v2259_v35 = vsel %vm965_vm11, %v2253_v25, -inf }
0x11e1   : > { %2260 = vmax.xlane.f32.xlu0 %v2259_v35 }
0x11e2   : > { %v2262_v36 = vsel %vm965_vm11, %v2256_v33, -inf }
0x11e3   : > { %2263 = vmax.xlane.f32.xlu1 %v2262_v36 }
0x11e5   : > { %v2372_v37 = vpop.f32.mrb[36].mxu1 }
0x11e6   : > { %v2373_v39 = vadd.f32 %v2372_v37, %v4228_v40  ;;  %v3658_v41 = vpop.f32.mrb[37].mxu1 }
0x11e7   : > { %v2375_v43 = vpop.f32.mrb[38].mxu1 }
0x11e8   : > { %v2376_v44 = vadd.f32 %v2375_v43, %v4230_v42  ;;  %v3659_v46 = vpop.f32.mrb[39].mxu1  ;;  %v2379_v48 = vsel %vm965_vm11, %v2373_v39, -inf }
0x11e9   : > { %2380 = vmax.xlane.f32.xlu0 %v2379_v48 }
0x11ea   : > { %v2382_v58 = vsel %vm965_vm11, %v2376_v44, -inf }
0x11ed   : > { %2383 = vmax.xlane.f32.xlu0 %v2382_v58  ;;  %v2492_v49 = vpop.f32.mrb[40].mxu1 }
0x11ee   : > { %v2493_v50 = vadd.f32 %v2492_v49, %v4228_v40  ;;  %v3670_v51 = vpop.f32.mrb[41].mxu1 }
0x11ef   : > { %v2495_v52 = vpop.f32.mrb[42].mxu1 }
0x11f0   : > { %v2496_v60 = vadd.f32 %v2495_v52, %v4230_v42  ;;  %v3671_v53 = vpop.f32.mrb[43].mxu1  ;;  %v2499_v63 = vsel %vm965_vm11, %v2493_v50, -inf }
0x11f1   : > { %2500 = vmax.xlane.f32.xlu0 %v2499_v63 }
0x11f2   : > { %v2502_v54 = vsel %vm965_vm11, %v2496_v60, -inf }
0x11f4   : > { %2161 = vrot.lane.b32.xlu1 %v4482_v0, %s3998_s4 }
0x11f5   : > { %2503 = vmax.xlane.f32.xlu0 %v2502_v54 }
0x11f8   : > { %2402 = vrot.lane.b32.xlu1 %v4482_v0, %s4800_s26 }
0x11fc   : > { %2522 = vrot.lane.b32.xlu1 %v4482_v0, %s4801_s30  ;;  %s4804_s30 = smov 16  }
0x1266   : > { %v2139_v40 = vpop.xlane.xlu0 %2138 }
0x1267   : > { %v2143_v55 = vsub.f32 %v2131_v17, %v2139_v40 }
0x1269   : > { %v2145_v56 = vmul.f32 1.442695, %v2143_v55 }
0x126a   : > { %v2142_v42 = vpop.xlane.xlu0 %2141 }
0x126b   : > { %3925 = vpow2.f32 %v2145_v56  ;;  %v2144_v57 = vsub.f32 %v2134_v20, %v2142_v42 }
0x126d   : > { %v2147_v59 = vmul.f32 1.442695, %v2144_v57 }
0x126e   : > { %v2261_v61 = vpop.xlane.xlu0 %2260 }
0x126f   : > { %3927 = vpow2.f32 %v2147_v59  ;;  %v2265_v1 = vsub.f32 %v2253_v25, %v2261_v61 }
0x1270   : > { %v2264_v2 = vpop.xlane.xlu1 %2263 }
0x1271   : > { %v2267_v3 = vmul.f32 1.442695, %v2265_v1  ;;  %v2266_v4 = vsub.f32 %v2256_v33, %v2264_v2 }
0x1273   : > { %3929 = vpow2.f32 %v2267_v3  ;;  %v2269_v5 = vmul.f32 1.442695, %v2266_v4 }
0x1274   : > { %v2162_v6 = vpop.permute.xlu1 %2161 }
0x1275   : > { %v3926_v7 = vpop.eup %3925  ;;  %3931 = vpow2.f32 %v2269_v5  ;;  %3637 = vmatpush3.bf16.msra.mxu0 %v2162_v6 }
0x1276   : > { %v2381_v8 = vpop.xlane.xlu0 %2380  ;;  %v2149_v13 = vsel %vm965_vm11, %v3926_v7, 0.0  ;;  %3648 = vmatprep.subr.bf16.mxu0 %v3989_v29 }
0x1277   : > { %v2385_v10 = vsub.f32 %v2373_v39, %v2381_v8  ;;  %2150 = vadd.xlane.f32.xlu0 %v2149_v13 }
0x1278   : > { %v2403_v2 = vpop.permute.xlu1 %2402 }
0x1279   : > { %v3928_v12 = vpop.eup %3927  ;;  %v2387_v14 = vmul.f32 1.442695, %v2385_v10 }
0x127a   : > { %v2384_v15 = vpop.xlane.xlu0 %2383  ;;  %v2152_v16 = vsel %vm965_vm11, %v3928_v12, 0.0 }
0x127b   : > { %3933 = vpow2.f32 %v2387_v14  ;;  %v2386_v17 = vsub.f32 %v2376_v44, %v2384_v15  ;;  %2153 = vadd.xlane.f32.xlu0 %v2152_v16 }
0x127c   : > { %v2523_v8 = vpop.permute.xlu1 %2522 }
0x127d   : > { %v3930_v18 = vpop.eup %3929  ;;  %v2389_v19 = vmul.f32 1.442695, %v2386_v17 }
0x127e   : > { %v2501_v20 = vpop.xlane.xlu0 %2500  ;;  %v2271_v21 = vsel %vm965_vm11, %v3930_v18, 0.0 }
0x127f   : > { %v3932_v22 = vpop.eup %3931  ;;  %3935 = vpow2.f32 %v2389_v19  ;;  %v2505_v23 = vsub.f32 %v2493_v50, %v2501_v20  ;;  %2272 = vadd.xlane.f32.xlu0 %v2271_v21 }
0x1280   : > { %v2274_v28 = vsel %vm965_vm11, %v3932_v22, 0.0 }
0x1281   : > { %v2507_v24 = vmul.f32 1.442695, %v2505_v23 }
0x1282   : > { %v2504_v25 = vpop.xlane.xlu0 %2503 }
0x1283   : > { %3937 = vpow2.f32 %v2507_v24  ;;  %v2506_v30 = vsub.f32 %v2496_v60, %v2504_v25  ;;  %2275 = vadd.xlane.f32.xlu0 %v2274_v28 }
0x1285   : > { %v3934_v33 = vpop.eup %3933  ;;  %v2509_v34 = vmul.f32 1.442695, %v2506_v30  ;;  %v3850_v30 = vld [vmem:[%s4795_s23 + $0x18] sm:$0xff]  }
0x1286   : > { %v2391_v35 = vsel %vm965_vm11, %v3934_v33, 0.0 }
0x1287   : > { %3939 = vpow2.f32 %v2509_v34  ;;  %2392 = vadd.xlane.f32.xlu0 %v2391_v35 }
0x1289   : > { %v3936_v36 = vpop.eup %3935 }
0x128a   : > { %v2394_v37 = vsel %vm965_vm11, %v3936_v36, 0.0 }
0x128b   : > { %2395 = vadd.xlane.f32.xlu0 %v2394_v37 }
0x128d   : > { %v3938_v39 = vpop.eup %3937 }
0x128e   : > { %v2511_v41 = vsel %vm965_vm11, %v3938_v39, 0.0 }
0x128f   : > { %2512 = vadd.xlane.f32.xlu0 %v2511_v41 }
0x1291   : > { %v3940_v43 = vpop.eup %3939 }
0x1292   : > { %v2514_v44 = vsel %vm965_vm11, %v3940_v43, 0.0 }
0x1293   : > { %2515 = vadd.xlane.f32.xlu0 %v2514_v44 }
0x12a9   : > { %2282 = vrot.lane.b32.xlu0 %v4482_v0, %s4802_s28  ;;  %s4805_s28 = smov 24  }
0x1304   : > { %v2151_v46 = vpop.xlane.xlu0 %2150 }
0x1305   : > { %3941 = vrcp.f32 %v2151_v46 }
0x1308   : > { %v2154_v48 = vpop.xlane.xlu0 %2153 }
0x1309   : > { %3943 = vrcp.f32 %v2154_v48 }
0x130c   : > { %v2273_v58 = vpop.xlane.xlu0 %2272 }
0x130f   : > { %v3942_v50 = vpop.eup %3941 }
0x1310   : > { %v2276_v49 = vpop.xlane.xlu0 %2275  ;;  %v2157_v52 = vmul.f32 %v3942_v50, %v3926_v7 }
0x1311   : > { %3945 = vrcp.f32 %v2276_v49 }
0x1312   : > { %3947 = vrcp.f32 %v2273_v58 }
0x1313   : > { %v3944_v51 = vpop.eup %3943 }
0x1314   : > { %v2158_v60 = vmul.f32 %v3944_v51, %v3928_v12  ;;  %v2393_v53 = vpop.xlane.xlu0 %2392 }
0x1316   : > { %v2159_v63 = vpack.c.bf16 %v2158_v60, %v2157_v52 }
0x1318   : > { %3639 = vmatmul.mubr.msk.bf16.vlgmr.msra.gmra.mrb[32].mxu0 %vm965_vm11, %v2159_v63  ;;  %v2396_v54 = vpop.xlane.xlu0 %2395 }
0x1319   : > { %3650 = vmatprep.mubr.msk.bf16.mxu0 %vm3990_vm2, %v3989_v29  ;;  %3949 = vrcp.f32 %v2396_v54 }
0x131a   : > { %3951 = vrcp.f32 %v2393_v53 }
0x131b   : > { %v3946_v40 = vpop.eup %3945 }
0x131c   : > { %v2513_v0 = vpop.xlane.xlu0 %2512  ;;  %v3948_v56 = vpop.eup %3947  ;;  %v2280_v42 = vmul.f32 %v3946_v40, %v3932_v22  ;;  %v3849_v22 = vld [vmem:[%s4795_s23 + $0x10] sm:$0xff]  }
0x131d   : > { %v2279_v57 = vmul.f32 %v3948_v56, %v3930_v18  ;;  %3679 = vmatpush3.bf16.msra.mxu1 %v3849_v22  ;;  %v3853_v22 = vld [vmem:[%s4751_s7 + $0x40] sm:$0xff]  }
0x131e   : > { %3680 = vmatprep.subr.bf16.mxu1 %v3989_v29 }
0x131f   : > { %v2281_v61 = vpack.c.bf16 %v2280_v42, %v2279_v57  ;;  %v3356_v42 = vld [vmem:[%s4750_s6 + $0x1] ss:$0 sm:$0xff] }
0x1320   : > { %v2516_v55 = vpop.xlane.xlu0 %2515 }
0x1321   : > { %3953 = vrcp.f32 %v2516_v55  ;;  %3681 = vmatpush3.bf16.msra.mxu1 %v3850_v30 }
0x1322   : > { %3955 = vrcp.f32 %v2513_v0  ;;  %3702 = vmatprep.subr.bf16.mxu1 %v3989_v29 }
0x1323   : > { %v3950_v1 = vpop.eup %3949 }
0x1324   : > { %v2283_v59 = vpop.permute.xlu0 %2282  ;;  %v3952_v3 = vpop.eup %3951  ;;  %v2400_v4 = vmul.f32 %v3950_v1, %v3936_v36 }
0x1325   : > { %3649 = vmatpush3.bf16.msra.mxu0 %v2283_v59  ;;  %v2399_v5 = vmul.f32 %v3952_v3, %v3934_v33 }
0x1326   : > { %3660 = vmatprep.subr.bf16.mxu0 %v3989_v29 }
0x1327   : > { %v2401_v6 = vpack.c.bf16 %v2400_v4, %v2399_v5 }
0x1328   : > { %3651 = vmatmul.mubr.msk.bf16.vlgmr.msra.gmra.mrb[36].mxu0 %vm965_vm11, %v2281_v61 }
0x1329   : > { %3661 = vmatpush3.bf16.msra.mxu0 %v2403_v2  ;;  %3662 = vmatprep.mubr.msk.bf16.mxu0 %vm3990_vm2, %v3989_v29 }
0x132a   : > { %3672 = vmatprep.subr.bf16.mxu0 %v3989_v29 }
0x132b   : > { %v3954_v7 = vpop.eup %3953 }
0x132c   : > { %v3956_v13 = vpop.eup %3955  ;;  %v2520_v10 = vmul.f32 %v3954_v7, %v3940_v43 }
0x132d   : > { %v2519_v12 = vmul.f32 %v3956_v13, %v3938_v39 }
0x132f   : > { %v2521_v14 = vpack.c.bf16 %v2520_v10, %v2519_v12 }
0x1330   : > { %3663 = vmatmul.mubr.msk.bf16.vlgmr.msra.gmra.mrb[40].mxu0 %vm965_vm11, %v2401_v6 }
0x1331   : > { %3673 = vmatpush3.bf16.msra.mxu0 %v2523_v8  ;;  %3674 = vmatprep.mubr.msk.bf16.mxu0 %vm3990_vm2, %v3989_v29 }
0x1332   : > { %3686 = vmatprep.subr.bf16.mxu0 %v3989_v29 }
0x1338   : > { %3675 = vmatmul.mubr.msk.bf16.vlgmr.msra.gmra.mrb[44].mxu0 %vm965_vm11, %v2521_v14 }
0x1339   : > { %3698 = vmatprep.mubr.msk.bf16.mxu0 %vm3990_vm2, %v3989_v29 }
0x13eb   : > { %v2201_v15 = vpop.f32.mrb[32].mxu0 }
0x13ec   : > { %v3640_v16 = vpop.f32.mrb[33].mxu0 }
0x13ed   : > { %v2204_v17 = vpop.f32.mrb[34].mxu0 }
0x13ee   : > { %v3641_v18 = vpop.f32.mrb[35].mxu0 }
0x13fb   : > { %v2322_v19 = vpop.f32.mrb[36].mxu0 }
0x13fc   : > { %v3652_v20 = vpop.f32.mrb[37].mxu0 }
0x13fd   : > { %v2325_v21 = vpop.f32.mrb[38].mxu0  ;;  %v3851_v20 = vld [vmem:[%s4751_s7 + $0x30] sm:$0xff]  }
0x13fe   : > { %v3798_v23 = vpack.i.bf16 %v2325_v21, %v2322_v19  ;;  %v3653_v24 = vpop.f32.mrb[39].mxu0  ;;  %3687 = vmatpush3.bf16.msra.mxu0 %v3851_v20  ;;  %v3852_v21 = vld [vmem:[%s4751_s7 + $0x38] sm:$0xff]  }
0x13ff   : > { %3688 = vmatprep.subr.bf16.mxu0 %v3989_v29 }
0x1400   : > { %3799 = vrot.lane.b32.xlu0 %v3798_v23, %s4803_s29 }
0x1402   : > { %3689 = vmatpush3.bf16.msra.mxu0 %v3852_v21 }
0x1403   : > { %v2442_v25 = vpop.f32.mrb[40].mxu0  ;;  %3690 = vmatprep.subr.bf16.mxu0 %v3989_v29 }
0x1404   : > { %v3664_v28 = vpop.f32.mrb[41].mxu0 }
0x1405   : > { %v2445_v33 = vpop.f32.mrb[42].mxu0 }
0x1406   : > { %v3803_v34 = vpack.i.bf16 %v2445_v33, %v2442_v25  ;;  %v3665_v35 = vpop.f32.mrb[43].mxu0  ;;  %3691 = vmatpush3.bf16.msra.mxu0 %v3853_v22 }
0x1407   : > { %3692 = vmatprep.subr.bf16.mxu0 %v3989_v29  ;;  %v3855_v35 = vld [vmem:[%s4751_s7 + $0x50] sm:$0xff]  }
0x1408   : > { %3804 = vrot.lane.b32.xlu1 %v3803_v34, %s4804_s30  ;;  %v3854_v34 = vld [vmem:[%s4751_s7 + $0x48] sm:$0xff]  }
0x140a   : > { %3693 = vmatpush3.bf16.msra.mxu0 %v3854_v34 }
0x140b   : > { %v2562_v36 = vpop.f32.mrb[44].mxu0  ;;  %3694 = vmatprep.subr.bf16.mxu0 %v3989_v29 }
0x140c   : > { %v3676_v37 = vpop.f32.mrb[45].mxu0 }
0x140d   : > { %v2565_v39 = vpop.f32.mrb[46].mxu0  ;;  %v3362_v37 = vld [vmem:[%s4757_s13 + $0x1] ss:$0 sm:$0xff] }
0x140e   : > { %v3808_v41 = vpack.i.bf16 %v2565_v39, %v2562_v36  ;;  %v3677_v43 = vpop.f32.mrb[47].mxu0  ;;  %3695 = vmatpush3.bf16.msra.mxu0 %v3855_v35 }
0x140f   : > { %v3363_v43 = vld [vmem:[%s4758_s14 + $0x1] ss:$0 sm:$0xff]  ;;  %3696 = vmatprep.subr.bf16.mxu0 %v3989_v29 }
0x1410   : > { %3809 = vrot.lane.b32.xlu0 %v3808_v41, %s4805_s28 }
0x1472   : > { %v3800_v44 = vpop.permute.xlu0 %3799 }
0x1473   : > { %v3802_v48 = vunpack.i.h.bf16 %v3800_v44  ;;  %v3801_v58 = vunpack.i.l.bf16 %v3800_v44 }
0x1475   : > { %v2594_v52 = vsel %vm720_vm5, %v2204_v17, %v3802_v48  ;;  %v2593_v60 = vsel %vm720_vm5, %v2201_v15, %v3801_v58 }
0x147a   : > { %v3805_v46 = vpop.permute.xlu1 %3804 }
0x147b   : > { %v3807_v49 = vunpack.i.h.bf16 %v3805_v46  ;;  %v3806_v50 = vunpack.i.l.bf16 %v3805_v46 }
0x147d   : > { %v2596_v54 = vsel %vm965_vm11, %v2594_v52, %v3807_v49  ;;  %v2595_v0 = vsel %vm965_vm11, %v2593_v60, %v3806_v50  ;;  %v3856_v49 = vld [vmem:[%s4751_s7 + $0x58] sm:$0xff]  }
0x147e   : > { %3697 = vmatpush3.bf16.msra.mxu0 %v3856_v49 }
0x147f   : > { %3726 = vmatprep.subr.bf16.mxu0 %v3989_v29 }
0x1482   : > { %v3810_v51 = vpop.permute.xlu0 %3809 }
0x1483   : > { %v3812_v53 = vunpack.i.h.bf16 %v3810_v51  ;;  %v3811_v63 = vunpack.i.l.bf16 %v3810_v51 }
0x1485   : > { %v2598_v40 = vsel %vm1426_vm12, %v2596_v54, %v3812_v53  ;;  %v2597_v55 = vsel %vm1426_vm12, %v2595_v0, %v3811_v63 }
0x1486   : > { %v2599_v56 = vpack.c.bf16 %v2598_v40, %v2597_v55 }
0x1488   : > { %3683 = vmatmul.mubr.msk.bf16.vlgmr.msra.gmra.mrb[44].mxu1 %vm827_vm7, %v2599_v56 }
0x1489   : > { %3710 = vmatprep.mubr.msk.bf16.mxu1 %vm3990_vm2, %v3989_v29 }
0x155b   : > { %v2662_v57 = vpop.f32.mrb[44].mxu1 }
0x155c   : > { %v2663_v59 = vadd.f32 %v3356_v42, %v2662_v57  ;;  %v3684_v61 = vpop.f32.mrb[45].mxu1 }
0x155d   : > { %v2665_v1 = vpop.f32.mrb[46].mxu1 }
0x155e   : > { %v2666_v2 = vadd.f32 %v3356_v42, %v2665_v1  ;;  %v3685_v3 = vpop.f32.mrb[47].mxu1  ;;  %v2669_v4 = vadd.f32 %v2663_v59, %v4468_v47 }
0x1560   : > { %v2675_v5 = vsel %vm827_vm7, %v2669_v4, 0.0  ;;  %v2670_v6 = vadd.f32 %v2666_v2, %v4471_v27 }
0x1561   : > { %2676 = vadd.xlane.f32.xlu1 %v2675_v5 }
0x1562   : > { %v2678_v7 = vsel %vm827_vm7, %v2670_v6, 0.0 }
0x1563   : > { %2679 = vadd.xlane.f32.xlu0 %v2678_v7 }
0x15ee   : > { %v2677_v8 = vpop.xlane.xlu1 %2676 }
0x15ef   : > { %v2681_v13 = vmul.f32 0.03125, %v2677_v8 }
0x15f0   : > { %v2680_v10 = vpop.xlane.xlu0 %2679 }
0x15f1   : > { %v2683_v12 = vsub.f32 %v2669_v4, %v2681_v13  ;;  %v2682_v14 = vmul.f32 0.03125, %v2680_v10  ;;  %v3859_v13 = vld [vmem:[%s4753_s9 + $0x30] sm:$0xff]   ;;  %v3860_v10 = vld [vmem:[%s4753_s9 + $0x38] sm:$0xff]  }
0x15f3   : > { %v2684_v15 = vsub.f32 %v2670_v6, %v2682_v14  ;;  %v2685_v16 = vmul.f32 %v2683_v12, %v2683_v12 }
0x15f5   : > { %v2687_v17 = vsel %vm827_vm7, %v2685_v16, 0.0  ;;  %v2686_v18 = vmul.f32 %v2684_v15, %v2684_v15 }
0x15f6   : > { %2688 = vadd.xlane.f32.xlu0 %v2687_v17 }
0x15f7   : > { %v2690_v19 = vsel %vm827_vm7, %v2686_v18, 0.0 }
0x15f8   : > { %2691 = vadd.xlane.f32.xlu1 %v2690_v19 }
0x1683   : > { %v2689_v23 = vpop.xlane.xlu0 %2688 }
0x1684   : > { %v2693_v24 = vmul.f32 0.03125, %v2689_v23 }
0x1685   : > { %v2692_v25 = vpop.xlane.xlu1 %2691 }
0x1686   : > { %v2695_v28 = vadd.f32 1e-05, %v2693_v24  ;;  %v2694_v30 = vmul.f32 0.03125, %v2692_v25 }
0x1688   : > { %3957 = vrsqrt.f32 %v2695_v28  ;;  %v2696_v33 = vadd.f32 1e-05, %v2694_v30 }
0x168a   : > { %3959 = vrsqrt.f32 %v2696_v33 }
0x1692   : > { %v3958_v36 = vpop.eup %3957 }
0x1693   : > { %v2699_v39 = vmul.f32 %v3958_v36, %v2683_v12  ;;  %v3377_v12 = vld [vmem:[%s4752_s8 + $0x1] ss:$0 sm:$0xff] }
0x1694   : > { %v3960_v41 = vpop.eup %3959  ;;  %v3861_v36 = vld [vmem:[%s4755_s11 + $0x20] sm:$0xff]  }
0x1695   : > { %v2707_v44 = vmul.f32 %v3362_v37, %v2699_v39  ;;  %v2700_v46 = vmul.f32 %v3960_v41, %v2684_v15  ;;  %v3863_v39 = vld [vmem:[%s4755_s11 + $0x30] sm:$0xff]   ;;  %v3864_v41 = vld [vmem:[%s4755_s11 + $0x38] sm:$0xff]  }
0x1697   : > { %v2708_v48 = vmul.f32 %v3362_v37, %v2700_v46  ;;  %v4611_v58 = vadd.f32 %v3363_v43, %v2707_v44  ;;  %v3862_v37 = vld [vmem:[%s4755_s11 + $0x28] sm:$0xff]  }
0x1699   : > { %v4616_v50 = vadd.f32 %v3363_v43, %v2708_v48  ;;  %v2717_v52 = vrot.slane %v4611_v58, 7  ;;  %v2723_v55 = vrot.slane %v4611_v58, 6  ;;  %v3394_v43 = vld [vmem:[%s4754_s10 + $0x1] ss:$0 sm:$0xff] }
0x169b   : > { %v3818_v51 = vpack.i.bf16 %v4616_v50, %v4611_v58  ;;  %v2718_v60 = vrot.slane %v4616_v50, 7  ;;  %v2724_v40 = vrot.slane %v4616_v50, 6 }
0x169d   : > { %3819 = vrot.lane.b32.xlu1 %v3818_v51, %s3998_s4  ;;  %v2720_v53 = vsel %vm694_vm4, %v2718_v60, %v2717_v52  ;;  %v2719_v54 = vsel %vm694_vm4, %v2717_v52, %v2718_v60  ;;  %v2726_v56 = vsel %vm1552_vm15, %v2724_v40, %v2723_v55  ;;  %v2725_v3 = vsel %vm1552_vm15, %v2723_v55, %v2724_v40 }
0x169e   : > { %v2721_v63 = vmul.f32 %v4347_v62, %v2720_v53  ;;  %v2727_v59 = vmul.f32 %v4363_v9, %v2726_v56  ;;  %v3857_v9 = vld [vmem:[%s4753_s9 + $0x20] sm:$0xff]   ;;  %vm3213_vm4 = vcmp.eq.f32.partialorder %v4139_v26, 0.0 }
0x169f   : > { %3703 = vmatpush3.bf16.msra.mxu1 %v3857_v9  ;;  %v3409_v56 = vld [vmem:[%s4756_s12 + $0x1] ss:$0 sm:$0xff] }
0x16a0   : > { %v3813_v0 = vpack.i.bf16 %v2719_v54, %v2721_v63  ;;  %3704 = vmatprep.subr.bf16.mxu1 %v3989_v29 }
0x16a2   : > { %3814 = vrot.lane.b32.xlu0 %v3813_v0, %s4806_s27 }
0x16a3   : > { %3705 = vmatpush3.bf16.msra.mxu1 %v3858_v31 }
0x16a4   : > { %3706 = vmatprep.subr.bf16.mxu1 %v3989_v29 }
0x16a7   : > { %3707 = vmatpush3.bf16.msra.mxu1 %v3859_v13 }
0x16a8   : > { %3708 = vmatprep.subr.bf16.mxu1 %v3989_v29 }
0x16ab   : > { %3709 = vmatpush3.bf16.msra.mxu1 %v3860_v10 }
0x16ac   : > { %3714 = vmatprep.subr.bf16.mxu1 %v3989_v29 }
0x170f   : > { %v3820_v42 = vpop.permute.xlu1 %3819 }
0x1710   : > { %v3822_v62 = vunpack.i.h.bf16 %v3820_v42  ;;  %v3821_v2 = vunpack.i.l.bf16 %v3820_v42 }
0x1714   : > { %v3815_v57 = vpop.permute.xlu0 %3814 }
0x1715   : > { %v3817_v61 = vunpack.i.h.bf16 %v3815_v57  ;;  %v3816_v1 = vunpack.i.l.bf16 %v3815_v57 }
0x1717   : > { %v2746_v4 = vsel %vm827_vm7, %v2725_v3, %v3817_v61  ;;  %v2745_v5 = vsel %vm827_vm7, %v2727_v59, %v3816_v1 }
0x1718   : > { %v2748_v6 = vsel %vm1575_vm1, %v2746_v4, %v3822_v62  ;;  %v2747_v7 = vsel %vm1575_vm1, %v2745_v5, %v3821_v2 }
0x1719   : > { %v2749_v8 = vpack.c.bf16 %v2748_v6, %v2747_v7 }
0x171b   : > { %3699 = vmatmul.mubr.msk.bf16.vlgmr.msra.gmra.mrb[48].mxu0 %vm1634_vm3, %v2749_v8 }
0x171c   : > { %3730 = vmatprep.mubr.msk.bf16.mxu0 %vm3990_vm2, %v3989_v29 }
0x17ee   : > { %v2844_v14 = vpop.f32.mrb[48].mxu0 }
0x17ef   : > { %v2845_v15 = vadd.f32 %v3377_v12, %v2844_v14  ;;  %v3700_v16 = vpop.f32.mrb[49].mxu0 }
0x17f0   : > { %v2847_v17 = vpop.f32.mrb[50].mxu0 }
0x17f1   : > { %v2853_v18 = vmul.f32 0.70710677, %v2845_v15  ;;  %v2848_v19 = vadd.f32 %v3377_v12, %v2847_v17  ;;  %v3701_v20 = vpop.f32.mrb[51].mxu0  ;;  %v2851_v25 = vmul.f32 0.5, %v2845_v15 }
0x17f3   : > { %3961 = verf.f32 %v2853_v18  ;;  %v2854_v21 = vmul.f32 0.70710677, %v2848_v19  ;;  %v2852_v28 = vmul.f32 0.5, %v2848_v19 }
0x17f5   : > { %3963 = verf.f32 %v2854_v21 }
0x17fd   : > { %v3962_v22 = vpop.eup %3961 }
0x17fe   : > { %v2857_v23 = vadd.f32 1.0, %v3962_v22 }
0x17ff   : > { %v3964_v24 = vpop.eup %3963 }
0x1800   : > { %v2858_v30 = vadd.f32 1.0, %v3964_v24  ;;  %v2859_v33 = vmul.f32 %v2857_v23, %v2851_v25 }
0x1802   : > { %v2860_v34 = vmul.f32 %v2858_v30, %v2852_v28 }
0x1804   : > { %v2861_v35 = vpack.c.bf16 %v2860_v34, %v2859_v33 }
0x1806   : > { %3711 = vmatmul.mubr.msk.bf16.vlgmr.msra.gmra.mrb[48].mxu1 %vm1575_vm1, %v2861_v35 }
0x1807   : > { %3722 = vmatprep.mubr.msk.bf16.mxu1 %vm3990_vm2, %v3989_v29  ;;  %3715 = vmatpush3.bf16.msra.mxu1 %v3861_v36  ;;  %vm3211_vm2 = vcmp.eq.f32.partialorder %v4139_v26, inf }
0x1808   : > { %3716 = vmatprep.subr.bf16.mxu1 %v3989_v29 }
0x180b   : > { %3717 = vmatpush3.bf16.msra.mxu1 %v3862_v37 }
0x180c   : > { %3718 = vmatprep.subr.bf16.mxu1 %v3989_v29 }
0x180f   : > { %3719 = vmatpush3.bf16.msra.mxu1 %v3863_v39 }
0x1810   : > { %3720 = vmatprep.subr.bf16.mxu1 %v3989_v29 }
0x1813   : > { %3721 = vmatpush3.bf16.msra.mxu1 %v3864_v41 }
0x18d9   : > { %v2940_v44 = vpop.f32.mrb[48].mxu1 }
0x18da   : > { %v3712_v46 = vpop.f32.mrb[49].mxu1  ;;  %v2941_v49 = vadd.f32 %v3394_v43, %v2940_v44 }
0x18db   : > { %v2943_v48 = vpop.f32.mrb[50].mxu1  ;;  %v3420_v46 = vld [vmem:[%s4760_s16 + $0x1] ss:$0 sm:$0xff] }
0x18dc   : > { %v2944_v51 = vadd.f32 %v3394_v43, %v2943_v48  ;;  %v3713_v52 = vpop.f32.mrb[51].mxu1  ;;  %v3419_v43 = vld [vmem:[%s4759_s15 + $0x1] ss:$0 sm:$0xff] }
0x18de   : > { %v3823_v60 = vpack.i.bf16 %v2944_v51, %v2941_v49 }
0x18e0   : > { %3824 = vrot.lane.b32.xlu1 %v3823_v60, %s4806_s27 }
0x1952   : > { %v3825_v53 = vpop.permute.xlu1 %3824 }
0x1953   : > { %v3827_v63 = vunpack.i.h.bf16 %v3825_v53  ;;  %v3826_v54 = vunpack.i.l.bf16 %v3825_v53 }
0x1955   : > { %v2956_v0 = vsel %vm827_vm7, %v4616_v50, %v3827_v63  ;;  %v2955_v40 = vsel %vm827_vm7, %v4611_v58, %v3826_v54 }
0x1956   : > { %v2957_v55 = vpack.c.bf16 %v2956_v0, %v2955_v40 }
0x1958   : > { %3723 = vmatmul.mubr.msk.bf16.vlgmr.msra.gmra.mrb[52].mxu1 %vm1575_vm1, %v2957_v55 }
0x1a2b   : > { %v3036_v42 = vpop.f32.mrb[52].mxu1 }
0x1a2c   : > { %v3037_v57 = vadd.f32 %v3409_v56, %v3036_v42  ;;  %v3724_v59 = vpop.f32.mrb[53].mxu1 }
0x1a2d   : > { %v3039_v61 = vpop.f32.mrb[54].mxu1 }
0x1a2e   : > { %v3415_v1 = vmul.f32 -1.442695, %v3037_v57  ;;  %v3040_v62 = vadd.f32 %v3409_v56, %v3039_v61  ;;  %v3725_v2 = vpop.f32.mrb[55].mxu1 }
0x1a2f   : > { %v3865_v2 = vld [vmem:[%s4763_s19] sm:$0xff]  }
0x1a30   : > { %3965 = vpow2.f32 %v3415_v1  ;;  %v3416_v3 = vmul.f32 -1.442695, %v3040_v62  ;;  %3727 = vmatpush3.bf16.msra.mxu0 %v3865_v2 }
0x1a31   : > { %3728 = vmatprep.subr.bf16.mxu0 %v3989_v29 }
0x1a32   : > { %3967 = vpow2.f32 %v3416_v3  ;;  %v3866_v3 = vld [vmem:[%s4763_s19 + $0x8] sm:$0xff]  }
0x1a34   : > { %3729 = vmatpush3.bf16.msra.mxu0 %v3866_v3 }
0x1a3a   : > { %v3966_v4 = vpop.eup %3965 }
0x1a3b   : > { %v3049_v5 = vadd.f32 1.0, %v3966_v4 }
0x1a3c   : > { %v3968_v6 = vpop.eup %3967 }
0x1a3d   : > { %3969 = vrcp.f32 %v3049_v5  ;;  %v3050_v7 = vadd.f32 1.0, %v3968_v6 }
0x1a3f   : > { %3971 = vrcp.f32 %v3050_v7 }
0x1a47   : > { %v3970_v8 = vpop.eup %3969 }
0x1a48   : > { %v3057_v9 = vsub.f32 1.0, %v3970_v8  ;;  %v3055_v13 = vmul.f32 %v3970_v8, %v4611_v58 }
0x1a49   : > { %v3972_v31 = vpop.eup %3971 }
0x1a4a   : > { %v3059_v10 = vmul.f32 %v3057_v9, %v2941_v49  ;;  %v3058_v12 = vsub.f32 1.0, %v3972_v31  ;;  %v3056_v15 = vmul.f32 %v3972_v31, %v4616_v50 }
0x1a4c   : > { %v3061_v14 = vadd.f32 %v3059_v10, %v3055_v13  ;;  %v3060_v16 = vmul.f32 %v3058_v12, %v2944_v51 }
0x1a4e   : > { %v3063_v17 = vadd.f32 %v3061_v14, %v4468_v47  ;;  %v3062_v18 = vadd.f32 %v3060_v16, %v3056_v15 }
0x1a50   : > { %v3069_v19 = vsel %vm827_vm7, %v3063_v17, 0.0  ;;  %v3064_v20 = vadd.f32 %v3062_v18, %v4471_v27  ;;  %v3210_v18 = vmul.f32 %v4151_v32, %v4139_v26 }
0x1a51   : > { %3070 = vadd.xlane.f32.xlu0 %v3069_v19  ;;  %v3214_v19 = vand.u32 2147483648, %v4139_v26 }
0x1a52   : > { %v3072_v21 = vsel %vm827_vm7, %v3064_v20, 0.0 }
0x1a53   : > { %3073 = vadd.xlane.f32.xlu1 %v3072_v21 }
0x1ade   : > { %v3071_v22 = vpop.xlane.xlu0 %3070 }
0x1adf   : > { %v3075_v23 = vmul.f32 0.03125, %v3071_v22 }
0x1ae0   : > { %v3074_v58 = vpop.xlane.xlu1 %3073 }
0x1ae1   : > { %v3077_v24 = vsub.f32 %v3063_v17, %v3075_v23  ;;  %v3076_v25 = vmul.f32 0.03125, %v3074_v58 }
0x1ae3   : > { %v3078_v28 = vsub.f32 %v3064_v20, %v3076_v25  ;;  %v3079_v30 = vmul.f32 %v3077_v24, %v3077_v24  ;;  %v3212_v20 = vsel %vm3211_vm2, %v4139_v26, %v3210_v18 }
0x1ae4   : > { %v3215_v21 = vsel %vm3213_vm4, %v3214_v19, %v3212_v20 }
0x1ae5   : > { %v3081_v50 = vsel %vm827_vm7, %v3079_v30, 0.0  ;;  %v3080_v33 = vmul.f32 %v3078_v28, %v3078_v28 }
0x1ae6   : > { %3082 = vadd.xlane.f32.xlu0 %v3081_v50 }
0x1ae7   : > { %v3084_v47 = vsel %vm827_vm7, %v3080_v33, 0.0 }
0x1aea   : > { %3085 = vadd.xlane.f32.xlu0 %v3084_v47 }
0x1b73   : > { %v3083_v34 = vpop.xlane.xlu0 %3082 }
0x1b74   : > { %v3087_v27 = vmul.f32 0.03125, %v3083_v34 }
0x1b76   : > { %v3089_v35 = vadd.f32 1e-05, %v3087_v27 }
0x1b77   : > { %v3086_v36 = vpop.xlane.xlu0 %3085 }
0x1b78   : > { %3973 = vrsqrt.f32 %v3089_v35  ;;  %v3088_v37 = vmul.f32 0.03125, %v3086_v36 }
0x1b7a   : > { %v3090_v39 = vadd.f32 1e-05, %v3088_v37 }
0x1b7c   : > { %3975 = vrsqrt.f32 %v3090_v39 }
0x1b82   : > { %v3974_v41 = vpop.eup %3973 }
0x1b83   : > { %v3093_v44 = vmul.f32 %v3974_v41, %v3077_v24 }
0x1b85   : > { %v3101_v48 = vmul.f32 %v3419_v43, %v3093_v44 }
0x1b86   : > { %v3976_v49 = vpop.eup %3975 }
0x1b87   : > { %v3109_v51 = vadd.f32 %v3420_v46, %v3101_v48  ;;  %v3094_v52 = vmul.f32 %v3976_v49, %v3078_v28 }
0x1b89   : > { %v3111_v60 = vsel %vm827_vm7, %v3109_v51, 0.0  ;;  %v3102_v53 = vmul.f32 %v3419_v43, %v3094_v52 }
0x1b8a   : > { %3112 = vadd.xlane.f32.xlu1 %v3111_v60 }
0x1b8b   : > { %v3110_v63 = vadd.f32 %v3420_v46, %v3102_v53 }
0x1b8d   : > { %v3114_v54 = vsel %vm827_vm7, %v3110_v63, 0.0 }
0x1b8e   : > { %3115 = vadd.xlane.f32.xlu0 %v3114_v54 }
0x1c17   : > { %v3113_v0 = vpop.xlane.xlu1 %3112 }
0x1c18   : > { %v3117_v40 = vmul.f32 0.03125, %v3113_v0 }
0x1c1a   : > { %v3119_v55 = vsub.f32 %v3109_v51, %v3117_v40 }
0x1c1b   : > { %v3116_v56 = vpop.xlane.xlu0 %3115 }
0x1c1c   : > { %v3118_v42 = vmul.f32 0.03125, %v3116_v56  ;;  %v3121_v57 = vmul.f32 %v3119_v55, %v3119_v55 }
0x1c1e   : > { %v3120_v59 = vsub.f32 %v3110_v63, %v3118_v42  ;;  %v3123_v61 = vsel %vm827_vm7, %v3121_v57, 0.0 }
0x1c1f   : > { %3124 = vadd.xlane.f32.xlu1 %v3123_v61 }
0x1c20   : > { %v3122_v1 = vmul.f32 %v3120_v59, %v3120_v59 }
0x1c22   : > { %v3126_v62 = vsel %vm827_vm7, %v3122_v1, 0.0 }
0x1c23   : > { %3127 = vadd.xlane.f32.xlu0 %v3126_v62 }
0x1cac   : > { %v3125_v4 = vpop.xlane.xlu1 %3124 }
0x1cad   : > { %v3129_v5 = vmul.f32 0.03125, %v3125_v4 }
0x1caf   : > { %v3131_v6 = vadd.f32 1e-05, %v3129_v5 }
0x1cb0   : > { %v3128_v7 = vpop.xlane.xlu0 %3127 }
0x1cb1   : > { %3977 = vrsqrt.f32 %v3131_v6  ;;  %v3130_v8 = vmul.f32 0.03125, %v3128_v7 }
0x1cb3   : > { %v3132_v9 = vadd.f32 1e-05, %v3130_v8 }
0x1cb5   : > { %3979 = vrsqrt.f32 %v3132_v9 }
0x1cbb   : > { %v3978_v31 = vpop.eup %3977 }
0x1cbc   : > { %v3135_v13 = vmul.f32 %v3978_v31, %v3119_v55 }
0x1cbe   : > { %v3137_v12 = vmul.f32 %v4458_v38, %v3135_v13 }
0x1cbf   : > { %v3980_v10 = vpop.eup %3979 }
0x1cc0   : > { %v3136_v14 = vmul.f32 %v3980_v10, %v3120_v59  ;;  %v3139_v16 = vadd.f32 %v4464_v45, %v3137_v12 }
0x1cc2   : > { %v3138_v15 = vmul.f32 %v4458_v38, %v3136_v14  ;;  %v3421_v38 = vld [vmem:[%s4764_s20] ss:$0 sm:$0xff] }
0x1cc4   : > { %v3140_v29 = vadd.f32 %v4464_v45, %v3138_v15 }
0x1cc6   : > { %v3141_v17 = vpack.c.bf16 %v3140_v29, %v3139_v16 }
0x1cc8   : > { %3731 = vmatmul.mubr.msk.bf16.vlgmr.msra.gmra.mrb[52].mxu0 %vm827_vm7, %v3141_v17 }
0x1d9b   : > { %v3202_v45 = vpop.f32.mrb[52].mxu0 }
0x1d9c   : > { %v3203_v22 = vadd.f32 %v3421_v38, %v3202_v45  ;;  %v3732_v23 = vpop.f32.mrb[53].mxu0 }
0x1d9d   : > { %v3205_v58 = vpop.f32.mrb[54].mxu0 }
0x1d9e   : > { %v3216_v24 = vmul.f32 %v3215_v21, %v3203_v22  ;;  %v3206_v25 = vadd.f32 %v3421_v38, %v3205_v58  ;;  %v3733_v32 = vpop.f32.mrb[55].mxu0 }
0x1da0   : > { %v3218_v28 = vadd.f32 %v3216_v24, %v4133_v11  ;;  %v3217_v26 = vmul.f32 %v3215_v21, %v3206_v25 }
0x1da2   : > { %3220 = vst.msk [vmem:[%s656_s5] sm:$0xff] %vm660_vm0, %v3218_v28  ;;  %v3219_v30 = vadd.f32 %v3217_v26, %v4133_v11 }
0x1da4   : > { %3221 = vst.msk [vmem:[%s656_s5 + $0x8] sm:$0xff] %vm660_vm0, %v3219_v30 }
0x1da5 PF: > { %s31_s2 = sadd.s32 1, %s3987_s2  }
0x1da6   : > { %p28_p4 = scmp.ge.s32.totalorder %s31_s2, 4  }
0x1da8   :  { %30 = sbr.rel (!%p28_p4) target bundleno = 7 (0x7), region = 148 }

</bundles_post_ra>
